<compile_context>
chip_gen: v7x
topology: tpu7x:2x2x1
jax: 0.10.0
libtpu: 0.0.40
codegen_flags: <defaults>
</compile_context>

<pallas_src>
import functools
import math

import jax
import jax.numpy as jnp
from jax.experimental import pallas as pl
from jax.experimental.pallas import tpu as pltpu

# ---------------- model hyper-parameters (small, consistent with the module) ----------
DIM_MODEL = 32
HEADS = 4
SEQ_LEN = 16
TOTAL_IN = 3
D_K = DIM_MODEL // HEADS
NEG_INF = -1.0e30
LN_EPS = 1e-5


# ================================ in-kernel helpers ===================================

def _layernorm(x, g, b):
    """LayerNorm over last dim. x: (M, D); g, b: (1, D)."""
    mu = jnp.mean(x, axis=-1, keepdims=True)
    xc = x - mu
    var = jnp.mean(xc * xc, axis=-1, keepdims=True)
    return xc * jax.lax.rsqrt(var + LN_EPS) * g + b


def _masked_mha(q2d, k2d, v2d, wo, bo, neg_mask, B, S, heads, dk):
    """Multi-head attention over all (batch, head) pairs in one shot.

    q2d/k2d/v2d: (B*S, D) already-projected Q/K/V.
    wo: (D, D) output-projection weight (row block j belongs to head j), bo: (1, D).
    neg_mask: (S, S) additive causal mask (0 where attending is allowed, -1e30 otherwise).
    Each head's context is pushed straight through the matching rows of wo, avoiding a
    lane-dim concat of the heads.
    """
    scale = 1.0 / math.sqrt(dk)
    acc = None
    for j in range(heads):                      # unrolled: HEADS = 4
        sl = slice(j * dk, (j + 1) * dk)
        qh = q2d[:, sl].reshape(B, S, dk)
        kh = k2d[:, sl].reshape(B, S, dk)
        vh = v2d[:, sl].reshape(B, S, dk)
        s = jnp.einsum("bqd,bkd->bqk", qh, kh,
                       preferred_element_type=jnp.float32) * scale
        s = s + neg_mask[None, :, :]
        m = jnp.max(s, axis=-1, keepdims=True)
        p = jnp.exp(s - m)
        p = p * pl.reciprocal(jnp.sum(p, axis=-1, keepdims=True), approx=True)
        oh = jnp.einsum("bqk,bkd->bqd", p, vh,
                        preferred_element_type=jnp.float32)       # (B, S, dk)
        contrib = jnp.dot(oh.reshape(B * S, dk), wo[sl, :],
                          preferred_element_type=jnp.float32)      # (B*S, D)
        acc = contrib if acc is None else acc + contrib
    return acc + bo


# ================================ fused decoder kernel ================================

def _decoder_block_kernel(x_ref, en_ref,
                          ln1g_ref, ln1b_ref, ln2g_ref, ln2b_ref, ln3g_ref, ln3b_ref,
                          wqkv1_ref, bqkv1_ref, wo1_ref, bo1_ref,
                          wq2_ref, bq2_ref, wkv2_ref, bkv2_ref, wo2_ref, bo2_ref,
                          ff1w_ref, ff1b_ref, ff2w_ref, ff2b_ref,
                          o_ref, *, B, S):
    D = x_ref.shape[-1]
    heads, dk = HEADS, D // HEADS

    # Causal mask built in-kernel with 2-D iota (no mask DMA). True=attend allowed.
    row = jax.lax.broadcasted_iota(jnp.int32, (S, S), 0)
    col = jax.lax.broadcasted_iota(jnp.int32, (S, S), 1)
    neg_mask = jnp.where(col <= row, 0.0, NEG_INF).astype(jnp.float32)

    x = x_ref[...]      # (B*S, D) embedded input + positional embedding
    en = en_ref[...]    # (B*S, D) encoder output

    # ---- M1 = SkipConct(Multihead(LayerNorm1(x); x; x)) -- masked self-attention ----
    x_ln = _layernorm(x, ln1g_ref[...], ln1b_ref[...])
    qkv = jnp.dot(x_ln, wqkv1_ref[...],
                  preferred_element_type=jnp.float32) + bqkv1_ref[...]     # (B*S, 3D)
    att1 = _masked_mha(qkv[:, 0:D], qkv[:, D:2 * D], qkv[:, 2 * D:3 * D],
                       wo1_ref[...], bo1_ref[...], neg_mask, B, S, heads, dk)
    out1 = x_ln + att1                       # dropout = identity (eval)

    # ---- M2 = SkipConct(Multihead(M1; LayerNorm2(en_out); LayerNorm2(en_out))) ------
    en_ln = _layernorm(en, ln2g_ref[...], ln2b_ref[...])
    q2 = jnp.dot(out1, wq2_ref[...],
                 preferred_element_type=jnp.float32) + bq2_ref[...]        # (B*S, D)
    kv2 = jnp.dot(en_ln, wkv2_ref[...],
                  preferred_element_type=jnp.float32) + bkv2_ref[...]      # (B*S, 2D)
    att2 = _masked_mha(q2, kv2[:, 0:D], kv2[:, D:2 * D],
                       wo2_ref[...], bo2_ref[...], neg_mask, B, S, heads, dk)
    out2 = att2 + out1                       # dropout = identity (eval)

    # ---- L = SkipConct(FFN(LayerNorm3(M2))) ------------------------------------------
    out2_ln = _layernorm(out2, ln3g_ref[...], ln3b_ref[...])
    ff = jnp.dot(out2_ln, ff1w_ref[...],
                 preferred_element_type=jnp.float32) + ff1b_ref[...]
    ff = jnp.maximum(ff, 0.0)
    ff = jnp.dot(ff, ff2w_ref[...],
                 preferred_element_type=jnp.float32) + ff2b_ref[...]
    o_ref[...] = (ff + out2_ln).astype(o_ref.dtype)   # dropout = identity (eval)


# ================================ host-side wrapper ===================================

def _vspec(shape):
    zeros = (0,) * len(shape)
    return pl.BlockSpec(shape, lambda i, _z=zeros: _z)


def decoder_block_forward(params, in_in, en_out, first_block=True):
    """Decoder_block.forward. in_in: (B,S) int ids (first_block) or (B,S,D) floats."""
    if first_block:
        # TODO(synk): nn.Embedding index gather has no clean Pallas equivalent for
        # arbitrary indices; done as plain-JAX glue (a few KB) before the fused kernel.
        x = params["embd_in"][in_in]                       # (B, S, D)
    else:
        x = in_in.astype(jnp.float32)
    B, S, D = x.shape
    pos = params["embd_pos"][jnp.arange(S)]                # get_pos + embd_pos: (S, D)
    x = (x + pos[None, :, :]).astype(jnp.float32)

    x2d = x.reshape(B * S, D)
    en2d = en_out.astype(jnp.float32).reshape(B * S, D)

    operands = (
        x2d, en2d,
        params["ln1_g"], params["ln1_b"],
        params["ln2_g"], params["ln2_b"],
        params["ln3_g"], params["ln3_b"],
        params["wqkv1"], params["bqkv1"], params["wo1"], params["bo1"],
        params["wq2"], params["bq2"], params["wkv2"], params["bkv2"],
        params["wo2"], params["bo2"],
        params["ff1_w"], params["ff1_b"], params["ff2_w"], params["ff2_b"],
    )

    out = pl.pallas_call(
        functools.partial(_decoder_block_kernel, B=B, S=S),
        out_shape=jax.ShapeDtypeStruct((B * S, D), jnp.float32),
        grid=(1,),
        in_specs=[_vspec(op.shape) for op in operands],
        out_specs=_vspec((B * S, D)),
        compiler_params=pltpu.CompilerParams(dimension_semantics=("arbitrary",)),
    )(*operands)
    return out.reshape(B, S, D)


# ================================ parameter init ======================================

def init_params(key):
    def nrm(k, shape, scale=0.1):
        return scale * jax.random.normal(k, shape, dtype=jnp.float32)

    D = DIM_MODEL
    ks = iter(jax.random.split(key, 16))
    p = {}
    p["embd_in"] = nrm(next(ks), (TOTAL_IN, D))
    p["embd_pos"] = nrm(next(ks), (SEQ_LEN, D))

    for i in (1, 2, 3):
        p[f"ln{i}_g"] = jnp.ones((1, D), jnp.float32)
        p[f"ln{i}_b"] = jnp.zeros((1, D), jnp.float32)

    # self-attention (multi_de1): combined QKV projection + output projection
    p["wqkv1"] = nrm(next(ks), (D, 3 * D))
    p["bqkv1"] = nrm(next(ks), (1, 3 * D), 0.01)
    p["wo1"] = nrm(next(ks), (D, D))
    p["bo1"] = nrm(next(ks), (1, D), 0.01)

    # cross-attention (multi_de2): Q projection + combined KV projection + output proj
    p["wq2"] = nrm(next(ks), (D, D))
    p["bq2"] = nrm(next(ks), (1, D), 0.01)
    p["wkv2"] = nrm(next(ks), (D, 2 * D))
    p["bkv2"] = nrm(next(ks), (1, 2 * D), 0.01)
    p["wo2"] = nrm(next(ks), (D, D))
    p["bo2"] = nrm(next(ks), (1, D), 0.01)

    # Feed_Forward_block
    p["ff1_w"] = nrm(next(ks), (D, D))
    p["ff1_b"] = nrm(next(ks), (1, D), 0.01)
    p["ff2_w"] = nrm(next(ks), (D, D))
    p["ff2_b"] = nrm(next(ks), (1, D), 0.01)
    return p


# ======================================================================================

if __name__ == "__main__":
    key = jax.random.PRNGKey(0)
    k_params, k_in, k_en = jax.random.split(key, 3)
    params = init_params(k_params)

    B, S = 2, SEQ_LEN
    in_in = jax.random.randint(k_in, (B, S), 0, TOTAL_IN)                 # token ids
    en_out = jax.random.normal(k_en, (B, S, DIM_MODEL), jnp.float32)      # encoder out

    out = decoder_block_forward(params, in_in, en_out, first_block=True)
    out = jax.block_until_ready(out)

    assert out.shape == (B, S, DIM_MODEL)
    assert bool(jnp.all(jnp.isfinite(out)))
    print("KERNEL_OK")
</pallas_src>

<mosaic_0001>
module attributes {stable_mosaic.version = 11 : i64} {
  func.func @_decoder_block_kernel(%arg0: i32, %arg1: memref<32x32xf32, #tpu.memory_space<vmem>>, %arg2: memref<32x32xf32, #tpu.memory_space<vmem>>, %arg3: memref<1x32xf32, #tpu.memory_space<vmem>>, %arg4: memref<1x32xf32, #tpu.memory_space<vmem>>, %arg5: memref<1x32xf32, #tpu.memory_space<vmem>>, %arg6: memref<1x32xf32, #tpu.memory_space<vmem>>, %arg7: memref<1x32xf32, #tpu.memory_space<vmem>>, %arg8: memref<1x32xf32, #tpu.memory_space<vmem>>, %arg9: memref<32x96xf32, #tpu.memory_space<vmem>>, %arg10: memref<1x96xf32, #tpu.memory_space<vmem>>, %arg11: memref<32x32xf32, #tpu.memory_space<vmem>>, %arg12: memref<1x32xf32, #tpu.memory_space<vmem>>, %arg13: memref<32x32xf32, #tpu.memory_space<vmem>>, %arg14: memref<1x32xf32, #tpu.memory_space<vmem>>, %arg15: memref<32x64xf32, #tpu.memory_space<vmem>>, %arg16: memref<1x64xf32, #tpu.memory_space<vmem>>, %arg17: memref<32x32xf32, #tpu.memory_space<vmem>>, %arg18: memref<1x32xf32, #tpu.memory_space<vmem>>, %arg19: memref<32x32xf32, #tpu.memory_space<vmem>>, %arg20: memref<1x32xf32, #tpu.memory_space<vmem>>, %arg21: memref<32x32xf32, #tpu.memory_space<vmem>>, %arg22: memref<1x32xf32, #tpu.memory_space<vmem>>, %arg23: memref<32x32xf32, #tpu.memory_space<vmem>>) attributes {dimension_semantics = [#tpu.dimension_semantics<arbitrary>], iteration_bounds = array<i64: 1>, scalar_prefetch = 0 : i64, scratch_operands = 0 : i64, tpu.core_type = #tpu.core_type<tc>, window_params = [{pipeline_mode = #tpu.pipeline_mode<synchronous>, transform_indices = @transform_0, window_bounds = array<i64: 32, 32>}, {pipeline_mode = #tpu.pipeline_mode<synchronous>, transform_indices = @transform_1, window_bounds = array<i64: 32, 32>}, {pipeline_mode = #tpu.pipeline_mode<synchronous>, transform_indices = @transform_2, window_bounds = array<i64: 1, 32>}, {pipeline_mode = #tpu.pipeline_mode<synchronous>, transform_indices = @transform_3, window_bounds = array<i64: 1, 32>}, {pipeline_mode = #tpu.pipeline_mode<synchronous>, transform_indices = @transform_4, window_bounds = array<i64: 1, 32>}, {pipeline_mode = #tpu.pipeline_mode<synchronous>, transform_indices = @transform_5, window_bounds = array<i64: 1, 32>}, {pipeline_mode = #tpu.pipeline_mode<synchronous>, transform_indices = @transform_6, window_bounds = array<i64: 1, 32>}, {pipeline_mode = #tpu.pipeline_mode<synchronous>, transform_indices = @transform_7, window_bounds = array<i64: 1, 32>}, {pipeline_mode = #tpu.pipeline_mode<synchronous>, transform_indices = @transform_8, window_bounds = array<i64: 32, 96>}, {pipeline_mode = #tpu.pipeline_mode<synchronous>, transform_indices = @transform_9, window_bounds = array<i64: 1, 96>}, {pipeline_mode = #tpu.pipeline_mode<synchronous>, transform_indices = @transform_10, window_bounds = array<i64: 32, 32>}, {pipeline_mode = #tpu.pipeline_mode<synchronous>, transform_indices = @transform_11, window_bounds = array<i64: 1, 32>}, {pipeline_mode = #tpu.pipeline_mode<synchronous>, transform_indices = @transform_12, window_bounds = array<i64: 32, 32>}, {pipeline_mode = #tpu.pipeline_mode<synchronous>, transform_indices = @transform_13, window_bounds = array<i64: 1, 32>}, {pipeline_mode = #tpu.pipeline_mode<synchronous>, transform_indices = @transform_14, window_bounds = array<i64: 32, 64>}, {pipeline_mode = #tpu.pipeline_mode<synchronous>, transform_indices = @transform_15, window_bounds = array<i64: 1, 64>}, {pipeline_mode = #tpu.pipeline_mode<synchronous>, transform_indices = @transform_16, window_bounds = array<i64: 32, 32>}, {pipeline_mode = #tpu.pipeline_mode<synchronous>, transform_indices = @transform_17, window_bounds = array<i64: 1, 32>}, {pipeline_mode = #tpu.pipeline_mode<synchronous>, transform_indices = @transform_18, window_bounds = array<i64: 32, 32>}, {pipeline_mode = #tpu.pipeline_mode<synchronous>, transform_indices = @transform_19, window_bounds = array<i64: 1, 32>}, {pipeline_mode = #tpu.pipeline_mode<synchronous>, transform_indices = @transform_20, window_bounds = array<i64: 32, 32>}, {pipeline_mode = #tpu.pipeline_mode<synchronous>, transform_indices = @transform_21, window_bounds = array<i64: 1, 32>}, {pipeline_mode = #tpu.pipeline_mode<synchronous>, transform_indices = @transform_22, window_bounds = array<i64: 32, 32>}]} {
    %0 = tpu.iota {dimensions = array<i32: 0>} : vector<16x16xi32>
    %1 = tpu.iota {dimensions = array<i32: 1>} : vector<16x16xi32>
    %2 = arith.cmpi sle, %1, %0 : vector<16x16xi32>
    %cst = arith.constant 0.000000e+00 : f32
    %cst_0 = arith.constant -1.000000e+30 : f32
    %3 = vector.broadcast %cst : f32 to vector<16x16xf32>
    %4 = vector.broadcast %cst_0 : f32 to vector<16x16xf32>
    %5 = arith.select %2, %3, %4 : vector<16x16xi1>, vector<16x16xf32>
    %c0 = arith.constant 0 : index
    %c0_1 = arith.constant 0 : index
    %6 = vector.load %arg1[%c0, %c0_1] : memref<32x32xf32, #tpu.memory_space<vmem>>, vector<32x32xf32>
    %c0_2 = arith.constant 0 : index
    %c0_3 = arith.constant 0 : index
    %7 = vector.load %arg2[%c0_2, %c0_3] : memref<32x32xf32, #tpu.memory_space<vmem>>, vector<32x32xf32>
    %c0_4 = arith.constant 0 : index
    %c0_5 = arith.constant 0 : index
    %8 = vector.load %arg3[%c0_4, %c0_5] : memref<1x32xf32, #tpu.memory_space<vmem>>, vector<1x32xf32>
    %c0_6 = arith.constant 0 : index
    %c0_7 = arith.constant 0 : index
    %9 = vector.load %arg4[%c0_6, %c0_7] : memref<1x32xf32, #tpu.memory_space<vmem>>, vector<1x32xf32>
    %cst_8 = arith.constant dense<0.000000e+00> : vector<32xf32>
    %10 = vector.multi_reduction <add>, %6, %cst_8 [1] : vector<32x32xf32> to vector<32xf32>
    %11 = vector.shape_cast %10 : vector<32xf32> to vector<32x1xf32>
    %cst_9 = arith.constant 3.200000e+01 : f32
    %12 = vector.broadcast %cst_9 : f32 to vector<32x1xf32>
    %13 = arith.divf %11, %12 : vector<32x1xf32>
    %14 = vector.broadcast %13 : vector<32x1xf32> to vector<32x32xf32>
    %15 = arith.subf %6, %14 : vector<32x32xf32>
    %16 = arith.mulf %15, %15 : vector<32x32xf32>
    %cst_10 = arith.constant dense<0.000000e+00> : vector<32xf32>
    %17 = vector.multi_reduction <add>, %16, %cst_10 [1] : vector<32x32xf32> to vector<32xf32>
    %18 = vector.shape_cast %17 : vector<32xf32> to vector<32x1xf32>
    %cst_11 = arith.constant 3.200000e+01 : f32
    %19 = vector.broadcast %cst_11 : f32 to vector<32x1xf32>
    %20 = arith.divf %18, %19 : vector<32x1xf32>
    %cst_12 = arith.constant 9.99999974E-6 : f32
    %21 = vector.broadcast %cst_12 : f32 to vector<32x1xf32>
    %22 = arith.addf %20, %21 : vector<32x1xf32>
    %23 = math.rsqrt %22 : vector<32x1xf32>
    %24 = vector.broadcast %23 : vector<32x1xf32> to vector<32x32xf32>
    %25 = arith.mulf %15, %24 : vector<32x32xf32>
    %26 = vector.broadcast %8 : vector<1x32xf32> to vector<32x32xf32>
    %27 = arith.mulf %25, %26 : vector<32x32xf32>
    %28 = vector.broadcast %9 : vector<1x32xf32> to vector<32x32xf32>
    %29 = arith.addf %27, %28 : vector<32x32xf32>
    %c0_13 = arith.constant 0 : index
    %c0_14 = arith.constant 0 : index
    %30 = vector.load %arg9[%c0_13, %c0_14] : memref<32x96xf32, #tpu.memory_space<vmem>>, vector<32x96xf32>
    %cst_15 = arith.constant dense<0.000000e+00> : vector<32x96xf32>
    %31 = tpu.matmul %29, %30, %cst_15 {dimension_numbers = #tpu.dot_dimension_numbers<[1], [0], [0], [1], [0, 0, 1, 1], [], []>} : vector<32x32xf32>, vector<32x96xf32>, vector<32x96xf32> -> vector<32x96xf32>
    %c0_16 = arith.constant 0 : index
    %c0_17 = arith.constant 0 : index
    %32 = vector.load %arg10[%c0_16, %c0_17] : memref<1x96xf32, #tpu.memory_space<vmem>>, vector<1x96xf32>
    %33 = vector.broadcast %32 : vector<1x96xf32> to vector<32x96xf32>
    %34 = arith.addf %31, %33 : vector<32x96xf32>
    %35 = vector.extract_strided_slice %34 {offsets = [0, 0], sizes = [32, 32], strides = [1, 1]} : vector<32x96xf32> to vector<32x32xf32>
    %36 = vector.extract_strided_slice %34 {offsets = [0, 32], sizes = [32, 32], strides = [1, 1]} : vector<32x96xf32> to vector<32x32xf32>
    %37 = vector.extract_strided_slice %34 {offsets = [0, 64], sizes = [32, 32], strides = [1, 1]} : vector<32x96xf32> to vector<32x32xf32>
    %c0_18 = arith.constant 0 : index
    %c0_19 = arith.constant 0 : index
    %38 = vector.load %arg11[%c0_18, %c0_19] : memref<32x32xf32, #tpu.memory_space<vmem>>, vector<32x32xf32>
    %c0_20 = arith.constant 0 : index
    %c0_21 = arith.constant 0 : index
    %39 = vector.load %arg12[%c0_20, %c0_21] : memref<1x32xf32, #tpu.memory_space<vmem>>, vector<1x32xf32>
    %40 = vector.extract_strided_slice %35 {offsets = [0, 0], sizes = [32, 8], strides = [1, 1]} : vector<32x32xf32> to vector<32x8xf32>
    %41 = vector.shape_cast %40 : vector<32x8xf32> to vector<2x16x8xf32>
    %42 = vector.extract_strided_slice %36 {offsets = [0, 0], sizes = [32, 8], strides = [1, 1]} : vector<32x32xf32> to vector<32x8xf32>
    %43 = vector.shape_cast %42 : vector<32x8xf32> to vector<2x16x8xf32>
    %44 = vector.extract_strided_slice %37 {offsets = [0, 0], sizes = [32, 8], strides = [1, 1]} : vector<32x32xf32> to vector<32x8xf32>
    %45 = vector.shape_cast %44 : vector<32x8xf32> to vector<2x16x8xf32>
    "tpu.trace_start"() <{level = 10 : i32, message = "bqd,bkd->bqk"}> : () -> ()
    %cst_22 = arith.constant dense<0.000000e+00> : vector<2x16x16xf32>
    %46 = tpu.matmul %41, %43, %cst_22 {dimension_numbers = #tpu.dot_dimension_numbers<[2], [2], [1], [1], [0, 0, 0, 1, 1, 1], [0], [0]>} : vector<2x16x8xf32>, vector<2x16x8xf32>, vector<2x16x16xf32> -> vector<2x16x16xf32>
    "tpu.trace_stop"() : () -> ()
    %cst_23 = arith.constant 0.353553385 : f32
    %47 = vector.broadcast %cst_23 : f32 to vector<2x16x16xf32>
    %48 = arith.mulf %46, %47 : vector<2x16x16xf32>
    %49 = vector.shape_cast %5 : vector<16x16xf32> to vector<1x16x16xf32>
    %50 = vector.broadcast %49 : vector<1x16x16xf32> to vector<2x16x16xf32>
    %51 = arith.addf %48, %50 : vector<2x16x16xf32>
    %cst_24 = arith.constant dense<0xFF800000> : vector<2x16xf32>
    %52 = vector.multi_reduction <maximumf>, %51, %cst_24 [2] : vector<2x16x16xf32> to vector<2x16xf32>
    %53 = vector.shape_cast %52 : vector<2x16xf32> to vector<2x16x1xf32>
    %54 = vector.broadcast %53 : vector<2x16x1xf32> to vector<2x16x16xf32>
    %55 = arith.subf %51, %54 : vector<2x16x16xf32>
    %56 = math.exp %55 : vector<2x16x16xf32>
    %cst_25 = arith.constant dense<0.000000e+00> : vector<2x16xf32>
    %57 = vector.multi_reduction <add>, %56, %cst_25 [2] : vector<2x16x16xf32> to vector<2x16xf32>
    %58 = vector.shape_cast %57 : vector<2x16xf32> to vector<2x16x1xf32>
    %59 = tpu.reciprocal %58 {approx = true} : vector<2x16x1xf32> -> vector<2x16x1xf32>
    %60 = vector.broadcast %59 : vector<2x16x1xf32> to vector<2x16x16xf32>
    %61 = arith.mulf %56, %60 : vector<2x16x16xf32>
    "tpu.trace_start"() <{level = 10 : i32, message = "bqk,bkd->bqd"}> : () -> ()
    %cst_26 = arith.constant dense<0.000000e+00> : vector<2x16x8xf32>
    %62 = tpu.matmul %61, %45, %cst_26 {dimension_numbers = #tpu.dot_dimension_numbers<[2], [1], [1], [2], [0, 0, 0, 1, 1, 2], [0], [0]>} : vector<2x16x16xf32>, vector<2x16x8xf32>, vector<2x16x8xf32> -> vector<2x16x8xf32>
    "tpu.trace_stop"() : () -> ()
    %63 = vector.shape_cast %62 : vector<2x16x8xf32> to vector<32x8xf32>
    %64 = vector.extract_strided_slice %38 {offsets = [0, 0], sizes = [8, 32], strides = [1, 1]} : vector<32x32xf32> to vector<8x32xf32>
    %cst_27 = arith.constant dense<0.000000e+00> : vector<32x32xf32>
    %65 = tpu.matmul %63, %64, %cst_27 {dimension_numbers = #tpu.dot_dimension_numbers<[1], [0], [0], [1], [0, 0, 1, 1], [], []>} : vector<32x8xf32>, vector<8x32xf32>, vector<32x32xf32> -> vector<32x32xf32>
    %66 = vector.extract_strided_slice %35 {offsets = [0, 8], sizes = [32, 8], strides = [1, 1]} : vector<32x32xf32> to vector<32x8xf32>
    %67 = vector.shape_cast %66 : vector<32x8xf32> to vector<2x16x8xf32>
    %68 = vector.extract_strided_slice %36 {offsets = [0, 8], sizes = [32, 8], strides = [1, 1]} : vector<32x32xf32> to vector<32x8xf32>
    %69 = vector.shape_cast %68 : vector<32x8xf32> to vector<2x16x8xf32>
    %70 = vector.extract_strided_slice %37 {offsets = [0, 8], sizes = [32, 8], strides = [1, 1]} : vector<32x32xf32> to vector<32x8xf32>
    %71 = vector.shape_cast %70 : vector<32x8xf32> to vector<2x16x8xf32>
    "tpu.trace_start"() <{level = 10 : i32, message = "bqd,bkd->bqk"}> : () -> ()
    %cst_28 = arith.constant dense<0.000000e+00> : vector<2x16x16xf32>
    %72 = tpu.matmul %67, %69, %cst_28 {dimension_numbers = #tpu.dot_dimension_numbers<[2], [2], [1], [1], [0, 0, 0, 1, 1, 1], [0], [0]>} : vector<2x16x8xf32>, vector<2x16x8xf32>, vector<2x16x16xf32> -> vector<2x16x16xf32>
    "tpu.trace_stop"() : () -> ()
    %cst_29 = arith.constant 0.353553385 : f32
    %73 = vector.broadcast %cst_29 : f32 to vector<2x16x16xf32>
    %74 = arith.mulf %72, %73 : vector<2x16x16xf32>
    %75 = vector.shape_cast %5 : vector<16x16xf32> to vector<1x16x16xf32>
    %76 = vector.broadcast %75 : vector<1x16x16xf32> to vector<2x16x16xf32>
    %77 = arith.addf %74, %76 : vector<2x16x16xf32>
    %cst_30 = arith.constant dense<0xFF800000> : vector<2x16xf32>
    %78 = vector.multi_reduction <maximumf>, %77, %cst_30 [2] : vector<2x16x16xf32> to vector<2x16xf32>
    %79 = vector.shape_cast %78 : vector<2x16xf32> to vector<2x16x1xf32>
    %80 = vector.broadcast %79 : vector<2x16x1xf32> to vector<2x16x16xf32>
    %81 = arith.subf %77, %80 : vector<2x16x16xf32>
    %82 = math.exp %81 : vector<2x16x16xf32>
    %cst_31 = arith.constant dense<0.000000e+00> : vector<2x16xf32>
    %83 = vector.multi_reduction <add>, %82, %cst_31 [2] : vector<2x16x16xf32> to vector<2x16xf32>
    %84 = vector.shape_cast %83 : vector<2x16xf32> to vector<2x16x1xf32>
    %85 = tpu.reciprocal %84 {approx = true} : vector<2x16x1xf32> -> vector<2x16x1xf32>
    %86 = vector.broadcast %85 : vector<2x16x1xf32> to vector<2x16x16xf32>
    %87 = arith.mulf %82, %86 : vector<2x16x16xf32>
    "tpu.trace_start"() <{level = 10 : i32, message = "bqk,bkd->bqd"}> : () -> ()
    %cst_32 = arith.constant dense<0.000000e+00> : vector<2x16x8xf32>
    %88 = tpu.matmul %87, %71, %cst_32 {dimension_numbers = #tpu.dot_dimension_numbers<[2], [1], [1], [2], [0, 0, 0, 1, 1, 2], [0], [0]>} : vector<2x16x16xf32>, vector<2x16x8xf32>, vector<2x16x8xf32> -> vector<2x16x8xf32>
    "tpu.trace_stop"() : () -> ()
    %89 = vector.shape_cast %88 : vector<2x16x8xf32> to vector<32x8xf32>
    %90 = vector.extract_strided_slice %38 {offsets = [8, 0], sizes = [8, 32], strides = [1, 1]} : vector<32x32xf32> to vector<8x32xf32>
    %cst_33 = arith.constant dense<0.000000e+00> : vector<32x32xf32>
    %91 = tpu.matmul %89, %90, %cst_33 {dimension_numbers = #tpu.dot_dimension_numbers<[1], [0], [0], [1], [0, 0, 1, 1], [], []>} : vector<32x8xf32>, vector<8x32xf32>, vector<32x32xf32> -> vector<32x32xf32>
    %92 = arith.addf %65, %91 : vector<32x32xf32>
    %93 = vector.extract_strided_slice %35 {offsets = [0, 16], sizes = [32, 8], strides = [1, 1]} : vector<32x32xf32> to vector<32x8xf32>
    %94 = vector.shape_cast %93 : vector<32x8xf32> to vector<2x16x8xf32>
    %95 = vector.extract_strided_slice %36 {offsets = [0, 16], sizes = [32, 8], strides = [1, 1]} : vector<32x32xf32> to vector<32x8xf32>
    %96 = vector.shape_cast %95 : vector<32x8xf32> to vector<2x16x8xf32>
    %97 = vector.extract_strided_slice %37 {offsets = [0, 16], sizes = [32, 8], strides = [1, 1]} : vector<32x32xf32> to vector<32x8xf32>
    %98 = vector.shape_cast %97 : vector<32x8xf32> to vector<2x16x8xf32>
    "tpu.trace_start"() <{level = 10 : i32, message = "bqd,bkd->bqk"}> : () -> ()
    %cst_34 = arith.constant dense<0.000000e+00> : vector<2x16x16xf32>
    %99 = tpu.matmul %94, %96, %cst_34 {dimension_numbers = #tpu.dot_dimension_numbers<[2], [2], [1], [1], [0, 0, 0, 1, 1, 1], [0], [0]>} : vector<2x16x8xf32>, vector<2x16x8xf32>, vector<2x16x16xf32> -> vector<2x16x16xf32>
    "tpu.trace_stop"() : () -> ()
    %cst_35 = arith.constant 0.353553385 : f32
    %100 = vector.broadcast %cst_35 : f32 to vector<2x16x16xf32>
    %101 = arith.mulf %99, %100 : vector<2x16x16xf32>
    %102 = vector.shape_cast %5 : vector<16x16xf32> to vector<1x16x16xf32>
    %103 = vector.broadcast %102 : vector<1x16x16xf32> to vector<2x16x16xf32>
    %104 = arith.addf %101, %103 : vector<2x16x16xf32>
    %cst_36 = arith.constant dense<0xFF800000> : vector<2x16xf32>
    %105 = vector.multi_reduction <maximumf>, %104, %cst_36 [2] : vector<2x16x16xf32> to vector<2x16xf32>
    %106 = vector.shape_cast %105 : vector<2x16xf32> to vector<2x16x1xf32>
    %107 = vector.broadcast %106 : vector<2x16x1xf32> to vector<2x16x16xf32>
    %108 = arith.subf %104, %107 : vector<2x16x16xf32>
    %109 = math.exp %108 : vector<2x16x16xf32>
    %cst_37 = arith.constant dense<0.000000e+00> : vector<2x16xf32>
    %110 = vector.multi_reduction <add>, %109, %cst_37 [2] : vector<2x16x16xf32> to vector<2x16xf32>
    %111 = vector.shape_cast %110 : vector<2x16xf32> to vector<2x16x1xf32>
    %112 = tpu.reciprocal %111 {approx = true} : vector<2x16x1xf32> -> vector<2x16x1xf32>
    %113 = vector.broadcast %112 : vector<2x16x1xf32> to vector<2x16x16xf32>
    %114 = arith.mulf %109, %113 : vector<2x16x16xf32>
    "tpu.trace_start"() <{level = 10 : i32, message = "bqk,bkd->bqd"}> : () -> ()
    %cst_38 = arith.constant dense<0.000000e+00> : vector<2x16x8xf32>
    %115 = tpu.matmul %114, %98, %cst_38 {dimension_numbers = #tpu.dot_dimension_numbers<[2], [1], [1], [2], [0, 0, 0, 1, 1, 2], [0], [0]>} : vector<2x16x16xf32>, vector<2x16x8xf32>, vector<2x16x8xf32> -> vector<2x16x8xf32>
    "tpu.trace_stop"() : () -> ()
    %116 = vector.shape_cast %115 : vector<2x16x8xf32> to vector<32x8xf32>
    %117 = vector.extract_strided_slice %38 {offsets = [16, 0], sizes = [8, 32], strides = [1, 1]} : vector<32x32xf32> to vector<8x32xf32>
    %cst_39 = arith.constant dense<0.000000e+00> : vector<32x32xf32>
    %118 = tpu.matmul %116, %117, %cst_39 {dimension_numbers = #tpu.dot_dimension_numbers<[1], [0], [0], [1], [0, 0, 1, 1], [], []>} : vector<32x8xf32>, vector<8x32xf32>, vector<32x32xf32> -> vector<32x32xf32>
    %119 = arith.addf %92, %118 : vector<32x32xf32>
    %120 = vector.extract_strided_slice %35 {offsets = [0, 24], sizes = [32, 8], strides = [1, 1]} : vector<32x32xf32> to vector<32x8xf32>
    %121 = vector.shape_cast %120 : vector<32x8xf32> to vector<2x16x8xf32>
    %122 = vector.extract_strided_slice %36 {offsets = [0, 24], sizes = [32, 8], strides = [1, 1]} : vector<32x32xf32> to vector<32x8xf32>
    %123 = vector.shape_cast %122 : vector<32x8xf32> to vector<2x16x8xf32>
    %124 = vector.extract_strided_slice %37 {offsets = [0, 24], sizes = [32, 8], strides = [1, 1]} : vector<32x32xf32> to vector<32x8xf32>
    %125 = vector.shape_cast %124 : vector<32x8xf32> to vector<2x16x8xf32>
    "tpu.trace_start"() <{level = 10 : i32, message = "bqd,bkd->bqk"}> : () -> ()
    %cst_40 = arith.constant dense<0.000000e+00> : vector<2x16x16xf32>
    %126 = tpu.matmul %121, %123, %cst_40 {dimension_numbers = #tpu.dot_dimension_numbers<[2], [2], [1], [1], [0, 0, 0, 1, 1, 1], [0], [0]>} : vector<2x16x8xf32>, vector<2x16x8xf32>, vector<2x16x16xf32> -> vector<2x16x16xf32>
    "tpu.trace_stop"() : () -> ()
    %cst_41 = arith.constant 0.353553385 : f32
    %127 = vector.broadcast %cst_41 : f32 to vector<2x16x16xf32>
    %128 = arith.mulf %126, %127 : vector<2x16x16xf32>
    %129 = vector.shape_cast %5 : vector<16x16xf32> to vector<1x16x16xf32>
    %130 = vector.broadcast %129 : vector<1x16x16xf32> to vector<2x16x16xf32>
    %131 = arith.addf %128, %130 : vector<2x16x16xf32>
    %cst_42 = arith.constant dense<0xFF800000> : vector<2x16xf32>
    %132 = vector.multi_reduction <maximumf>, %131, %cst_42 [2] : vector<2x16x16xf32> to vector<2x16xf32>
    %133 = vector.shape_cast %132 : vector<2x16xf32> to vector<2x16x1xf32>
    %134 = vector.broadcast %133 : vector<2x16x1xf32> to vector<2x16x16xf32>
    %135 = arith.subf %131, %134 : vector<2x16x16xf32>
    %136 = math.exp %135 : vector<2x16x16xf32>
    %cst_43 = arith.constant dense<0.000000e+00> : vector<2x16xf32>
    %137 = vector.multi_reduction <add>, %136, %cst_43 [2] : vector<2x16x16xf32> to vector<2x16xf32>
    %138 = vector.shape_cast %137 : vector<2x16xf32> to vector<2x16x1xf32>
    %139 = tpu.reciprocal %138 {approx = true} : vector<2x16x1xf32> -> vector<2x16x1xf32>
    %140 = vector.broadcast %139 : vector<2x16x1xf32> to vector<2x16x16xf32>
    %141 = arith.mulf %136, %140 : vector<2x16x16xf32>
    "tpu.trace_start"() <{level = 10 : i32, message = "bqk,bkd->bqd"}> : () -> ()
    %cst_44 = arith.constant dense<0.000000e+00> : vector<2x16x8xf32>
    %142 = tpu.matmul %141, %125, %cst_44 {dimension_numbers = #tpu.dot_dimension_numbers<[2], [1], [1], [2], [0, 0, 0, 1, 1, 2], [0], [0]>} : vector<2x16x16xf32>, vector<2x16x8xf32>, vector<2x16x8xf32> -> vector<2x16x8xf32>
    "tpu.trace_stop"() : () -> ()
    %143 = vector.shape_cast %142 : vector<2x16x8xf32> to vector<32x8xf32>
    %144 = vector.extract_strided_slice %38 {offsets = [24, 0], sizes = [8, 32], strides = [1, 1]} : vector<32x32xf32> to vector<8x32xf32>
    %cst_45 = arith.constant dense<0.000000e+00> : vector<32x32xf32>
    %145 = tpu.matmul %143, %144, %cst_45 {dimension_numbers = #tpu.dot_dimension_numbers<[1], [0], [0], [1], [0, 0, 1, 1], [], []>} : vector<32x8xf32>, vector<8x32xf32>, vector<32x32xf32> -> vector<32x32xf32>
    %146 = arith.addf %119, %145 : vector<32x32xf32>
    %147 = vector.broadcast %39 : vector<1x32xf32> to vector<32x32xf32>
    %148 = arith.addf %146, %147 : vector<32x32xf32>
    %149 = arith.addf %29, %148 : vector<32x32xf32>
    %c0_46 = arith.constant 0 : index
    %c0_47 = arith.constant 0 : index
    %150 = vector.load %arg5[%c0_46, %c0_47] : memref<1x32xf32, #tpu.memory_space<vmem>>, vector<1x32xf32>
    %c0_48 = arith.constant 0 : index
    %c0_49 = arith.constant 0 : index
    %151 = vector.load %arg6[%c0_48, %c0_49] : memref<1x32xf32, #tpu.memory_space<vmem>>, vector<1x32xf32>
    %cst_50 = arith.constant dense<0.000000e+00> : vector<32xf32>
    %152 = vector.multi_reduction <add>, %7, %cst_50 [1] : vector<32x32xf32> to vector<32xf32>
    %153 = vector.shape_cast %152 : vector<32xf32> to vector<32x1xf32>
    %cst_51 = arith.constant 3.200000e+01 : f32
    %154 = vector.broadcast %cst_51 : f32 to vector<32x1xf32>
    %155 = arith.divf %153, %154 : vector<32x1xf32>
    %156 = vector.broadcast %155 : vector<32x1xf32> to vector<32x32xf32>
    %157 = arith.subf %7, %156 : vector<32x32xf32>
    %158 = arith.mulf %157, %157 : vector<32x32xf32>
    %cst_52 = arith.constant dense<0.000000e+00> : vector<32xf32>
    %159 = vector.multi_reduction <add>, %158, %cst_52 [1] : vector<32x32xf32> to vector<32xf32>
    %160 = vector.shape_cast %159 : vector<32xf32> to vector<32x1xf32>
    %cst_53 = arith.constant 3.200000e+01 : f32
    %161 = vector.broadcast %cst_53 : f32 to vector<32x1xf32>
    %162 = arith.divf %160, %161 : vector<32x1xf32>
    %cst_54 = arith.constant 9.99999974E-6 : f32
    %163 = vector.broadcast %cst_54 : f32 to vector<32x1xf32>
    %164 = arith.addf %162, %163 : vector<32x1xf32>
    %165 = math.rsqrt %164 : vector<32x1xf32>
    %166 = vector.broadcast %165 : vector<32x1xf32> to vector<32x32xf32>
    %167 = arith.mulf %157, %166 : vector<32x32xf32>
    %168 = vector.broadcast %150 : vector<1x32xf32> to vector<32x32xf32>
    %169 = arith.mulf %167, %168 : vector<32x32xf32>
    %170 = vector.broadcast %151 : vector<1x32xf32> to vector<32x32xf32>
    %171 = arith.addf %169, %170 : vector<32x32xf32>
    %c0_55 = arith.constant 0 : index
    %c0_56 = arith.constant 0 : index
    %172 = vector.load %arg13[%c0_55, %c0_56] : memref<32x32xf32, #tpu.memory_space<vmem>>, vector<32x32xf32>
    %cst_57 = arith.constant dense<0.000000e+00> : vector<32x32xf32>
    %173 = tpu.matmul %149, %172, %cst_57 {dimension_numbers = #tpu.dot_dimension_numbers<[1], [0], [0], [1], [0, 0, 1, 1], [], []>} : vector<32x32xf32>, vector<32x32xf32>, vector<32x32xf32> -> vector<32x32xf32>
    %c0_58 = arith.constant 0 : index
    %c0_59 = arith.constant 0 : index
    %174 = vector.load %arg14[%c0_58, %c0_59] : memref<1x32xf32, #tpu.memory_space<vmem>>, vector<1x32xf32>
    %175 = vector.broadcast %174 : vector<1x32xf32> to vector<32x32xf32>
    %176 = arith.addf %173, %175 : vector<32x32xf32>
    %c0_60 = arith.constant 0 : index
    %c0_61 = arith.constant 0 : index
    %177 = vector.load %arg15[%c0_60, %c0_61] : memref<32x64xf32, #tpu.memory_space<vmem>>, vector<32x64xf32>
    %cst_62 = arith.constant dense<0.000000e+00> : vector<32x64xf32>
    %178 = tpu.matmul %171, %177, %cst_62 {dimension_numbers = #tpu.dot_dimension_numbers<[1], [0], [0], [1], [0, 0, 1, 1], [], []>} : vector<32x32xf32>, vector<32x64xf32>, vector<32x64xf32> -> vector<32x64xf32>
    %c0_63 = arith.constant 0 : index
    %c0_64 = arith.constant 0 : index
    %179 = vector.load %arg16[%c0_63, %c0_64] : memref<1x64xf32, #tpu.memory_space<vmem>>, vector<1x64xf32>
    %180 = vector.broadcast %179 : vector<1x64xf32> to vector<32x64xf32>
    %181 = arith.addf %178, %180 : vector<32x64xf32>
    %182 = vector.extract_strided_slice %181 {offsets = [0, 0], sizes = [32, 32], strides = [1, 1]} : vector<32x64xf32> to vector<32x32xf32>
    %183 = vector.extract_strided_slice %181 {offsets = [0, 32], sizes = [32, 32], strides = [1, 1]} : vector<32x64xf32> to vector<32x32xf32>
    %c0_65 = arith.constant 0 : index
    %c0_66 = arith.constant 0 : index
    %184 = vector.load %arg17[%c0_65, %c0_66] : memref<32x32xf32, #tpu.memory_space<vmem>>, vector<32x32xf32>
    %c0_67 = arith.constant 0 : index
    %c0_68 = arith.constant 0 : index
    %185 = vector.load %arg18[%c0_67, %c0_68] : memref<1x32xf32, #tpu.memory_space<vmem>>, vector<1x32xf32>
    %186 = vector.extract_strided_slice %176 {offsets = [0, 0], sizes = [32, 8], strides = [1, 1]} : vector<32x32xf32> to vector<32x8xf32>
    %187 = vector.shape_cast %186 : vector<32x8xf32> to vector<2x16x8xf32>
    %188 = vector.extract_strided_slice %182 {offsets = [0, 0], sizes = [32, 8], strides = [1, 1]} : vector<32x32xf32> to vector<32x8xf32>
    %189 = vector.shape_cast %188 : vector<32x8xf32> to vector<2x16x8xf32>
    %190 = vector.extract_strided_slice %183 {offsets = [0, 0], sizes = [32, 8], strides = [1, 1]} : vector<32x32xf32> to vector<32x8xf32>
    %191 = vector.shape_cast %190 : vector<32x8xf32> to vector<2x16x8xf32>
    "tpu.trace_start"() <{level = 10 : i32, message = "bqd,bkd->bqk"}> : () -> ()
    %cst_69 = arith.constant dense<0.000000e+00> : vector<2x16x16xf32>
    %192 = tpu.matmul %187, %189, %cst_69 {dimension_numbers = #tpu.dot_dimension_numbers<[2], [2], [1], [1], [0, 0, 0, 1, 1, 1], [0], [0]>} : vector<2x16x8xf32>, vector<2x16x8xf32>, vector<2x16x16xf32> -> vector<2x16x16xf32>
    "tpu.trace_stop"() : () -> ()
    %cst_70 = arith.constant 0.353553385 : f32
    %193 = vector.broadcast %cst_70 : f32 to vector<2x16x16xf32>
    %194 = arith.mulf %192, %193 : vector<2x16x16xf32>
    %195 = vector.shape_cast %5 : vector<16x16xf32> to vector<1x16x16xf32>
    %196 = vector.broadcast %195 : vector<1x16x16xf32> to vector<2x16x16xf32>
    %197 = arith.addf %194, %196 : vector<2x16x16xf32>
    %cst_71 = arith.constant dense<0xFF800000> : vector<2x16xf32>
    %198 = vector.multi_reduction <maximumf>, %197, %cst_71 [2] : vector<2x16x16xf32> to vector<2x16xf32>
    %199 = vector.shape_cast %198 : vector<2x16xf32> to vector<2x16x1xf32>
    %200 = vector.broadcast %199 : vector<2x16x1xf32> to vector<2x16x16xf32>
    %201 = arith.subf %197, %200 : vector<2x16x16xf32>
    %202 = math.exp %201 : vector<2x16x16xf32>
    %cst_72 = arith.constant dense<0.000000e+00> : vector<2x16xf32>
    %203 = vector.multi_reduction <add>, %202, %cst_72 [2] : vector<2x16x16xf32> to vector<2x16xf32>
    %204 = vector.shape_cast %203 : vector<2x16xf32> to vector<2x16x1xf32>
    %205 = tpu.reciprocal %204 {approx = true} : vector<2x16x1xf32> -> vector<2x16x1xf32>
    %206 = vector.broadcast %205 : vector<2x16x1xf32> to vector<2x16x16xf32>
    %207 = arith.mulf %202, %206 : vector<2x16x16xf32>
    "tpu.trace_start"() <{level = 10 : i32, message = "bqk,bkd->bqd"}> : () -> ()
    %cst_73 = arith.constant dense<0.000000e+00> : vector<2x16x8xf32>
    %208 = tpu.matmul %207, %191, %cst_73 {dimension_numbers = #tpu.dot_dimension_numbers<[2], [1], [1], [2], [0, 0, 0, 1, 1, 2], [0], [0]>} : vector<2x16x16xf32>, vector<2x16x8xf32>, vector<2x16x8xf32> -> vector<2x16x8xf32>
    "tpu.trace_stop"() : () -> ()
    %209 = vector.shape_cast %208 : vector<2x16x8xf32> to vector<32x8xf32>
    %210 = vector.extract_strided_slice %184 {offsets = [0, 0], sizes = [8, 32], strides = [1, 1]} : vector<32x32xf32> to vector<8x32xf32>
    %cst_74 = arith.constant dense<0.000000e+00> : vector<32x32xf32>
    %211 = tpu.matmul %209, %210, %cst_74 {dimension_numbers = #tpu.dot_dimension_numbers<[1], [0], [0], [1], [0, 0, 1, 1], [], []>} : vector<32x8xf32>, vector<8x32xf32>, vector<32x32xf32> -> vector<32x32xf32>
    %212 = vector.extract_strided_slice %176 {offsets = [0, 8], sizes = [32, 8], strides = [1, 1]} : vector<32x32xf32> to vector<32x8xf32>
    %213 = vector.shape_cast %212 : vector<32x8xf32> to vector<2x16x8xf32>
    %214 = vector.extract_strided_slice %182 {offsets = [0, 8], sizes = [32, 8], strides = [1, 1]} : vector<32x32xf32> to vector<32x8xf32>
    %215 = vector.shape_cast %214 : vector<32x8xf32> to vector<2x16x8xf32>
    %216 = vector.extract_strided_slice %183 {offsets = [0, 8], sizes = [32, 8], strides = [1, 1]} : vector<32x32xf32> to vector<32x8xf32>
    %217 = vector.shape_cast %216 : vector<32x8xf32> to vector<2x16x8xf32>
    "tpu.trace_start"() <{level = 10 : i32, message = "bqd,bkd->bqk"}> : () -> ()
    %cst_75 = arith.constant dense<0.000000e+00> : vector<2x16x16xf32>
    %218 = tpu.matmul %213, %215, %cst_75 {dimension_numbers = #tpu.dot_dimension_numbers<[2], [2], [1], [1], [0, 0, 0, 1, 1, 1], [0], [0]>} : vector<2x16x8xf32>, vector<2x16x8xf32>, vector<2x16x16xf32> -> vector<2x16x16xf32>
    "tpu.trace_stop"() : () -> ()
    %cst_76 = arith.constant 0.353553385 : f32
    %219 = vector.broadcast %cst_76 : f32 to vector<2x16x16xf32>
    %220 = arith.mulf %218, %219 : vector<2x16x16xf32>
    %221 = vector.shape_cast %5 : vector<16x16xf32> to vector<1x16x16xf32>
    %222 = vector.broadcast %221 : vector<1x16x16xf32> to vector<2x16x16xf32>
    %223 = arith.addf %220, %222 : vector<2x16x16xf32>
    %cst_77 = arith.constant dense<0xFF800000> : vector<2x16xf32>
    %224 = vector.multi_reduction <maximumf>, %223, %cst_77 [2] : vector<2x16x16xf32> to vector<2x16xf32>
    %225 = vector.shape_cast %224 : vector<2x16xf32> to vector<2x16x1xf32>
    %226 = vector.broadcast %225 : vector<2x16x1xf32> to vector<2x16x16xf32>
    %227 = arith.subf %223, %226 : vector<2x16x16xf32>
    %228 = math.exp %227 : vector<2x16x16xf32>
    %cst_78 = arith.constant dense<0.000000e+00> : vector<2x16xf32>
    %229 = vector.multi_reduction <add>, %228, %cst_78 [2] : vector<2x16x16xf32> to vector<2x16xf32>
    %230 = vector.shape_cast %229 : vector<2x16xf32> to vector<2x16x1xf32>
    %231 = tpu.reciprocal %230 {approx = true} : vector<2x16x1xf32> -> vector<2x16x1xf32>
    %232 = vector.broadcast %231 : vector<2x16x1xf32> to vector<2x16x16xf32>
    %233 = arith.mulf %228, %232 : vector<2x16x16xf32>
    "tpu.trace_start"() <{level = 10 : i32, message = "bqk,bkd->bqd"}> : () -> ()
    %cst_79 = arith.constant dense<0.000000e+00> : vector<2x16x8xf32>
    %234 = tpu.matmul %233, %217, %cst_79 {dimension_numbers = #tpu.dot_dimension_numbers<[2], [1], [1], [2], [0, 0, 0, 1, 1, 2], [0], [0]>} : vector<2x16x16xf32>, vector<2x16x8xf32>, vector<2x16x8xf32> -> vector<2x16x8xf32>
    "tpu.trace_stop"() : () -> ()
    %235 = vector.shape_cast %234 : vector<2x16x8xf32> to vector<32x8xf32>
    %236 = vector.extract_strided_slice %184 {offsets = [8, 0], sizes = [8, 32], strides = [1, 1]} : vector<32x32xf32> to vector<8x32xf32>
    %cst_80 = arith.constant dense<0.000000e+00> : vector<32x32xf32>
    %237 = tpu.matmul %235, %236, %cst_80 {dimension_numbers = #tpu.dot_dimension_numbers<[1], [0], [0], [1], [0, 0, 1, 1], [], []>} : vector<32x8xf32>, vector<8x32xf32>, vector<32x32xf32> -> vector<32x32xf32>
    %238 = arith.addf %211, %237 : vector<32x32xf32>
    %239 = vector.extract_strided_slice %176 {offsets = [0, 16], sizes = [32, 8], strides = [1, 1]} : vector<32x32xf32> to vector<32x8xf32>
    %240 = vector.shape_cast %239 : vector<32x8xf32> to vector<2x16x8xf32>
    %241 = vector.extract_strided_slice %182 {offsets = [0, 16], sizes = [32, 8], strides = [1, 1]} : vector<32x32xf32> to vector<32x8xf32>
    %242 = vector.shape_cast %241 : vector<32x8xf32> to vector<2x16x8xf32>
    %243 = vector.extract_strided_slice %183 {offsets = [0, 16], sizes = [32, 8], strides = [1, 1]} : vector<32x32xf32> to vector<32x8xf32>
    %244 = vector.shape_cast %243 : vector<32x8xf32> to vector<2x16x8xf32>
    "tpu.trace_start"() <{level = 10 : i32, message = "bqd,bkd->bqk"}> : () -> ()
    %cst_81 = arith.constant dense<0.000000e+00> : vector<2x16x16xf32>
    %245 = tpu.matmul %240, %242, %cst_81 {dimension_numbers = #tpu.dot_dimension_numbers<[2], [2], [1], [1], [0, 0, 0, 1, 1, 1], [0], [0]>} : vector<2x16x8xf32>, vector<2x16x8xf32>, vector<2x16x16xf32> -> vector<2x16x16xf32>
    "tpu.trace_stop"() : () -> ()
    %cst_82 = arith.constant 0.353553385 : f32
    %246 = vector.broadcast %cst_82 : f32 to vector<2x16x16xf32>
    %247 = arith.mulf %245, %246 : vector<2x16x16xf32>
    %248 = vector.shape_cast %5 : vector<16x16xf32> to vector<1x16x16xf32>
    %249 = vector.broadcast %248 : vector<1x16x16xf32> to vector<2x16x16xf32>
    %250 = arith.addf %247, %249 : vector<2x16x16xf32>
    %cst_83 = arith.constant dense<0xFF800000> : vector<2x16xf32>
    %251 = vector.multi_reduction <maximumf>, %250, %cst_83 [2] : vector<2x16x16xf32> to vector<2x16xf32>
    %252 = vector.shape_cast %251 : vector<2x16xf32> to vector<2x16x1xf32>
    %253 = vector.broadcast %252 : vector<2x16x1xf32> to vector<2x16x16xf32>
    %254 = arith.subf %250, %253 : vector<2x16x16xf32>
    %255 = math.exp %254 : vector<2x16x16xf32>
    %cst_84 = arith.constant dense<0.000000e+00> : vector<2x16xf32>
    %256 = vector.multi_reduction <add>, %255, %cst_84 [2] : vector<2x16x16xf32> to vector<2x16xf32>
    %257 = vector.shape_cast %256 : vector<2x16xf32> to vector<2x16x1xf32>
    %258 = tpu.reciprocal %257 {approx = true} : vector<2x16x1xf32> -> vector<2x16x1xf32>
    %259 = vector.broadcast %258 : vector<2x16x1xf32> to vector<2x16x16xf32>
    %260 = arith.mulf %255, %259 : vector<2x16x16xf32>
    "tpu.trace_start"() <{level = 10 : i32, message = "bqk,bkd->bqd"}> : () -> ()
    %cst_85 = arith.constant dense<0.000000e+00> : vector<2x16x8xf32>
    %261 = tpu.matmul %260, %244, %cst_85 {dimension_numbers = #tpu.dot_dimension_numbers<[2], [1], [1], [2], [0, 0, 0, 1, 1, 2], [0], [0]>} : vector<2x16x16xf32>, vector<2x16x8xf32>, vector<2x16x8xf32> -> vector<2x16x8xf32>
    "tpu.trace_stop"() : () -> ()
    %262 = vector.shape_cast %261 : vector<2x16x8xf32> to vector<32x8xf32>
    %263 = vector.extract_strided_slice %184 {offsets = [16, 0], sizes = [8, 32], strides = [1, 1]} : vector<32x32xf32> to vector<8x32xf32>
    %cst_86 = arith.constant dense<0.000000e+00> : vector<32x32xf32>
    %264 = tpu.matmul %262, %263, %cst_86 {dimension_numbers = #tpu.dot_dimension_numbers<[1], [0], [0], [1], [0, 0, 1, 1], [], []>} : vector<32x8xf32>, vector<8x32xf32>, vector<32x32xf32> -> vector<32x32xf32>
    %265 = arith.addf %238, %264 : vector<32x32xf32>
    %266 = vector.extract_strided_slice %176 {offsets = [0, 24], sizes = [32, 8], strides = [1, 1]} : vector<32x32xf32> to vector<32x8xf32>
    %267 = vector.shape_cast %266 : vector<32x8xf32> to vector<2x16x8xf32>
    %268 = vector.extract_strided_slice %182 {offsets = [0, 24], sizes = [32, 8], strides = [1, 1]} : vector<32x32xf32> to vector<32x8xf32>
    %269 = vector.shape_cast %268 : vector<32x8xf32> to vector<2x16x8xf32>
    %270 = vector.extract_strided_slice %183 {offsets = [0, 24], sizes = [32, 8], strides = [1, 1]} : vector<32x32xf32> to vector<32x8xf32>
    %271 = vector.shape_cast %270 : vector<32x8xf32> to vector<2x16x8xf32>
    "tpu.trace_start"() <{level = 10 : i32, message = "bqd,bkd->bqk"}> : () -> ()
    %cst_87 = arith.constant dense<0.000000e+00> : vector<2x16x16xf32>
    %272 = tpu.matmul %267, %269, %cst_87 {dimension_numbers = #tpu.dot_dimension_numbers<[2], [2], [1], [1], [0, 0, 0, 1, 1, 1], [0], [0]>} : vector<2x16x8xf32>, vector<2x16x8xf32>, vector<2x16x16xf32> -> vector<2x16x16xf32>
    "tpu.trace_stop"() : () -> ()
    %cst_88 = arith.constant 0.353553385 : f32
    %273 = vector.broadcast %cst_88 : f32 to vector<2x16x16xf32>
    %274 = arith.mulf %272, %273 : vector<2x16x16xf32>
    %275 = vector.shape_cast %5 : vector<16x16xf32> to vector<1x16x16xf32>
    %276 = vector.broadcast %275 : vector<1x16x16xf32> to vector<2x16x16xf32>
    %277 = arith.addf %274, %276 : vector<2x16x16xf32>
    %cst_89 = arith.constant dense<0xFF800000> : vector<2x16xf32>
    %278 = vector.multi_reduction <maximumf>, %277, %cst_89 [2] : vector<2x16x16xf32> to vector<2x16xf32>
    %279 = vector.shape_cast %278 : vector<2x16xf32> to vector<2x16x1xf32>
    %280 = vector.broadcast %279 : vector<2x16x1xf32> to vector<2x16x16xf32>
    %281 = arith.subf %277, %280 : vector<2x16x16xf32>
    %282 = math.exp %281 : vector<2x16x16xf32>
    %cst_90 = arith.constant dense<0.000000e+00> : vector<2x16xf32>
    %283 = vector.multi_reduction <add>, %282, %cst_90 [2] : vector<2x16x16xf32> to vector<2x16xf32>
    %284 = vector.shape_cast %283 : vector<2x16xf32> to vector<2x16x1xf32>
    %285 = tpu.reciprocal %284 {approx = true} : vector<2x16x1xf32> -> vector<2x16x1xf32>
    %286 = vector.broadcast %285 : vector<2x16x1xf32> to vector<2x16x16xf32>
    %287 = arith.mulf %282, %286 : vector<2x16x16xf32>
    "tpu.trace_start"() <{level = 10 : i32, message = "bqk,bkd->bqd"}> : () -> ()
    %cst_91 = arith.constant dense<0.000000e+00> : vector<2x16x8xf32>
    %288 = tpu.matmul %287, %271, %cst_91 {dimension_numbers = #tpu.dot_dimension_numbers<[2], [1], [1], [2], [0, 0, 0, 1, 1, 2], [0], [0]>} : vector<2x16x16xf32>, vector<2x16x8xf32>, vector<2x16x8xf32> -> vector<2x16x8xf32>
    "tpu.trace_stop"() : () -> ()
    %289 = vector.shape_cast %288 : vector<2x16x8xf32> to vector<32x8xf32>
    %290 = vector.extract_strided_slice %184 {offsets = [24, 0], sizes = [8, 32], strides = [1, 1]} : vector<32x32xf32> to vector<8x32xf32>
    %cst_92 = arith.constant dense<0.000000e+00> : vector<32x32xf32>
    %291 = tpu.matmul %289, %290, %cst_92 {dimension_numbers = #tpu.dot_dimension_numbers<[1], [0], [0], [1], [0, 0, 1, 1], [], []>} : vector<32x8xf32>, vector<8x32xf32>, vector<32x32xf32> -> vector<32x32xf32>
    %292 = arith.addf %265, %291 : vector<32x32xf32>
    %293 = vector.broadcast %185 : vector<1x32xf32> to vector<32x32xf32>
    %294 = arith.addf %292, %293 : vector<32x32xf32>
    %295 = arith.addf %294, %149 : vector<32x32xf32>
    %c0_93 = arith.constant 0 : index
    %c0_94 = arith.constant 0 : index
    %296 = vector.load %arg7[%c0_93, %c0_94] : memref<1x32xf32, #tpu.memory_space<vmem>>, vector<1x32xf32>
    %c0_95 = arith.constant 0 : index
    %c0_96 = arith.constant 0 : index
    %297 = vector.load %arg8[%c0_95, %c0_96] : memref<1x32xf32, #tpu.memory_space<vmem>>, vector<1x32xf32>
    %cst_97 = arith.constant dense<0.000000e+00> : vector<32xf32>
    %298 = vector.multi_reduction <add>, %295, %cst_97 [1] : vector<32x32xf32> to vector<32xf32>
    %299 = vector.shape_cast %298 : vector<32xf32> to vector<32x1xf32>
    %cst_98 = arith.constant 3.200000e+01 : f32
    %300 = vector.broadcast %cst_98 : f32 to vector<32x1xf32>
    %301 = arith.divf %299, %300 : vector<32x1xf32>
    %302 = vector.broadcast %301 : vector<32x1xf32> to vector<32x32xf32>
    %303 = arith.subf %295, %302 : vector<32x32xf32>
    %304 = arith.mulf %303, %303 : vector<32x32xf32>
    %cst_99 = arith.constant dense<0.000000e+00> : vector<32xf32>
    %305 = vector.multi_reduction <add>, %304, %cst_99 [1] : vector<32x32xf32> to vector<32xf32>
    %306 = vector.shape_cast %305 : vector<32xf32> to vector<32x1xf32>
    %cst_100 = arith.constant 3.200000e+01 : f32
    %307 = vector.broadcast %cst_100 : f32 to vector<32x1xf32>
    %308 = arith.divf %306, %307 : vector<32x1xf32>
    %cst_101 = arith.constant 9.99999974E-6 : f32
    %309 = vector.broadcast %cst_101 : f32 to vector<32x1xf32>
    %310 = arith.addf %308, %309 : vector<32x1xf32>
    %311 = math.rsqrt %310 : vector<32x1xf32>
    %312 = vector.broadcast %311 : vector<32x1xf32> to vector<32x32xf32>
    %313 = arith.mulf %303, %312 : vector<32x32xf32>
    %314 = vector.broadcast %296 : vector<1x32xf32> to vector<32x32xf32>
    %315 = arith.mulf %313, %314 : vector<32x32xf32>
    %316 = vector.broadcast %297 : vector<1x32xf32> to vector<32x32xf32>
    %317 = arith.addf %315, %316 : vector<32x32xf32>
    %c0_102 = arith.constant 0 : index
    %c0_103 = arith.constant 0 : index
    %318 = vector.load %arg19[%c0_102, %c0_103] : memref<32x32xf32, #tpu.memory_space<vmem>>, vector<32x32xf32>
    %cst_104 = arith.constant dense<0.000000e+00> : vector<32x32xf32>
    %319 = tpu.matmul %317, %318, %cst_104 {dimension_numbers = #tpu.dot_dimension_numbers<[1], [0], [0], [1], [0, 0, 1, 1], [], []>} : vector<32x32xf32>, vector<32x32xf32>, vector<32x32xf32> -> vector<32x32xf32>
    %c0_105 = arith.constant 0 : index
    %c0_106 = arith.constant 0 : index
    %320 = vector.load %arg20[%c0_105, %c0_106] : memref<1x32xf32, #tpu.memory_space<vmem>>, vector<1x32xf32>
    %321 = vector.broadcast %320 : vector<1x32xf32> to vector<32x32xf32>
    %322 = arith.addf %319, %321 : vector<32x32xf32>
    %cst_107 = arith.constant 0.000000e+00 : f32
    %323 = vector.broadcast %cst_107 : f32 to vector<32x32xf32>
    %324 = arith.maximumf %322, %323 : vector<32x32xf32>
    %c0_108 = arith.constant 0 : index
    %c0_109 = arith.constant 0 : index
    %325 = vector.load %arg21[%c0_108, %c0_109] : memref<32x32xf32, #tpu.memory_space<vmem>>, vector<32x32xf32>
    %cst_110 = arith.constant dense<0.000000e+00> : vector<32x32xf32>
    %326 = tpu.matmul %324, %325, %cst_110 {dimension_numbers = #tpu.dot_dimension_numbers<[1], [0], [0], [1], [0, 0, 1, 1], [], []>} : vector<32x32xf32>, vector<32x32xf32>, vector<32x32xf32> -> vector<32x32xf32>
    %c0_111 = arith.constant 0 : index
    %c0_112 = arith.constant 0 : index
    %327 = vector.load %arg22[%c0_111, %c0_112] : memref<1x32xf32, #tpu.memory_space<vmem>>, vector<1x32xf32>
    %328 = vector.broadcast %327 : vector<1x32xf32> to vector<32x32xf32>
    %329 = arith.addf %326, %328 : vector<32x32xf32>
    %330 = arith.addf %329, %317 : vector<32x32xf32>
    %c0_113 = arith.constant 0 : index
    %c0_114 = arith.constant 0 : index
    %331 = vector.load %arg23[%c0_113, %c0_114] : memref<32x32xf32, #tpu.memory_space<vmem>>, vector<32x32xf32>
    tpu.vector_store %arg23[%c0_113, %c0_114], %330 {strides = array<i32>} : memref<32x32xf32, #tpu.memory_space<vmem>>, vector<32x32xf32>,
    return
  }
  func.func @transform_0(%arg0: i32) -> (i32, i32) {
    %c0_i32 = arith.constant 0 : i32
    %c0_i32_0 = arith.constant 0 : i32
    %c0_i32_1 = arith.constant 0 : i32
    return %c0_i32, %c0_i32_0 : i32, i32
  }
  func.func @transform_1(%arg0: i32) -> (i32, i32) {
    %c0_i32 = arith.constant 0 : i32
    %c0_i32_0 = arith.constant 0 : i32
    %c0_i32_1 = arith.constant 0 : i32
    return %c0_i32, %c0_i32_0 : i32, i32
  }
  func.func @transform_2(%arg0: i32) -> (i32, i32) {
    %c0_i32 = arith.constant 0 : i32
    %c0_i32_0 = arith.constant 0 : i32
    %c0_i32_1 = arith.constant 0 : i32
    return %c0_i32, %c0_i32_0 : i32, i32
  }
  func.func @transform_3(%arg0: i32) -> (i32, i32) {
    %c0_i32 = arith.constant 0 : i32
    %c0_i32_0 = arith.constant 0 : i32
    %c0_i32_1 = arith.constant 0 : i32
    return %c0_i32, %c0_i32_0 : i32, i32
  }
  func.func @transform_4(%arg0: i32) -> (i32, i32) {
    %c0_i32 = arith.constant 0 : i32
    %c0_i32_0 = arith.constant 0 : i32
    %c0_i32_1 = arith.constant 0 : i32
    return %c0_i32, %c0_i32_0 : i32, i32
  }
  func.func @transform_5(%arg0: i32) -> (i32, i32) {
    %c0_i32 = arith.constant 0 : i32
    %c0_i32_0 = arith.constant 0 : i32
    %c0_i32_1 = arith.constant 0 : i32
    return %c0_i32, %c0_i32_0 : i32, i32
  }
  func.func @transform_6(%arg0: i32) -> (i32, i32) {
    %c0_i32 = arith.constant 0 : i32
    %c0_i32_0 = arith.constant 0 : i32
    %c0_i32_1 = arith.constant 0 : i32
    return %c0_i32, %c0_i32_0 : i32, i32
  }
  func.func @transform_7(%arg0: i32) -> (i32, i32) {
    %c0_i32 = arith.constant 0 : i32
    %c0_i32_0 = arith.constant 0 : i32
    %c0_i32_1 = arith.constant 0 : i32
    return %c0_i32, %c0_i32_0 : i32, i32
  }
  func.func @transform_8(%arg0: i32) -> (i32, i32) {
    %c0_i32 = arith.constant 0 : i32
    %c0_i32_0 = arith.constant 0 : i32
    %c0_i32_1 = arith.constant 0 : i32
    return %c0_i32, %c0_i32_0 : i32, i32
  }
  func.func @transform_9(%arg0: i32) -> (i32, i32) {
    %c0_i32 = arith.constant 0 : i32
    %c0_i32_0 = arith.constant 0 : i32
    %c0_i32_1 = arith.constant 0 : i32
    return %c0_i32, %c0_i32_0 : i32, i32
  }
  func.func @transform_10(%arg0: i32) -> (i32, i32) {
    %c0_i32 = arith.constant 0 : i32
    %c0_i32_0 = arith.constant 0 : i32
    %c0_i32_1 = arith.constant 0 : i32
    return %c0_i32, %c0_i32_0 : i32, i32
  }
  func.func @transform_11(%arg0: i32) -> (i32, i32) {
    %c0_i32 = arith.constant 0 : i32
    %c0_i32_0 = arith.constant 0 : i32
    %c0_i32_1 = arith.constant 0 : i32
    return %c0_i32, %c0_i32_0 : i32, i32
  }
  func.func @transform_12(%arg0: i32) -> (i32, i32) {
    %c0_i32 = arith.constant 0 : i32
    %c0_i32_0 = arith.constant 0 : i32
    %c0_i32_1 = arith.constant 0 : i32
    return %c0_i32, %c0_i32_0 : i32, i32
  }
  func.func @transform_13(%arg0: i32) -> (i32, i32) {
    %c0_i32 = arith.constant 0 : i32
    %c0_i32_0 = arith.constant 0 : i32
    %c0_i32_1 = arith.constant 0 : i32
    return %c0_i32, %c0_i32_0 : i32, i32
  }
  func.func @transform_14(%arg0: i32) -> (i32, i32) {
    %c0_i32 = arith.constant 0 : i32
    %c0_i32_0 = arith.constant 0 : i32
    %c0_i32_1 = arith.constant 0 : i32
    return %c0_i32, %c0_i32_0 : i32, i32
  }
  func.func @transform_15(%arg0: i32) -> (i32, i32) {
    %c0_i32 = arith.constant 0 : i32
    %c0_i32_0 = arith.constant 0 : i32
    %c0_i32_1 = arith.constant 0 : i32
    return %c0_i32, %c0_i32_0 : i32, i32
  }
  func.func @transform_16(%arg0: i32) -> (i32, i32) {
    %c0_i32 = arith.constant 0 : i32
    %c0_i32_0 = arith.constant 0 : i32
    %c0_i32_1 = arith.constant 0 : i32
    return %c0_i32, %c0_i32_0 : i32, i32
  }
  func.func @transform_17(%arg0: i32) -> (i32, i32) {
    %c0_i32 = arith.constant 0 : i32
    %c0_i32_0 = arith.constant 0 : i32
    %c0_i32_1 = arith.constant 0 : i32
    return %c0_i32, %c0_i32_0 : i32, i32
  }
  func.func @transform_18(%arg0: i32) -> (i32, i32) {
    %c0_i32 = arith.constant 0 : i32
    %c0_i32_0 = arith.constant 0 : i32
    %c0_i32_1 = arith.constant 0 : i32
    return %c0_i32, %c0_i32_0 : i32, i32
  }
  func.func @transform_19(%arg0: i32) -> (i32, i32) {
    %c0_i32 = arith.constant 0 : i32
    %c0_i32_0 = arith.constant 0 : i32
    %c0_i32_1 = arith.constant 0 : i32
    return %c0_i32, %c0_i32_0 : i32, i32
  }
  func.func @transform_20(%arg0: i32) -> (i32, i32) {
    %c0_i32 = arith.constant 0 : i32
    %c0_i32_0 = arith.constant 0 : i32
    %c0_i32_1 = arith.constant 0 : i32
    return %c0_i32, %c0_i32_0 : i32, i32
  }
  func.func @transform_21(%arg0: i32) -> (i32, i32) {
    %c0_i32 = arith.constant 0 : i32
    %c0_i32_0 = arith.constant 0 : i32
    %c0_i32_1 = arith.constant 0 : i32
    return %c0_i32, %c0_i32_0 : i32, i32
  }
  func.func @transform_22(%arg0: i32) -> (i32, i32) {
    %c0_i32 = arith.constant 0 : i32
    %c0_i32_0 = arith.constant 0 : i32
    %c0_i32_1 = arith.constant 0 : i32
    return %c0_i32, %c0_i32_0 : i32, i32
  }
}

</mosaic_0001>

<bundles_post_ra>
// kernel: tpu_custom_call.1
= control target key start
LH: loop header
LB: loop body
LE: loop exit
PB: predicated region body
PF: predicated region fallthrough
CT: control target
= control target key end

     0   :  { %s7902_s0 = inlined_call_operand.hbm [shape: f32[32,32], index: 0, kind: input, shape index: {}]   ;;  %s7903_s1 = inlined_call_operand.hbm [shape: f32[32,32], index: 1, kind: input, shape index: {}]   ;;  %s7904_s2 = inlined_call_operand.hbm [shape: f32[1,32], index: 2, kind: input, shape index: {}]   ;;  %s7905_s3 = inlined_call_operand.hbm [shape: f32[1,32], index: 3, kind: input, shape index: {}]   ;;  %s7906_s4 = inlined_call_operand.hbm [shape: f32[1,32], index: 4, kind: input, shape index: {}]   ;;  %s7907_s5 = inlined_call_operand.hbm [shape: f32[1,32], index: 5, kind: input, shape index: {}]   ;;  %s7908_s6 = inlined_call_operand.hbm [shape: f32[1,32], index: 6, kind: input, shape index: {}]   ;;  %s7909_s7 = inlined_call_operand.hbm [shape: f32[1,32], index: 7, kind: input, shape index: {}]   ;;  %s7910_s8 = inlined_call_operand.hbm [shape: f32[32,96], index: 8, kind: input, shape index: {}]   ;;  %s7911_s9 = inlined_call_operand.hbm [shape: f32[1,96], index: 9, kind: input, shape index: {}]   ;;  %s7912_s10 = inlined_call_operand.vmem [shape: f32[32,32], index: 10, kind: input, shape index: {}]   ;;  %s7913_s11 = inlined_call_operand.hbm [shape: f32[1,32], index: 11, kind: input, shape index: {}]   ;;  %s7914_s12 = inlined_call_operand.hbm [shape: f32[32,32], index: 12, kind: input, shape index: {}]   ;;  %s7915_s13 = inlined_call_operand.hbm [shape: f32[1,32], index: 13, kind: input, shape index: {}]   ;;  %s7916_s14 = inlined_call_operand.hbm [shape: f32[32,64], index: 14, kind: input, shape index: {}]   ;;  %s7917_s15 = inlined_call_operand.hbm [shape: f32[1,64], index: 15, kind: input, shape index: {}]   ;;  %s7918_s16 = inlined_call_operand.hbm [shape: f32[32,32], index: 16, kind: input, shape index: {}]   ;;  %s7919_s17 = inlined_call_operand.hbm [shape: f32[1,32], index: 17, kind: input, shape index: {}]   ;;  %s7920_s18 = inlined_call_operand.vmem [shape: f32[32,32], index: 18, kind: input, shape index: {}]   ;;  %s7921_s19 = inlined_call_operand.vmem [shape: f32[1,32], index: 19, kind: input, shape index: {}]   ;;  %s7922_s20 = inlined_call_operand.hbm [shape: f32[32,32], index: 20, kind: input, shape index: {}]   ;;  %s7923_s21 = inlined_call_operand.vmem [shape: f32[1,32], index: 21, kind: input, shape index: {}]   ;;  %s7924_s22 = inlined_call_operand.hbm [shape: f32[32,32], index: 22, kind: output, shape index: {}]  }
   0x1   :  { %7937 = sst [smem:[#allocation43_spill]] %s7902_s0 }
   0x2   :  { %7938 = sst [smem:[#allocation44_spill]] %s7903_s1 }
   0x3   :  { %7939 = sst [smem:[#allocation45_spill]] %s7904_s2 }
   0x4   :  { %7940 = sst [smem:[#allocation46_spill]] %s7905_s3 }
   0x5   :  { %7941 = sst [smem:[#allocation47_spill]] %s7906_s4 }
   0x6   :  { %7942 = sst [smem:[#allocation48_spill]] %s7907_s5 }
   0x7   :  { %7943 = sst [smem:[#allocation49_spill]] %s7908_s6 }
   0x8   :  { %7944 = sst [smem:[#allocation50_spill]] %s7924_s22 }
   0x9   :  { %27 = vsyncpa [#allocation3], 0 }
   0xa   :  { %28 = vsyncpa [#allocation6], 0 }
   0xb   :  { %29 = vsyncpa [#allocation9], 0 }
   0xc   :  { %30 = vsyncpa [#allocation12], 0 }
   0xd   :  { %31 = vsyncpa [#allocation15], 0 }
   0xe   :  { %32 = vsyncpa [#allocation18], 0 }
   0xf   :  { %33 = vsyncpa [#allocation21], 0 }
  0x10   :  { %34 = vsyncpa [#allocation24], 0 }
  0x11   :  { %35 = vsyncpa [#allocation27], 0 }
  0x12   :  { %36 = vsyncpa [#allocation30], 0 }
  0x13   :  { %37 = vsyncpa [#allocation4], 0  ;;  %s6923_s3 = smov [#allocation5]   ;;  %s6924_s29 = smov [#allocation8]  }
  0x14   :  { %s55_s28 = sshll.u32 %s6923_s3, 4  ;;  %s78_s30 = sshll.u32 %s6924_s29, 4  ;;  %s56_s28 = int_to_ptr.vmem [resolvable:$true] %s55_s28  ;;  %s7071_s30 = int_to_ptr.vmem [resolvable:$true] %s78_s30 }
  0x15   :  { %s7945_s23 = sld [smem:[#allocation44_spill]] }
  0x1b   :  { %s6483_s1 = scalar_lea.hbm %s7945_s23, 512 }
  0x1c   :  { %p6484_p0 = scmp.ne.s32.totalorder %s7945_s23, %s6483_s1  ;;  %p6487_p1 = scmp.lt.u32.totalorder %s6483_s1, %s7945_s23 }
  0x1e   :  { %p6489_p2 = pnand %p6487_p1, %p6484_p0 }
  0x20   :  { %6492 = shalt.err (!%p6489_p2)
}
  0x21   :  { %s6493_s26 = scalar_lea.vmem %s56_s28, 512  ;;  %p6498_p4 = scmp.lt.s32.totalorder %s56_s28, %s56_s28 }
  0x22   :  { %p6494_p3 = scmp.ne.s32.totalorder %s56_s28, %s6493_s26  ;;  %p6499_p5 = scmp.lt.s32.totalorder %s6493_s26, %s6493_s26 }
  0x24   :  { %p6500_p6 = por %p6499_p5, %p6498_p4 }
  0x26   :  { %p6501_p7 = pnand %p6500_p6, %p6494_p3 }
  0x28   :  { %6504 = shalt.err (!%p6501_p7)
}
  0x29   :  { %s7932_s2 = smov 128   ;;  %s7934_s27 = smov 8  }
  0x2a   :  { %61 = dma.hbm_to_vmem [thread:$0]  %s7945_s23, 512, %s56_s28, [#allocation6], %s7932_s2, %s7932_s2, %s7934_s27  }
  0x2b   :  { %s7946_s1 = sld [smem:[#allocation46_spill]] }
  0x31   :  { %s6505_s5 = scalar_lea.hbm %s7946_s1, 16 }
  0x32   :  { %p6506_p8 = scmp.ne.s32.totalorder %s7946_s1, %s6505_s5  ;;  %p6509_p9 = scmp.lt.u32.totalorder %s6505_s5, %s7946_s1 }
  0x34   :  { %p6511_p10 = pnand %p6509_p9, %p6506_p8 }
  0x36   :  { %6514 = shalt.err (!%p6511_p10)
}
  0x37   :  { %s6515_s3 = scalar_lea.vmem %s7071_s30, 16  ;;  %s6519_s28 = scalar_lea.vmem %s7071_s30, 32 }
  0x38   :  { %p6516_p11 = scmp.ne.s32.totalorder %s7071_s30, %s6515_s3  ;;  %p6520_p12 = scmp.lt.s32.totalorder %s7071_s30, %s7071_s30 }
  0x39   :  { %p6521_p13 = scmp.lt.s32.totalorder %s6519_s28, %s6515_s3 }
  0x3b   :  { %p6522_p0 = por %p6521_p13, %p6520_p12 }
  0x3d   :  { %p6523_p1 = pnand %p6522_p0, %p6516_p11 }
  0x3f   :  { %6526 = shalt.err (!%p6523_p1)
}
  0x40   :  { %81 = dma.hbm_to_vmem [thread:$0]  %s7946_s1, 16, %s7071_s30, [#allocation9]  }
  0x41   :  { %s6927_s4 = smov [#allocation11]   ;;  %s6928_s5 = smov [#allocation14]  }
  0x42   :  { %s98_s0 = sshll.u32 %s6927_s4, 4  ;;  %s118_s24 = sshll.u32 %s6928_s5, 4  ;;  %s99_s0 = int_to_ptr.vmem [resolvable:$true] %s98_s0  ;;  %s119_s24 = int_to_ptr.vmem [resolvable:$true] %s118_s24 }
  0x43   :  { %s7947_s26 = sld [smem:[#allocation48_spill]] }
  0x49   :  { %s6527_s2 = scalar_lea.hbm %s7947_s26, 16 }
  0x4a   :  { %p6528_p2 = scmp.ne.s32.totalorder %s7947_s26, %s6527_s2  ;;  %p6531_p3 = scmp.lt.u32.totalorder %s6527_s2, %s7947_s26 }
  0x4c   :  { %p6533_p4 = pnand %p6531_p3, %p6528_p2 }
  0x4e   :  { %6536 = shalt.err (!%p6533_p4)
}
  0x4f   :  { %s6537_s30 = scalar_lea.vmem %s99_s0, 16  ;;  %s6541_s1 = scalar_lea.vmem %s99_s0, 32 }
  0x50   :  { %p6538_p5 = scmp.ne.s32.totalorder %s99_s0, %s6537_s30  ;;  %p6542_p6 = scmp.lt.s32.totalorder %s99_s0, %s99_s0 }
  0x51   :  { %p6543_p7 = scmp.lt.s32.totalorder %s6541_s1, %s6537_s30 }
  0x53   :  { %p6544_p8 = por %p6543_p7, %p6542_p6 }
  0x55   :  { %p6545_p9 = pnand %p6544_p8, %p6538_p5 }
  0x57   :  { %6548 = shalt.err (!%p6545_p9)
}
  0x58   :  { %101 = dma.hbm_to_vmem [thread:$0]  %s7947_s26, 16, %s99_s0, [#allocation12]  }
  0x59   :  { %s6549_s5 = scalar_lea.hbm %s7909_s7, 16 }
  0x5a   :  { %p6550_p10 = scmp.ne.s32.totalorder %s7909_s7, %s6549_s5  ;;  %p6553_p11 = scmp.lt.u32.totalorder %s6549_s5, %s7909_s7 }
  0x5c   :  { %p6555_p12 = pnand %p6553_p11, %p6550_p10 }
  0x5e   :  { %6558 = shalt.err (!%p6555_p12)
}
  0x5f   :  { %s6559_s3 = scalar_lea.vmem %s119_s24, 16  ;;  %s6563_s28 = scalar_lea.vmem %s119_s24, 32 }
  0x60   :  { %p6560_p13 = scmp.ne.s32.totalorder %s119_s24, %s6559_s3  ;;  %p6564_p0 = scmp.lt.s32.totalorder %s119_s24, %s119_s24 }
  0x61   :  { %p6565_p1 = scmp.lt.s32.totalorder %s6563_s28, %s6559_s3 }
  0x63   :  { %p6566_p2 = por %p6565_p1, %p6564_p0 }
  0x65   :  { %p6567_p3 = pnand %p6566_p2, %p6560_p13 }
  0x67   :  { %6570 = shalt.err (!%p6567_p3)
}
  0x68   :  { %121 = dma.hbm_to_vmem [thread:$0]  %s7909_s7, 16, %s119_s24, [#allocation15]  }
  0x69   :  { %s6929_s30 = smov [#allocation17]   ;;  %s6930_s23 = smov [#allocation20]  }
  0x6a   :  { %s140_s1 = sshll.u32 %s6929_s30, 4  ;;  %s161_s29 = sshll.u32 %s6930_s23, 4  ;;  %s141_s1 = int_to_ptr.vmem [resolvable:$true] %s140_s1  ;;  %s7130_s29 = int_to_ptr.vmem [resolvable:$true] %s161_s29 }
  0x6b   :  { %s6571_s5 = scalar_lea.hbm %s7911_s9, 16 }
  0x6c   :  { %p6572_p4 = scmp.ne.s32.totalorder %s7911_s9, %s6571_s5  ;;  %p6575_p5 = scmp.lt.u32.totalorder %s6571_s5, %s7911_s9 }
  0x6e   :  { %p6577_p6 = pnand %p6575_p5, %p6572_p4 }
  0x70   :  { %6580 = shalt.err (!%p6577_p6)
}
  0x71   :  { %s6581_s7 = scalar_lea.vmem %s141_s1, 16  ;;  %s6585_s24 = scalar_lea.vmem %s141_s1, 32 }
  0x72   :  { %p6582_p7 = scmp.ne.s32.totalorder %s141_s1, %s6581_s7  ;;  %p6586_p8 = scmp.lt.s32.totalorder %s141_s1, %s141_s1 }
  0x73   :  { %p6587_p9 = scmp.lt.s32.totalorder %s6585_s24, %s6581_s7 }
  0x75   :  { %p6588_p10 = por %p6587_p9, %p6586_p8 }
  0x77   :  { %p6589_p11 = pnand %p6588_p10, %p6582_p7 }
  0x79   :  { %6592 = shalt.err (!%p6589_p11)
}
  0x7a   :  { %143 = dma.hbm_to_vmem [thread:$0]  %s7911_s9, 16, %s141_s1, [#allocation18]  }
  0x7b   :  { %s6593_s30 = scalar_lea.hbm %s7914_s12, 512 }
  0x7c   :  { %p6594_p12 = scmp.ne.s32.totalorder %s7914_s12, %s6593_s30  ;;  %p6597_p13 = scmp.lt.u32.totalorder %s6593_s30, %s7914_s12 }
  0x7e   :  { %p6599_p0 = pnand %p6597_p13, %p6594_p12 }
  0x80   :  { %6602 = shalt.err (!%p6599_p0)
}
  0x81   :  { %s6603_s22 = scalar_lea.vmem %s7130_s29, 512  ;;  %p6608_p2 = scmp.lt.s32.totalorder %s7130_s29, %s7130_s29 }
  0x82   :  { %p6604_p1 = scmp.ne.s32.totalorder %s7130_s29, %s6603_s22  ;;  %p6609_p3 = scmp.lt.s32.totalorder %s6603_s22, %s6603_s22 }
  0x84   :  { %p6610_p4 = por %p6609_p3, %p6608_p2 }
  0x86   :  { %p6611_p5 = pnand %p6610_p4, %p6604_p1 }
  0x88   :  { %6614 = shalt.err (!%p6611_p5)
}
  0x89   :  { %s7948_s9 = smov 8   ;;  %s7949_s1 = smov 128  }
  0x8a   :  { %167 = dma.hbm_to_vmem [thread:$0]  %s7914_s12, 512, %s7130_s29, [#allocation21], %s7949_s1, %s7949_s1, %s7948_s9  }
  0x8b   :  { %s6931_s25 = smov [#allocation23]   ;;  %s6932_s24 = smov [#allocation26]  }
  0x8c   :  { %s183_s7 = sshll.u32 %s6931_s25, 4  ;;  %s205_s3 = sshll.u32 %s6932_s24, 4  ;;  %s184_s7 = int_to_ptr.vmem [resolvable:$true] %s183_s7  ;;  %s7164_s3 = int_to_ptr.vmem [resolvable:$true] %s205_s3 }
  0x8d   :  { %s6615_s26 = scalar_lea.hbm %s7916_s14, 512 }
  0x8e   :  { %p6616_p6 = scmp.ne.s32.totalorder %s7916_s14, %s6615_s26  ;;  %p6619_p7 = scmp.lt.u32.totalorder %s6615_s26, %s7916_s14 }
  0x90   :  { %p6621_p8 = pnand %p6619_p7, %p6616_p6 }
  0x92   :  { %6624 = shalt.err (!%p6621_p8)
}
  0x93   :  { %s6625_s12 = scalar_lea.vmem %s184_s7, 512  ;;  %p6630_p10 = scmp.lt.s32.totalorder %s184_s7, %s184_s7 }
  0x94   :  { %p6626_p9 = scmp.ne.s32.totalorder %s184_s7, %s6625_s12  ;;  %p6631_p11 = scmp.lt.s32.totalorder %s6625_s12, %s6625_s12 }
  0x96   :  { %p6632_p12 = por %p6631_p11, %p6630_p10 }
  0x98   :  { %p6633_p13 = pnand %p6632_p12, %p6626_p9 }
  0x9a   :  { %6636 = shalt.err (!%p6633_p13)
}
  0x9b   :  { %189 = dma.hbm_to_vmem [thread:$0]  %s7916_s14, 512, %s184_s7, [#allocation24], %s7949_s1, %s7949_s1, %s7948_s9  }
  0x9c   :  { %s6637_s6 = scalar_lea.hbm %s7918_s16, 512 }
  0x9d   :  { %p6638_p0 = scmp.ne.s32.totalorder %s7918_s16, %s6637_s6  ;;  %p6641_p1 = scmp.lt.u32.totalorder %s6637_s6, %s7918_s16 }
  0x9f   :  { %p6643_p2 = pnand %p6641_p1, %p6638_p0 }
  0xa1   :  { %6646 = shalt.err (!%p6643_p2)
}
  0xa2   :  { %s6647_s26 = scalar_lea.vmem %s7164_s3, 512  ;;  %p6652_p4 = scmp.lt.s32.totalorder %s7164_s3, %s7164_s3 }
  0xa3   :  { %p6648_p3 = scmp.ne.s32.totalorder %s7164_s3, %s6647_s26  ;;  %p6653_p5 = scmp.lt.s32.totalorder %s6647_s26, %s6647_s26 }
  0xa5   :  { %p6654_p6 = por %p6653_p5, %p6652_p4 }
  0xa7   :  { %p6655_p7 = pnand %p6654_p6, %p6648_p3 }
  0xa9   :  { %6658 = shalt.err (!%p6655_p7)
}
  0xaa   :  { %211 = dma.hbm_to_vmem [thread:$0]  %s7918_s16, 512, %s7164_s3, [#allocation27], %s7949_s1, %s7949_s1, %s7948_s9  }
  0xab   :  { %s6933_s30 = smov [#allocation2]   ;;  %s6934_s27 = smov [#allocation7]  }
  0xac   :  { %s43_s23 = sshll.u32 %s6933_s30, 4  ;;  %s68_s4 = sshll.u32 %s6934_s27, 4  ;;  %s44_s23 = int_to_ptr.vmem [resolvable:$true] %s43_s23  ;;  %s69_s4 = int_to_ptr.vmem [resolvable:$true] %s68_s4 }
  0xad   :  { %s7950_s5 = sld [smem:[#allocation43_spill]] }
  0xb3   :  { %s6659_s22 = scalar_lea.hbm %s7950_s5, 512 }
  0xb4   :  { %p6660_p8 = scmp.ne.s32.totalorder %s7950_s5, %s6659_s22  ;;  %p6663_p9 = scmp.lt.u32.totalorder %s6659_s22, %s7950_s5 }
  0xb6   :  { %p6665_p10 = pnand %p6663_p9, %p6660_p8 }
  0xb8   :  { %6668 = shalt.err (!%p6665_p10)
}
  0xb9   :  { %s6669_s16 = scalar_lea.vmem %s44_s23, 512  ;;  %p6674_p12 = scmp.lt.s32.totalorder %s44_s23, %s44_s23 }
  0xba   :  { %p6670_p11 = scmp.ne.s32.totalorder %s44_s23, %s6669_s16  ;;  %p6675_p13 = scmp.lt.s32.totalorder %s6669_s16, %s6669_s16 }
  0xbc   :  { %p6676_p0 = por %p6675_p13, %p6674_p12 }
  0xbe   :  { %p6677_p1 = pnand %p6676_p0, %p6670_p11 }
  0xc0   :  { %6680 = shalt.err (!%p6677_p1)
}
  0xc1   :  { %49 = dma.hbm_to_vmem [thread:$0]  %s7950_s5, 512, %s44_s23, [#allocation3], %s7949_s1, %s7949_s1, %s7948_s9  }
  0xc2   :  { %s7951_s14 = sld [smem:[#allocation45_spill]] }
  0xc8   :  { %s6681_s7 = scalar_lea.hbm %s7951_s14, 16 }
  0xc9   :  { %p6682_p2 = scmp.ne.s32.totalorder %s7951_s14, %s6681_s7  ;;  %p6685_p3 = scmp.lt.u32.totalorder %s6681_s7, %s7951_s14 }
  0xcb   :  { %p6687_p4 = pnand %p6685_p3, %p6682_p2 }
  0xcd   :  { %6690 = shalt.err (!%p6687_p4)
}
  0xce   :  { %s6691_s22 = scalar_lea.vmem %s69_s4, 16  ;;  %s6695_s2 = scalar_lea.vmem %s69_s4, 32 }
  0xcf   :  { %p6692_p5 = scmp.ne.s32.totalorder %s69_s4, %s6691_s22  ;;  %p6696_p6 = scmp.lt.s32.totalorder %s69_s4, %s69_s4 }
  0xd0   :  { %p6697_p7 = scmp.lt.s32.totalorder %s6695_s2, %s6691_s22 }
  0xd2   :  { %p6698_p8 = por %p6697_p7, %p6696_p6 }
  0xd4   :  { %p6699_p9 = pnand %p6698_p8, %p6692_p5 }
  0xd6   :  { %6702 = shalt.err (!%p6699_p9)
}
  0xd7   :  { %71 = dma.hbm_to_vmem [thread:$0]  %s7951_s14, 16, %s69_s4, [#allocation6]  }
  0xd8   :  { %s6935_s6 = smov [#allocation10]   ;;  %s6936_s24 = smov [#allocation13]  }
  0xd9   :  { %s88_s25 = sshll.u32 %s6935_s6, 4  ;;  %s108_s16 = sshll.u32 %s6936_s24, 4  ;;  %s89_s25 = int_to_ptr.vmem [resolvable:$true] %s88_s25  ;;  %s109_s16 = int_to_ptr.vmem [resolvable:$true] %s108_s16 }
  0xda   :  { %s7952_s0 = sld [smem:[#allocation47_spill]] }
  0xe0   :  { %s6703_s26 = scalar_lea.hbm %s7952_s0, 16 }
  0xe1   :  { %p6704_p10 = scmp.ne.s32.totalorder %s7952_s0, %s6703_s26  ;;  %p6707_p11 = scmp.lt.u32.totalorder %s6703_s26, %s7952_s0 }
  0xe3   :  { %p6709_p12 = pnand %p6707_p11, %p6704_p10 }
  0xe5   :  { %6712 = shalt.err (!%p6709_p12)
}
  0xe6   :  { %s6713_s4 = scalar_lea.vmem %s89_s25, 16  ;;  %s6717_s14 = scalar_lea.vmem %s89_s25, 32 }
  0xe7   :  { %p6714_p13 = scmp.ne.s32.totalorder %s89_s25, %s6713_s4  ;;  %p6718_p0 = scmp.lt.s32.totalorder %s89_s25, %s89_s25 }
  0xe8   :  { %p6719_p1 = scmp.lt.s32.totalorder %s6717_s14, %s6713_s4 }
  0xea   :  { %p6720_p2 = por %p6719_p1, %p6718_p0 }
  0xec   :  { %p6721_p3 = pnand %p6720_p2, %p6714_p13 }
  0xee   :  { %6724 = shalt.err (!%p6721_p3)
}
  0xef   :  { %91 = dma.hbm_to_vmem [thread:$0]  %s7952_s0, 16, %s89_s25, [#allocation9]  }
  0xf0   :  { %s7953_s5 = sld [smem:[#allocation49_spill]] }
  0xf6   :  { %s6725_s6 = scalar_lea.hbm %s7953_s5, 16 }
  0xf7   :  { %p6726_p4 = scmp.ne.s32.totalorder %s7953_s5, %s6725_s6  ;;  %p6729_p5 = scmp.lt.u32.totalorder %s6725_s6, %s7953_s5 }
  0xf9   :  { %p6731_p6 = pnand %p6729_p5, %p6726_p4 }
  0xfb   :  { %6734 = shalt.err (!%p6731_p6)
}
  0xfc   :  { %s6735_s7 = scalar_lea.vmem %s109_s16, 16  ;;  %s6739_s30 = scalar_lea.vmem %s109_s16, 32 }
  0xfd   :  { %p6736_p7 = scmp.ne.s32.totalorder %s109_s16, %s6735_s7  ;;  %p6740_p8 = scmp.lt.s32.totalorder %s109_s16, %s109_s16 }
  0xfe   :  { %p6741_p9 = scmp.lt.s32.totalorder %s6739_s30, %s6735_s7 }
 0x100   :  { %p6742_p10 = por %p6741_p9, %p6740_p8 }
 0x102   :  { %p6743_p11 = pnand %p6742_p10, %p6736_p7 }
 0x104   :  { %6746 = shalt.err (!%p6743_p11)
}
 0x105   :  { %111 = dma.hbm_to_vmem [thread:$0]  %s7953_s5, 16, %s109_s16, [#allocation12]  }
 0x106   :  { %s6937_s27 = smov [#allocation16]   ;;  %s6938_s4 = smov [#allocation19]  }
 0x107   :  { %s127_s12 = sshll.u32 %s6937_s27, 4  ;;  %s152_s14 = sshll.u32 %s6938_s4, 4  ;;  %s128_s12 = int_to_ptr.vmem [resolvable:$true] %s127_s12  ;;  %s153_s14 = int_to_ptr.vmem [resolvable:$true] %s152_s14 }
 0x108   :  { %s6747_s2 = scalar_lea.hbm %s7910_s8, 512 }
 0x109   :  { %p6748_p12 = scmp.ne.s32.totalorder %s7910_s8, %s6747_s2  ;;  %p6751_p13 = scmp.lt.u32.totalorder %s6747_s2, %s7910_s8 }
 0x10b   :  { %p6753_p0 = pnand %p6751_p13, %p6748_p12 }
 0x10d   :  { %6756 = shalt.err (!%p6753_p0)
}
 0x10e   :  { %s6757_s16 = scalar_lea.vmem %s128_s12, 512  ;;  %p6762_p2 = scmp.lt.s32.totalorder %s128_s12, %s128_s12 }
 0x10f   :  { %p6758_p1 = scmp.ne.s32.totalorder %s128_s12, %s6757_s16  ;;  %p6763_p3 = scmp.lt.s32.totalorder %s6757_s16, %s6757_s16 }
 0x111   :  { %p6764_p4 = por %p6763_p3, %p6762_p2 }
 0x113   :  { %p6765_p5 = pnand %p6764_p4, %p6758_p1 }
 0x115   :  { %6768 = shalt.err (!%p6765_p5)
}
 0x116   :  { %133 = dma.hbm_to_vmem [thread:$0]  %s7910_s8, 512, %s128_s12, [#allocation15], %s7949_s1, %s7949_s1, %s7948_s9  }
 0x117   :  { %s6769_s30 = scalar_lea.hbm %s7913_s11, 16 }
 0x118   :  { %p6770_p6 = scmp.ne.s32.totalorder %s7913_s11, %s6769_s30  ;;  %p6773_p7 = scmp.lt.u32.totalorder %s6769_s30, %s7913_s11 }
 0x11a   :  { %p6775_p8 = pnand %p6773_p7, %p6770_p6 }
 0x11c   :  { %6778 = shalt.err (!%p6775_p8)
}
 0x11d   :  { %s6779_s29 = scalar_lea.vmem %s153_s14, 16  ;;  %s6783_s22 = scalar_lea.vmem %s153_s14, 32 }
 0x11e   :  { %p6780_p9 = scmp.ne.s32.totalorder %s153_s14, %s6779_s29  ;;  %p6784_p10 = scmp.lt.s32.totalorder %s153_s14, %s153_s14 }
 0x11f   :  { %p6785_p11 = scmp.lt.s32.totalorder %s6783_s22, %s6779_s29 }
 0x121   :  { %p6786_p12 = por %p6785_p11, %p6784_p10 }
 0x123   :  { %p6787_p13 = pnand %p6786_p12, %p6780_p9 }
 0x125   :  { %6790 = shalt.err (!%p6787_p13)
}
 0x126   :  { %155 = dma.hbm_to_vmem [thread:$0]  %s7913_s11, 16, %s153_s14, [#allocation18]  }
 0x127   :  { %s6939_s2 = smov [#allocation22]   ;;  %s6940_s6 = smov [#allocation25]  }
 0x128   :  { %s174_s23 = sshll.u32 %s6939_s2, 4  ;;  %s196_s24 = sshll.u32 %s6940_s6, 4  ;;  %s175_s23 = int_to_ptr.vmem [resolvable:$true] %s174_s23  ;;  %s197_s24 = int_to_ptr.vmem [resolvable:$true] %s196_s24 }
 0x129   :  { %s6791_s5 = scalar_lea.hbm %s7915_s13, 16 }
 0x12a   :  { %p6792_p0 = scmp.ne.s32.totalorder %s7915_s13, %s6791_s5  ;;  %p6795_p1 = scmp.lt.u32.totalorder %s6791_s5, %s7915_s13 }
 0x12c   :  { %p6797_p2 = pnand %p6795_p1, %p6792_p0 }
 0x12e   :  { %6800 = shalt.err (!%p6797_p2)
}
 0x12f   :  { %s6801_s11 = scalar_lea.vmem %s175_s23, 16  ;;  %s6805_s14 = scalar_lea.vmem %s175_s23, 32 }
 0x130   :  { %p6802_p3 = scmp.ne.s32.totalorder %s175_s23, %s6801_s11  ;;  %p6806_p4 = scmp.lt.s32.totalorder %s175_s23, %s175_s23 }
 0x131   :  { %p6807_p5 = scmp.lt.s32.totalorder %s6805_s14, %s6801_s11 }
 0x133   :  { %p6808_p6 = por %p6807_p5, %p6806_p4 }
 0x135   :  { %p6809_p7 = pnand %p6808_p6, %p6802_p3 }
 0x137   :  { %6812 = shalt.err (!%p6809_p7)
}
 0x138   :  { %177 = dma.hbm_to_vmem [thread:$0]  %s7915_s13, 16, %s175_s23, [#allocation21]  }
 0x139   :  { %s6813_s29 = scalar_lea.hbm %s7917_s15, 16 }
 0x13a   :  { %p6814_p8 = scmp.ne.s32.totalorder %s7917_s15, %s6813_s29  ;;  %p6817_p9 = scmp.lt.u32.totalorder %s6813_s29, %s7917_s15 }
 0x13c   :  { %p6819_p10 = pnand %p6817_p9, %p6814_p8 }
 0x13e   :  { %6822 = shalt.err (!%p6819_p10)
}
 0x13f   :  { %s6823_s6 = scalar_lea.vmem %s197_s24, 16  ;;  %s6827_s3 = scalar_lea.vmem %s197_s24, 32 }
 0x140   :  { %p6824_p11 = scmp.ne.s32.totalorder %s197_s24, %s6823_s6  ;;  %p6828_p12 = scmp.lt.s32.totalorder %s197_s24, %s197_s24 }
 0x141   :  { %p6829_p13 = scmp.lt.s32.totalorder %s6827_s3, %s6823_s6 }
 0x143   :  { %p6830_p0 = por %p6829_p13, %p6828_p12 }
 0x145   :  { %p6831_p1 = pnand %p6830_p0, %p6824_p11 }
 0x147   :  { %6834 = shalt.err (!%p6831_p1)
}
 0x148   :  { %199 = dma.hbm_to_vmem [thread:$0]  %s7917_s15, 16, %s197_s24, [#allocation24]  }
 0x149   :  { %s6941_s16 = smov [#allocation28]   ;;  %s6942_s28 = smov [#allocation29]  }
 0x14a   :  { %s218_s5 = sshll.u32 %s6941_s16, 4  ;;  %s231_s26 = sshll.u32 %s6942_s28, 4  ;;  %s219_s5 = int_to_ptr.vmem [resolvable:$true] %s218_s5  ;;  %s7303_s26 = int_to_ptr.vmem [resolvable:$true] %s231_s26 }
 0x14b   :  { %s6835_s11 = scalar_lea.hbm %s7919_s17, 16 }
 0x14c   :  { %p6836_p2 = scmp.ne.s32.totalorder %s7919_s17, %s6835_s11  ;;  %p6839_p3 = scmp.lt.u32.totalorder %s6835_s11, %s7919_s17 }
 0x14e   :  { %p6841_p4 = pnand %p6839_p3, %p6836_p2 }
 0x150   :  { %6844 = shalt.err (!%p6841_p4)
}
 0x151   :  { %s6845_s15 = scalar_lea.vmem %s219_s5, 16  ;;  %s6849_s24 = scalar_lea.vmem %s219_s5, 32 }
 0x152   :  { %p6846_p5 = scmp.ne.s32.totalorder %s219_s5, %s6845_s15  ;;  %p6850_p6 = scmp.lt.s32.totalorder %s219_s5, %s219_s5 }
 0x153   :  { %p6851_p7 = scmp.lt.s32.totalorder %s6849_s24, %s6845_s15 }
 0x155   :  { %p6852_p8 = por %p6851_p7, %p6850_p6 }
 0x157   :  { %p6853_p9 = pnand %p6852_p8, %p6846_p5 }
 0x159   :  { %6856 = shalt.err (!%p6853_p9)
}
 0x15a   :  { %221 = dma.hbm_to_vmem [thread:$0]  %s7919_s17, 16, %s219_s5, [#allocation27]  }
 0x15b   :  { %s6857_s12 = scalar_lea.hbm %s7922_s20, 512 }
 0x15c   :  { %p6858_p10 = scmp.ne.s32.totalorder %s7922_s20, %s6857_s12  ;;  %p6861_p11 = scmp.lt.u32.totalorder %s6857_s12, %s7922_s20 }
 0x15e   :  { %p6863_p12 = pnand %p6861_p11, %p6858_p10 }
 0x160   :  { %6866 = shalt.err (!%p6863_p12)
}
 0x161   :  { %s6867_s23 = scalar_lea.vmem %s7303_s26, 512  ;;  %p6872_p0 = scmp.lt.s32.totalorder %s7303_s26, %s7303_s26 }
 0x162   :  { %p6868_p13 = scmp.ne.s32.totalorder %s7303_s26, %s6867_s23  ;;  %p6873_p1 = scmp.lt.s32.totalorder %s6867_s23, %s6867_s23 }
 0x164   :  { %p6874_p2 = por %p6873_p1, %p6872_p0 }
 0x166   :  { %p6875_p3 = pnand %p6874_p2, %p6868_p13 }
 0x168   :  { %6878 = shalt.err (!%p6875_p3)
}
 0x169   :  { %237 = dma.hbm_to_vmem [thread:$0]  %s7922_s20, 512, %s7303_s26, [#allocation30], %s7949_s1, %s7949_s1, %s7948_s9  }
 0x16a   :  { %6901 = dma.done.wait [#allocation3], 512  }
 0x16b   :  { %6902 = vsyncadd [#allocation3], 4294966784 }
 0x16c   :  { %6903 = dma.done.wait [#allocation6], 528  }
 0x16d   :  { %6904 = vsyncadd [#allocation6], 4294966768 }
 0x16e   :  { %6905 = dma.done.wait [#allocation9], 32  }
 0x16f   :  { %6906 = vsyncadd [#allocation9], 4294967264 }
 0x170   :  { %6907 = dma.done.wait [#allocation12], 32  }
 0x171   :  { %6908 = vsyncadd [#allocation12], 4294967264 }
 0x172   :  { %6909 = dma.done.wait [#allocation15], 528  }
 0x173   :  { %6910 = vsyncadd [#allocation15], 4294966768 }
 0x174   :  { %6911 = dma.done.wait [#allocation18], 32  }
 0x175   :  { %6912 = vsyncadd [#allocation18], 4294967264 }
 0x176   :  { %6913 = dma.done.wait [#allocation21], 528  }
 0x177   :  { %6914 = vsyncadd [#allocation21], 4294966768 }
 0x178   :  { %6915 = dma.done.wait [#allocation24], 528  }
 0x179   :  { %6916 = vsyncadd [#allocation24], 4294966768 }
 0x17a   :  { %6917 = dma.done.wait [#allocation27], 528  }
 0x17b   :  { %6918 = vsyncadd [#allocation27], 4294966768 }
 0x17c   :  { %6919 = dma.done.wait [#allocation30], 512  }
 0x17d   :  { %6920 = vsyncadd [#allocation30], 4294966784  ;;  %vm313_vm0 = vcmask 261120   ;;  %v303_v0 = vld [vmem:[#allocation2] sm:$0xff]  ;;  %v305_v1 = vld [vmem:[#allocation2 + $0x10] sm:$0xff]  ;;  %vm506_vm1 = vcmask 64512  }
 0x17e   :  { %v304_v2 = vld [vmem:[#allocation2 + $0x8] sm:$0xff]  ;;  %v314_v3 = vsel %vm313_vm0, %v303_v0, 0.0  ;;  %v320_v4 = vsel %vm313_vm0, %v305_v1, 0.0  ;;  %v306_v5 = vld [vmem:[#allocation2 + $0x18] sm:$0xff]  ;;  %v5197_v47 = vld [vmem:[#allocation7] ss:$0 sm:$0xff] }
 0x17f   :  { %315 = vadd.xlane.f32.xlu0 %v314_v3  ;;  %321 = vadd.xlane.f32.xlu1 %v320_v4  ;;  %v317_v6 = vsel %vm313_vm0, %v304_v2, 0.0  ;;  %v323_v7 = vsel %vm313_vm0, %v306_v5, 0.0  ;;  %v387_v28 = vld [vmem:[#allocation16] sm:$0xff]  ;;  %v388_v29 = vld [vmem:[#allocation16 + $0x8] sm:$0xff]  ;;  %v389_v30 = vld [vmem:[#allocation16 + $0x10] sm:$0xff]  ;;  %s6943_s20 = smov 96  }
 0x180   :  { %v5924_v31 = vpack.c.bf16 %v388_v29, %v387_v28  ;;  %v390_v32 = vld [vmem:[#allocation16 + $0x18] sm:$0xff]  ;;  %v5198_v49 = vld [vmem:[#allocation8] ss:$0 sm:$0xff]  ;;  %vm7387_vm2 = vmpackc.low %vm506_vm1, %vm506_vm1  ;;  %vm687_vm5 = vcmask 130048   ;;  %s6945_s5 = smov 64   ;;  %s6946_s28 = smov 88  }
 0x181   :  { %v5928_v33 = vpack.c.bf16 %v390_v32, %v389_v30  ;;  %s6947_s26 = smov 120   ;;  %s6948_s7 = smov 56  }
 0x182   :  { %5925 = vmatprep.subr.bf16.mxu0 %v5924_v31  ;;  %s6949_s30 = smov 80   ;;  %s6950_s11 = smov 112  }
 0x183   :  { %318 = vadd.xlane.f32.xlu0 %v317_v6  ;;  %324 = vadd.xlane.f32.xlu1 %v323_v7  ;;  %s6951_s15 = smov 48   ;;  %s6952_s24 = smov 72  }
 0x184   :  { %5927 = vmatpush3.bf16.msra.mxu0 %v5924_v31  ;;  %s6953_s4 = smov 104   ;;  %s6954_s8 = smov 40  }
 0x185   :  { %5929 = vmatprep.subr.bf16.mxu0 %v5928_v33 }
 0x188   :  { %5931 = vmatpush3.bf16.msra.mxu0 %v5928_v33 }
 0x20c   :  { %v316_v8 = vpop.xlane.xlu0 %315  ;;  %v322_v9 = vpop.xlane.xlu1 %321 }
 0x20d   :  { %v327_v10 = vmul.f32 0.03125, %v316_v8  ;;  %v329_v11 = vmul.f32 0.03125, %v322_v9 }
 0x20f   :  { %v331_v12 = vsub.f32 %v303_v0, %v327_v10  ;;  %v333_v13 = vsub.f32 %v305_v1, %v329_v11  ;;  %v5199_v0 = vld [vmem:[#allocation17] ss:$0 sm:$0xff] }
 0x210   :  { %v319_v14 = vpop.xlane.xlu0 %318  ;;  %v325_v15 = vpop.xlane.xlu1 %324 }
 0x211   :  { %v328_v16 = vmul.f32 0.03125, %v319_v14  ;;  %v330_v17 = vmul.f32 0.03125, %v325_v15  ;;  %v335_v18 = vmul.f32 %v331_v12, %v331_v12  ;;  %v337_v19 = vmul.f32 %v333_v13, %v333_v13 }
 0x213   :  { %v332_v20 = vsub.f32 %v304_v2, %v328_v16  ;;  %v334_v21 = vsub.f32 %v306_v5, %v330_v17  ;;  %v339_v22 = vsel %vm313_vm0, %v335_v18, 0.0  ;;  %v345_v23 = vsel %vm313_vm0, %v337_v19, 0.0 }
 0x214   :  { %340 = vadd.xlane.f32.xlu0 %v339_v22 }
 0x215   :  { %v336_v24 = vmul.f32 %v332_v20, %v332_v20  ;;  %v338_v25 = vmul.f32 %v334_v21, %v334_v21 }
 0x217   :  { %v342_v26 = vsel %vm313_vm0, %v336_v24, 0.0  ;;  %v348_v27 = vsel %vm313_vm0, %v338_v25, 0.0  ;;  %v6944_v25 = vmov -1e+30  }
 0x218   :  { %346 = vadd.xlane.f32.xlu0 %v345_v23  ;;  %343 = vadd.xlane.f32.xlu1 %v342_v26 }
 0x21c   :  { %349 = vadd.xlane.f32.xlu1 %v348_v27 }
 0x2a1   :  { %v341_v34 = vpop.xlane.xlu0 %340 }
 0x2a2   :  { %v351_v35 = vmul.f32 0.03125, %v341_v34 }
 0x2a4   :  { %v355_v36 = vadd.f32 1e-05, %v351_v35 }
 0x2a5   :  { %v344_v37 = vpop.xlane.xlu1 %343  ;;  %v347_v38 = vpop.xlane.xlu0 %346 }
 0x2a6   :  { %6331 = vrsqrt.f32 %v355_v36  ;;  %v352_v39 = vmul.f32 0.03125, %v344_v37  ;;  %v353_v40 = vmul.f32 0.03125, %v347_v38 }
 0x2a8   :  { %v356_v41 = vadd.f32 1e-05, %v352_v39  ;;  %v357_v42 = vadd.f32 1e-05, %v353_v40 }
 0x2a9   :  { %v350_v43 = vpop.xlane.xlu1 %349 }
 0x2aa   :  { %6333 = vrsqrt.f32 %v356_v41  ;;  %v354_v44 = vmul.f32 0.03125, %v350_v43 }
 0x2ab   :  { %6335 = vrsqrt.f32 %v357_v42 }
 0x2ac   :  { %v358_v45 = vadd.f32 1e-05, %v354_v44 }
 0x2ae   :  { %6337 = vrsqrt.f32 %v358_v45 }
 0x2b0   :  { %v6332_v46 = vpop.eup %6331 }
 0x2b1   :  { %v363_v48 = vmul.f32 %v6332_v46, %v331_v12 }
 0x2b3   :  { %v373_v50 = vmul.f32 %v5197_v47, %v363_v48 }
 0x2b4   :  { %v6334_v51 = vpop.eup %6333 }
 0x2b5   :  { %v6336_v52 = vpop.eup %6335  ;;  %v7345_v53 = vadd.f32 %v5198_v49, %v373_v50  ;;  %v364_v54 = vmul.f32 %v6334_v51, %v332_v20  ;;  %v294_v20 = vlaneseq }
 0x2b6   :  { %v365_v55 = vmul.f32 %v6336_v52, %v333_v13 }
 0x2b7   :  { %5574 = vmatprep.mubr.msk.f32.mxu0 %vm313_vm0, %v7345_v53  ;;  %v374_v56 = vmul.f32 %v5197_v47, %v364_v54  ;;  %v298_v23 = vand.u32 127, %v294_v20 }
 0x2b8   :  { %v6338_v57 = vpop.eup %6337  ;;  %v375_v58 = vmul.f32 %v5197_v47, %v365_v55 }
 0x2b9   :  { %v7349_v59 = vadd.f32 %v5198_v49, %v374_v56  ;;  %v366_v60 = vmul.f32 %v6338_v57, %v334_v21  ;;  %v295_v21 = vshrl.u32 %v294_v20, 7 }
 0x2ba   :  { %v7351_v61 = vadd.f32 %v5198_v49, %v375_v58 }
 0x2bb   :  { %5575 = vmatmul.mubr.msk.f32.vlgmr.msra.gmra.mrb[0].mxu0 %vm313_vm0, %v7349_v59  ;;  %v376_v62 = vmul.f32 %v5197_v47, %v366_v60  ;;  %v296_v22 = vadd.s32 8, %v295_v21  ;;  %vm299_vm4 = vcmp.le.s32.totalorder %v298_v23, %v295_v21 }
 0x2bc   :  { %5577 = vmatprep.mubr.msk.f32.mxu0 %vm313_vm0, %v7351_v61  ;;  %v7405_v29 = vsel %vm299_vm4, 0.0, %v6944_v25 }
 0x2bd   :  { %v7357_v63 = vadd.f32 %v5198_v49, %v376_v62  ;;  %vm300_vm3 = vcmp.le.s32.totalorder %v298_v23, %v296_v22 }
 0x2be   :  { %v7403_v26 = vsel %vm300_vm3, 0.0, %v6944_v25 }
 0x2bf   :  { %5578 = vmatmul.mubr.msk.f32.gmra.mrb[2].mxu0 %vm313_vm0, %v7357_v63 }
 0x38e   :  { %v5576_v1 = vpop.f32.mrb[0].mxu0 }
 0x38f   :  { %v7361_v2 = vadd.f32 %v5576_v1, %v5199_v0  ;;  %v476_v3 = vpop.f32.mrb[1].mxu0 }
 0x390   :  { %v7363_v4 = vadd.f32 %v5199_v0, %v476_v3 }
 0x392   :  { %v5579_v5 = vpop.f32.mrb[2].mxu0  ;;  %5584 = vmatprep.mubr.msk.f32.mxu1 %vm506_vm1, %v7363_v4  ;;  %v7369_v6 = vpack.i.bf16 %v7361_v2, %v7363_v4 }
 0x393   :  { %v7371_v7 = vadd.f32 %v5579_v5, %v5199_v0  ;;  %v486_v8 = vpop.f32.mrb[3].mxu0 }
 0x394   :  { %v7373_v9 = vadd.f32 %v5199_v0, %v486_v8  ;;  %6182 = vrot.lane.b32.xlu0 %v7369_v6, %s6943_s20 }
 0x396   :  { %5591 = vmatprep.mubr.msk.f32.mxu0 %vm506_vm1, %v7373_v9  ;;  %v7381_v10 = vpack.i.bf16 %v7371_v7, %v7373_v9 }
 0x398   :  { %6187 = vrot.lane.b32.xlu1 %v7381_v10, %s6943_s20 }
 0x406   :  { %v6183_v11 = vpop.permute.xlu0 %6182 }
 0x407   :  { %v6185_v12 = vunpack.i.h.bf16 %v6183_v11  ;;  %v6184_v13 = vunpack.i.l.bf16 %v6183_v11 }
 0x409   :  { %v5932_v15 = vpack.c.bf16 %v6185_v12, %v6184_v13 }
 0x40a   :  { %v6188_v16 = vpop.permute.xlu1 %6187 }
 0x40b   :  { %v6190_v17 = vunpack.i.h.bf16 %v6188_v16  ;;  %v6189_v18 = vunpack.i.l.bf16 %v6188_v16  ;;  %5934 = vmatprep.subr.msk.bf16.mxu1 %vm7387_vm2, %v5932_v15 }
 0x40c   :  { %5937 = vmatpush3.bf16.xpose.msk.msra.mxu1 %vm7387_vm2, %v5932_v15 }
 0x40d   :  { %v5938_v19 = vpack.c.bf16 %v6190_v17, %v6189_v18 }
 0x40f   :  { %5940 = vmatprep.subr.msk.bf16.mxu0 %vm7387_vm2, %v5938_v19 }
 0x410   :  { %5943 = vmatpush3.bf16.xpose.msk.msra.mxu0 %vm7387_vm2, %v5938_v19 }
 0x413   :  { %5585 = vmatmul.mubr.msk.f32.vlgmr.msra.gmra.mrb[0].mxu1 %vm506_vm1, %v7361_v2 }
 0x417   :  { %5592 = vmatmul.mubr.msk.f32.vlgmr.msra.gmra.mrb[4].mxu0 %vm506_vm1, %v7371_v7 }
 0x4e6   :  { %v5586_v24 = vpop.f32.mrb[0].mxu1 }
 0x4e7   :  { %v680_v27 = vmul.f32 0.35355338, %v5586_v24  ;;  %v581_v28 = vpop.f32.mrb[1].mxu1 }
 0x4e8   :  { %v679_v30 = vmul.f32 0.35355338, %v581_v28 }
 0x4e9   :  { %v684_v31 = vadd.f32 %v680_v27, %v7403_v26 }
 0x4ea   :  { %v5593_v32 = vpop.f32.mrb[4].mxu0  ;;  %v683_v33 = vadd.f32 %v679_v30, %v7405_v29 }
 0x4eb   :  { %v682_v34 = vmul.f32 0.35355338, %v5593_v32  ;;  %v670_v35 = vpop.f32.mrb[5].mxu0  ;;  %v691_v36 = vsel %vm687_vm5, %v684_v31, -inf }
 0x4ec   :  { %v681_v37 = vmul.f32 0.35355338, %v670_v35  ;;  %692 = vmax.xlane.f32.xlu0 %v691_v36  ;;  %v688_v38 = vsel %vm687_vm5, %v683_v33, -inf }
 0x4ed   :  { %689 = vmax.xlane.f32.xlu1 %v688_v38  ;;  %v686_v39 = vadd.f32 %v682_v34, %v7403_v26 }
 0x4ee   :  { %v685_v40 = vadd.f32 %v681_v37, %v7405_v29 }
 0x4ef   :  { %v697_v41 = vsel %vm687_vm5, %v686_v39, -inf }
 0x4f0   :  { %v694_v42 = vsel %vm687_vm5, %v685_v40, -inf }
 0x4f1   :  { %695 = vmax.xlane.f32.xlu0 %v694_v42  ;;  %698 = vmax.xlane.f32.xlu1 %v697_v41 }
 0x502   :  { %6197 = vrot.lane.b32.xlu1 %v7381_v10, %s6945_s5 }
 0x506   :  { %6202 = vrot.lane.b32.xlu1 %v7369_v6, %s6946_s28 }
 0x507   :  { %6192 = vrot.lane.b32.xlu0 %v7369_v6, %s6945_s5 }
 0x50a   :  { %906 = vrot.lane.b32.xlu1 %v7363_v4, %s6947_s26 }
 0x579   :  { %v693_v43 = vpop.xlane.xlu0 %692 }
 0x57a   :  { %v701_v44 = vsub.f32 %v684_v31, %v693_v43  ;;  %v690_v45 = vpop.xlane.xlu1 %689 }
 0x57b   :  { %v700_v46 = vsub.f32 %v683_v33, %v690_v45 }
 0x57c   :  { %v706_v47 = vmul.f32 1.442695, %v701_v44 }
 0x57d   :  { %v704_v48 = vmul.f32 1.442695, %v700_v46 }
 0x57e   :  { %6339 = vpow2.f32 %v706_v47  ;;  %v696_v49 = vpop.xlane.xlu0 %695  ;;  %v699_v50 = vpop.xlane.xlu1 %698 }
 0x57f   :  { %6341 = vpow2.f32 %v704_v48  ;;  %v702_v51 = vsub.f32 %v685_v40, %v696_v49  ;;  %v703_v52 = vsub.f32 %v686_v39, %v699_v50 }
 0x581   :  { %v708_v54 = vmul.f32 1.442695, %v702_v51  ;;  %v710_v55 = vmul.f32 1.442695, %v703_v52 }
 0x582   :  { %v6193_v56 = vpop.permute.xlu0 %6192  ;;  %v6198_v57 = vpop.permute.xlu1 %6197 }
 0x583   :  { %6343 = vpow2.f32 %v708_v54  ;;  %v6195_v58 = vunpack.i.h.bf16 %v6193_v56  ;;  %v6194_v60 = vunpack.i.l.bf16 %v6193_v56  ;;  %v6200_v62 = vunpack.i.h.bf16 %v6198_v57 }
 0x584   :  { %6345 = vpow2.f32 %v710_v55  ;;  %v6199_v0 = vunpack.i.l.bf16 %v6198_v57 }
 0x585   :  { %v5944_v1 = vpack.c.bf16 %v6195_v58, %v6194_v60 }
 0x586   :  { %v6203_v3 = vpop.permute.xlu1 %6202  ;;  %v5948_v11 = vpack.c.bf16 %v6200_v62, %v6199_v0 }
 0x587   :  { %v6205_v5 = vunpack.i.h.bf16 %v6203_v3  ;;  %v6204_v8 = vunpack.i.l.bf16 %v6203_v3  ;;  %5945 = vmatprep.subr.bf16.mxu1 %v5944_v1 }
 0x588   :  { %v6340_v12 = vpop.eup %6339  ;;  %5947 = vmatpush3.bf16.msra.mxu1 %v5944_v1 }
 0x589   :  { %v6342_v13 = vpop.eup %6341  ;;  %v5952_v15 = vpack.c.bf16 %v6205_v5, %v6204_v8  ;;  %5949 = vmatprep.subr.bf16.mxu1 %v5948_v11  ;;  %v715_v16 = vsel %vm687_vm5, %v6340_v12, 0.0 }
 0x58a   :  { %716 = vadd.xlane.f32.xlu1 %v715_v16  ;;  %v907_v17 = vpop.permute.xlu1 %906  ;;  %v712_v18 = vsel %vm687_vm5, %v6342_v13, 0.0 }
 0x58b   :  { %713 = vadd.xlane.f32.xlu0 %v712_v18  ;;  %5954 = vmatprep.subr.msk.bf16.mxu0 %vm7387_vm2, %v5952_v15 }
 0x58c   :  { %5612 = vmatprep.mubr.msk.f32.mxu0 %vm506_vm1, %v907_v17  ;;  %5957 = vmatpush3.bf16.xpose.msk.msra.mxu0 %vm7387_vm2, %v5952_v15 }
 0x58d   :  { %v6344_v19 = vpop.eup %6343 }
 0x58e   :  { %v6346_v20 = vpop.eup %6345  ;;  %v718_v21 = vsel %vm687_vm5, %v6344_v19, 0.0 }
 0x58f   :  { %719 = vadd.xlane.f32.xlu0 %v718_v21  ;;  %v721_v22 = vsel %vm687_vm5, %v6346_v20, 0.0 }
 0x590   :  { %722 = vadd.xlane.f32.xlu1 %v721_v22 }
 0x5a1   :  { %908 = vrot.lane.b32.xlu1 %v7361_v2, %s6947_s26 }
 0x5a5   :  { %999 = vrot.lane.b32.xlu1 %v7371_v7, %s6947_s26  ;;  %6207 = vrot.lane.b32.xlu0 %v7381_v10, %s6946_s28 }
 0x5a9   :  { %997 = vrot.lane.b32.xlu0 %v7373_v9, %s6947_s26 }
 0x617   :  { %v717_v23 = vpop.xlane.xlu1 %716 }
 0x618   :  { %6347 = vrcp.f32 %v717_v23  ;;  %v714_v24 = vpop.xlane.xlu0 %713 }
 0x619   :  { %6349 = vrcp.f32 %v714_v24 }
 0x61c   :  { %v720_v25 = vpop.xlane.xlu0 %719 }
 0x61d   :  { %6351 = vrcp.f32 %v720_v25  ;;  %v723_v27 = vpop.xlane.xlu1 %722 }
 0x61e   :  { %6353 = vrcp.f32 %v723_v27 }
 0x620   :  { %v6208_v28 = vpop.permute.xlu0 %6207 }
 0x621   :  { %v909_v30 = vpop.permute.xlu1 %908  ;;  %v6210_v33 = vunpack.i.h.bf16 %v6208_v28  ;;  %v6209_v34 = vunpack.i.l.bf16 %v6208_v28 }
 0x622   :  { %v6348_v31 = vpop.eup %6347  ;;  %5613 = vmatmul.mubr.msk.f32.vlgmr.msra.gmra.mrb[6].mxu0 %vm506_vm1, %v909_v30 }
 0x623   :  { %v6350_v32 = vpop.eup %6349  ;;  %v729_v36 = vmul.f32 %v6348_v31, %v6340_v12  ;;  %v5958_v38 = vpack.c.bf16 %v6210_v33, %v6209_v34 }
 0x624   :  { %v728_v35 = vmul.f32 %v6350_v32, %v6342_v13  ;;  %v998_v42 = vpop.permute.xlu0 %997 }
 0x625   :  { %v1000_v43 = vpop.permute.xlu1 %999 }
 0x626   :  { %5598 = vmatprep.mubr.msk.f32.mxu1 %vm687_vm5, %v728_v35 }
 0x627   :  { %v6352_v37 = vpop.eup %6351  ;;  %5599 = vmatmul.mubr.msk.f32.vlgmr.msra.gmra.mrb[2].mxu1 %vm687_vm5, %v729_v36 }
 0x628   :  { %v6354_v39 = vpop.eup %6353  ;;  %5951 = vmatpush3.bf16.msra.mxu1 %v5948_v11  ;;  %v730_v40 = vmul.f32 %v6352_v37, %v6344_v19 }
 0x629   :  { %5960 = vmatprep.subr.msk.bf16.mxu1 %vm7387_vm2, %v5958_v38  ;;  %v731_v41 = vmul.f32 %v6354_v39, %v6346_v20 }
 0x62a   :  { %5605 = vmatprep.mubr.msk.f32.mxu1 %vm687_vm5, %v730_v40 }
 0x62b   :  { %5606 = vmatmul.mubr.msk.f32.vlgmr.msra.gmra.mrb[4].mxu1 %vm687_vm5, %v731_v41 }
 0x62c   :  { %5619 = vmatprep.mubr.msk.f32.mxu1 %vm506_vm1, %v998_v42 }
 0x631   :  { %5963 = vmatpush3.bf16.xpose.msk.msra.mxu1 %vm7387_vm2, %v5958_v38 }
 0x638   :  { %5620 = vmatmul.mubr.msk.f32.vlgmr.msra.gmra.mrb[6].mxu1 %vm506_vm1, %v1000_v43 }
 0x6f5   :  { %v5614_v44 = vpop.f32.mrb[6].mxu0 }
 0x6f6   :  { %v1089_v45 = vmul.f32 0.35355338, %v5614_v44  ;;  %v988_v46 = vpop.f32.mrb[7].mxu0 }
 0x6f7   :  { %v1088_v47 = vmul.f32 0.35355338, %v988_v46 }
 0x6f8   :  { %v1093_v48 = vadd.f32 %v1089_v45, %v7403_v26 }
 0x6f9   :  { %v1092_v49 = vadd.f32 %v1088_v47, %v7405_v29 }
 0x6fa   :  { %v7451_v50 = vpop.f32.mrb[2].mxu1  ;;  %v1099_v51 = vsel %vm687_vm5, %v1093_v48, -inf }
 0x6fb   :  { %1100 = vmax.xlane.f32.xlu1 %v1099_v51  ;;  %v7454_v52 = vpop.f32.mrb[3].mxu1  ;;  %v1096_v54 = vsel %vm687_vm5, %v1092_v49, -inf }
 0x6fc   :  { %1097 = vmax.xlane.f32.xlu0 %v1096_v54 }
 0x6fe   :  { %v7457_v55 = vpop.f32.mrb[4].mxu1 }
 0x6ff   :  { %v7459_v56 = vpop.f32.mrb[5].mxu1 }
 0x70b   :  { %v5621_v57 = vpop.f32.mrb[6].mxu1 }
 0x70c   :  { %v1079_v58 = vpop.f32.mrb[7].mxu1  ;;  %v1091_v60 = vmul.f32 0.35355338, %v5621_v57 }
 0x70d   :  { %v1090_v62 = vmul.f32 0.35355338, %v1079_v58 }
 0x70e   :  { %v1095_v3 = vadd.f32 %v1091_v60, %v7403_v26 }
 0x70f   :  { %v1094_v0 = vadd.f32 %v1090_v62, %v7405_v29 }
 0x710   :  { %v1105_v5 = vsel %vm687_vm5, %v1095_v3, -inf }
 0x711   :  { %v1102_v1 = vsel %vm687_vm5, %v1094_v0, -inf }
 0x712   :  { %1103 = vmax.xlane.f32.xlu0 %v1102_v1 }
 0x716   :  { %1106 = vmax.xlane.f32.xlu0 %v1105_v5 }
 0x788   :  { %v1101_v8 = vpop.xlane.xlu1 %1100 }
 0x789   :  { %v1109_v11 = vsub.f32 %v1093_v48, %v1101_v8  ;;  %v1098_v12 = vpop.xlane.xlu0 %1097 }
 0x78a   :  { %v1108_v13 = vsub.f32 %v1092_v49, %v1098_v12 }
 0x78b   :  { %v1114_v15 = vmul.f32 1.442695, %v1109_v11 }
 0x78c   :  { %v1112_v16 = vmul.f32 1.442695, %v1108_v13 }
 0x78d   :  { %6355 = vpow2.f32 %v1114_v15 }
 0x78e   :  { %6357 = vpow2.f32 %v1112_v16  ;;  %v496_v16 = vld [vmem:[%s7912_s10 + $0x8] sm:$0xff] }
 0x78f   :  { %5636 = vmatprep.subr.mxu0 %v496_v16 }
 0x790   :  { %5637 = vmatpush3.msra.mxu0 %v496_v16 }
 0x797   :  { %v6356_v17 = vpop.eup %6355 }
 0x798   :  { %v6358_v18 = vpop.eup %6357  ;;  %v1123_v19 = vsel %vm687_vm5, %v6356_v17, 0.0 }
 0x799   :  { %1124 = vadd.xlane.f32.xlu1 %v1123_v19  ;;  %v1120_v20 = vsel %vm687_vm5, %v6358_v18, 0.0 }
 0x79a   :  { %1121 = vadd.xlane.f32.xlu0 %v1120_v20 }
 0x79f   :  { %v1104_v21 = vpop.xlane.xlu0 %1103 }
 0x7a0   :  { %v1110_v22 = vsub.f32 %v1094_v0, %v1104_v21 }
 0x7a2   :  { %v1116_v23 = vmul.f32 1.442695, %v1110_v22 }
 0x7a3   :  { %v1107_v24 = vpop.xlane.xlu0 %1106 }
 0x7a4   :  { %6359 = vpow2.f32 %v1116_v23  ;;  %v1111_v25 = vsub.f32 %v1095_v3, %v1107_v24 }
 0x7a6   :  { %v1118_v27 = vmul.f32 1.442695, %v1111_v25 }
 0x7a8   :  { %6361 = vpow2.f32 %v1118_v27 }
 0x7ae   :  { %v6360_v28 = vpop.eup %6359 }
 0x7af   :  { %v1126_v30 = vsel %vm687_vm5, %v6360_v28, 0.0 }
 0x7b0   :  { %1127 = vadd.xlane.f32.xlu0 %v1126_v30 }
 0x7b2   :  { %v6362_v31 = vpop.eup %6361 }
 0x7b3   :  { %v1129_v32 = vsel %vm687_vm5, %v6362_v31, 0.0 }
 0x7b4   :  { %1130 = vadd.xlane.f32.xlu1 %v1129_v32 }
 0x7c5   :  { %6217 = vrot.lane.b32.xlu1 %v7381_v10, %s6948_s7 }
 0x7c6   :  { %6212 = vrot.lane.b32.xlu0 %v7369_v6, %s6948_s7 }
 0x7c9   :  { %6222 = vrot.lane.b32.xlu1 %v7369_v6, %s6949_s30 }
 0x7ca   :  { %1508 = vrot.lane.b32.xlu0 %v7363_v4, %s6950_s11 }
 0x7cd   :  { %6227 = vrot.lane.b32.xlu1 %v7381_v10, %s6949_s30 }
 0x7ce   :  { %1599 = vrot.lane.b32.xlu0 %v7373_v9, %s6950_s11 }
 0x7d1   :  { %1510 = vrot.lane.b32.xlu1 %v7361_v2, %s6950_s11 }
 0x7d5   :  { %1601 = vrot.lane.b32.xlu1 %v7371_v7, %s6950_s11 }
 0x826   :  { %v1125_v36 = vpop.xlane.xlu1 %1124 }
 0x827   :  { %v1122_v33 = vpop.xlane.xlu0 %1121 }
 0x828   :  { %6363 = vrcp.f32 %v1122_v33 }
 0x829   :  { %6365 = vrcp.f32 %v1125_v36 }
 0x832   :  { %v6364_v34 = vpop.eup %6363 }
 0x833   :  { %v1136_v35 = vmul.f32 %v6364_v34, %v6358_v18  ;;  %v6366_v43 = vpop.eup %6365 }
 0x834   :  { %v1137_v49 = vmul.f32 %v6366_v43, %v6356_v17  ;;  %v495_v17 = vld [vmem:[%s7912_s10] sm:$0xff] }
 0x835   :  { %5626 = vmatprep.mubr.msk.f32.mxu1 %vm687_vm5, %v1136_v35  ;;  %5644 = vmatprep.subr.mxu0 %v495_v17 }
 0x83d   :  { %v1128_v37 = vpop.xlane.xlu0 %1127 }
 0x83e   :  { %6367 = vrcp.f32 %v1128_v37 }
 0x841   :  { %v1131_v38 = vpop.xlane.xlu1 %1130  ;;  %v6213_v39 = vpop.permute.xlu0 %6212 }
 0x842   :  { %6369 = vrcp.f32 %v1131_v38  ;;  %v6215_v40 = vunpack.i.h.bf16 %v6213_v39  ;;  %v6214_v41 = vunpack.i.l.bf16 %v6213_v39 }
 0x844   :  { %v5964_v42 = vpack.c.bf16 %v6215_v40, %v6214_v41 }
 0x845   :  { %v6218_v44 = vpop.permute.xlu1 %6217  ;;  %v1509_v3 = vpop.permute.xlu0 %1508 }
 0x846   :  { %v6220_v45 = vunpack.i.h.bf16 %v6218_v44  ;;  %v6219_v46 = vunpack.i.l.bf16 %v6218_v44  ;;  %5965 = vmatprep.subr.bf16.mxu1 %v5964_v42 }
 0x847   :  { %5967 = vmatpush3.bf16.msra.mxu1 %v5964_v42 }
 0x848   :  { %v6368_v47 = vpop.eup %6367  ;;  %v5968_v48 = vpack.c.bf16 %v6220_v45, %v6219_v46 }
 0x849   :  { %v6223_v51 = vpop.permute.xlu1 %6222  ;;  %v1138_v54 = vmul.f32 %v6368_v47, %v6360_v28  ;;  %v1600_v13 = vpop.permute.xlu0 %1599 }
 0x84a   :  { %v6225_v57 = vunpack.i.h.bf16 %v6223_v51  ;;  %v6224_v58 = vunpack.i.l.bf16 %v6223_v51  ;;  %5627 = vmatmul.mubr.msk.f32.vlgmr.msra.gmra.mrb[8].mxu1 %vm687_vm5, %v1137_v49  ;;  %5969 = vmatprep.subr.bf16.mxu1 %v5968_v48 }
 0x84b   :  { %5971 = vmatpush3.bf16.msra.mxu1 %v5968_v48  ;;  %5633 = vmatprep.mubr.msk.f32.mxu1 %vm687_vm5, %v1138_v54 }
 0x84c   :  { %v6370_v60 = vpop.eup %6369  ;;  %v5972_v62 = vpack.c.bf16 %v6225_v57, %v6224_v58 }
 0x84d   :  { %v1139_v0 = vmul.f32 %v6370_v60, %v6362_v31  ;;  %v6228_v1 = vpop.permute.xlu1 %6227 }
 0x84e   :  { %5974 = vmatprep.subr.msk.bf16.mxu1 %vm7387_vm2, %v5972_v62  ;;  %v6230_v5 = vunpack.i.h.bf16 %v6228_v1  ;;  %v6229_v8 = vunpack.i.l.bf16 %v6228_v1 }
 0x84f   :  { %5634 = vmatmul.mubr.msk.f32.vlgmr.msra.gmra.mrb[10].mxu1 %vm687_vm5, %v1139_v0 }
 0x850   :  { %5656 = vmatprep.mubr.msk.f32.mxu1 %vm506_vm1, %v1509_v3  ;;  %v5978_v11 = vpack.c.bf16 %v6230_v5, %v6229_v8 }
 0x851   :  { %v1511_v12 = vpop.permute.xlu1 %1510 }
 0x854   :  { %5977 = vmatpush3.bf16.xpose.msk.msra.mxu1 %vm7387_vm2, %v5972_v62 }
 0x855   :  { %5980 = vmatprep.subr.msk.bf16.mxu1 %vm7387_vm2, %v5978_v11  ;;  %v1602_v15 = vpop.permute.xlu1 %1601 }
 0x85b   :  { %5657 = vmatmul.mubr.msk.f32.vlgmr.msra.gmra.mrb[12].mxu1 %vm506_vm1, %v1511_v12 }
 0x85c   :  { %5983 = vmatpush3.bf16.xpose.msk.msra.mxu1 %vm7387_vm2, %v5978_v11  ;;  %5663 = vmatprep.mubr.msk.f32.mxu1 %vm506_vm1, %v1600_v13 }
 0x863   :  { %5664 = vmatmul.mubr.msk.f32.vlgmr.msra.gmra.mrb[14].mxu1 %vm506_vm1, %v1602_v15 }
 0x91d   :  { %v5628_v18 = vpop.f32.mrb[8].mxu1 }
 0x91e   :  { %v1218_v19 = vpop.f32.mrb[9].mxu1 }
 0x91f   :  { %5638 = vmatprep.mubr.msk.f32.mxu0 %vm506_vm1, %v1218_v19 }
 0x920   :  { %5639 = vmatmul.mubr.msk.f32.vlgmr.msra.gmra.mrb[8].mxu0 %vm506_vm1, %v5628_v18 }
 0x921   :  { %5645 = vmatpush3.msra.mxu0 %v495_v17 }
 0x922   :  { %v5635_v20 = vpop.f32.mrb[10].mxu1 }
 0x923   :  { %v1305_v21 = vpop.f32.mrb[11].mxu1 }
 0x924   :  { %5641 = vmatprep.mubr.msk.f32.mxu0 %vm506_vm1, %v1305_v21 }
 0x925   :  { %5642 = vmatmul.mubr.msk.f32.gmra.mrb[10].mxu0 %vm506_vm1, %v5635_v20 }
 0x926   :  { %5646 = vmatprep.mubr.msk.f32.mxu0 %vm506_vm1, %v7454_v52 }
 0x929   :  { %5647 = vmatmul.mubr.msk.f32.vlgmr.msra.gmra.mrb[8].mxu0 %vm506_vm1, %v7451_v50 }
 0x92a   :  { %5649 = vmatprep.mubr.msk.f32.mxu0 %vm506_vm1, %v7459_v56 }
 0x92d   :  { %5650 = vmatmul.mubr.msk.f32.gmra.mrb[10].mxu0 %vm506_vm1, %v7457_v55 }
 0x92e   :  { %v5658_v22 = vpop.f32.mrb[12].mxu1 }
 0x92f   :  { %v1691_v23 = vmul.f32 0.35355338, %v5658_v22  ;;  %v1590_v24 = vpop.f32.mrb[13].mxu1 }
 0x930   :  { %v1690_v25 = vmul.f32 0.35355338, %v1590_v24 }
 0x931   :  { %v1695_v27 = vadd.f32 %v1691_v23, %v7403_v26 }
 0x932   :  { %v1694_v28 = vadd.f32 %v1690_v25, %v7405_v29 }
 0x933   :  { %v1701_v30 = vsel %vm687_vm5, %v1695_v27, -inf }
 0x934   :  { %1702 = vmax.xlane.f32.xlu1 %v1701_v30  ;;  %v1698_v52 = vsel %vm687_vm5, %v1694_v28, -inf }
 0x935   :  { %1699 = vmax.xlane.f32.xlu0 %v1698_v52 }
 0x936   :  { %v5665_v50 = vpop.f32.mrb[14].mxu1 }
 0x937   :  { %v1681_v31 = vpop.f32.mrb[15].mxu1  ;;  %v1693_v56 = vmul.f32 0.35355338, %v5665_v50 }
 0x938   :  { %v1692_v32 = vmul.f32 0.35355338, %v1681_v31 }
 0x939   :  { %v1697_v34 = vadd.f32 %v1693_v56, %v7403_v26 }
 0x93a   :  { %v1696_v55 = vadd.f32 %v1692_v32, %v7405_v29 }
 0x93b   :  { %v1707_v35 = vsel %vm687_vm5, %v1697_v34, -inf }
 0x93c   :  { %v1704_v33 = vsel %vm687_vm5, %v1696_v55, -inf }
 0x93d   :  { %1705 = vmax.xlane.f32.xlu0 %v1704_v33 }
 0x941   :  { %1708 = vmax.xlane.f32.xlu0 %v1707_v35 }
 0x9c1   :  { %v1703_v36 = vpop.xlane.xlu1 %1702 }
 0x9c2   :  { %v1711_v37 = vsub.f32 %v1695_v27, %v1703_v36  ;;  %v1700_v38 = vpop.xlane.xlu0 %1699 }
 0x9c3   :  { %v1710_v39 = vsub.f32 %v1694_v28, %v1700_v38 }
 0x9c4   :  { %v1716_v40 = vmul.f32 1.442695, %v1711_v37 }
 0x9c5   :  { %v1714_v41 = vmul.f32 1.442695, %v1710_v39 }
 0x9c6   :  { %6371 = vpow2.f32 %v1716_v40 }
 0x9c7   :  { %6373 = vpow2.f32 %v1714_v41 }
 0x9ca   :  { %v1706_v42 = vpop.xlane.xlu0 %1705 }
 0x9cb   :  { %v1712_v43 = vsub.f32 %v1696_v55, %v1706_v42 }
 0x9cd   :  { %v1718_v44 = vmul.f32 1.442695, %v1712_v43 }
 0x9ce   :  { %v1709_v45 = vpop.xlane.xlu0 %1708 }
 0x9cf   :  { %6375 = vpow2.f32 %v1718_v44  ;;  %v1713_v46 = vsub.f32 %v1697_v34, %v1709_v45 }
 0x9d0   :  { %v6372_v47 = vpop.eup %6371 }
 0x9d1   :  { %v6374_v48 = vpop.eup %6373  ;;  %v1720_v49 = vmul.f32 1.442695, %v1713_v46  ;;  %v1725_v51 = vsel %vm687_vm5, %v6372_v47, 0.0 }
 0x9d2   :  { %1726 = vadd.xlane.f32.xlu1 %v1725_v51  ;;  %v1722_v54 = vsel %vm687_vm5, %v6374_v48, 0.0 }
 0x9d3   :  { %6377 = vpow2.f32 %v1720_v49  ;;  %1723 = vadd.xlane.f32.xlu0 %v1722_v54 }
 0x9d9   :  { %v6376_v57 = vpop.eup %6375 }
 0x9da   :  { %v1728_v58 = vsel %vm687_vm5, %v6376_v57, 0.0 }
 0x9db   :  { %1729 = vadd.xlane.f32.xlu0 %v1728_v58 }
 0x9dd   :  { %v6378_v60 = vpop.eup %6377 }
 0x9de   :  { %v1731_v62 = vsel %vm687_vm5, %v6378_v60, 0.0 }
 0x9df   :  { %1732 = vadd.xlane.f32.xlu1 %v1731_v62 }
 0x9f0   :  { %6237 = vrot.lane.b32.xlu1 %v7381_v10, %s6951_s15 }
 0x9f1   :  { %6232 = vrot.lane.b32.xlu0 %v7369_v6, %s6951_s15 }
 0x9f4   :  { %6242 = vrot.lane.b32.xlu1 %v7369_v6, %s6952_s24 }
 0x9f5   :  { %6247 = vrot.lane.b32.xlu0 %v7381_v10, %s6952_s24 }
 0x9f8   :  { %2017 = vrot.lane.b32.xlu1 %v7363_v4, %s6953_s4 }
 0x9f9   :  { %2108 = vrot.lane.b32.xlu0 %v7373_v9, %s6953_s4 }
 0x9fc   :  { %2019 = vrot.lane.b32.xlu1 %v7361_v2, %s6953_s4 }
 0xa00   :  { %2110 = vrot.lane.b32.xlu1 %v7371_v7, %s6953_s4  ;;  %v497_v7 = vld [vmem:[%s7912_s10 + $0x10] sm:$0xff] }
 0xa5f   :  { %v1727_v1 = vpop.xlane.xlu1 %1726 }
 0xa60   :  { %v1724_v0 = vpop.xlane.xlu0 %1723 }
 0xa61   :  { %6379 = vrcp.f32 %v1724_v0 }
 0xa62   :  { %6381 = vrcp.f32 %v1727_v1 }
 0xa68   :  { %v1730_v3 = vpop.xlane.xlu0 %1729 }
 0xa69   :  { %6383 = vrcp.f32 %v1730_v3 }
 0xa6b   :  { %v6380_v5 = vpop.eup %6379 }
 0xa6c   :  { %v1733_v8 = vpop.xlane.xlu1 %1732  ;;  %v6233_v11 = vpop.permute.xlu0 %6232  ;;  %v1738_v12 = vmul.f32 %v6380_v5, %v6374_v48 }
 0xa6d   :  { %6385 = vrcp.f32 %v1733_v8  ;;  %v6235_v4 = vunpack.i.h.bf16 %v6233_v11  ;;  %v6234_v13 = vunpack.i.l.bf16 %v6233_v11  ;;  %v6382_v2 = vpop.eup %6381 }
 0xa6e   :  { %5670 = vmatprep.mubr.msk.f32.mxu0 %vm687_vm5, %v1738_v12  ;;  %v1739_v22 = vmul.f32 %v6382_v2, %v6372_v47 }
 0xa6f   :  { %v5984_v9 = vpack.c.bf16 %v6235_v4, %v6234_v13 }
 0xa70   :  { %v6238_v15 = vpop.permute.xlu1 %6237  ;;  %v6248_v16 = vpop.permute.xlu0 %6247 }
 0xa71   :  { %v6240_v17 = vunpack.i.h.bf16 %v6238_v15  ;;  %v6239_v18 = vunpack.i.l.bf16 %v6238_v15  ;;  %5985 = vmatprep.subr.bf16.mxu0 %v5984_v9  ;;  %v6250_v19 = vunpack.i.h.bf16 %v6248_v16  ;;  %v6249_v20 = vunpack.i.l.bf16 %v6248_v16 }
 0xa72   :  { %5987 = vmatpush3.bf16.msra.mxu0 %v5984_v9 }
 0xa73   :  { %v6384_v21 = vpop.eup %6383  ;;  %v5988_v23 = vpack.c.bf16 %v6240_v17, %v6239_v18  ;;  %5680 = vmatprep.subr.mxu0 %v497_v7  ;;  %v5998_v30 = vpack.c.bf16 %v6250_v19, %v6249_v20 }
 0xa74   :  { %v6243_v24 = vpop.permute.xlu1 %6242  ;;  %v1740_v25 = vmul.f32 %v6384_v21, %v6376_v57  ;;  %v2109_v36 = vpop.permute.xlu0 %2108 }
 0xa75   :  { %v6245_v27 = vunpack.i.h.bf16 %v6243_v24  ;;  %v6244_v28 = vunpack.i.l.bf16 %v6243_v24  ;;  %5671 = vmatmul.mubr.msk.f32.vlgmr.msra.gmra.mrb[12].mxu0 %vm687_vm5, %v1739_v22  ;;  %5989 = vmatprep.subr.bf16.mxu1 %v5988_v23  ;;  %v308_v24 = vld [vmem:[#allocation5 + $0x8] sm:$0xff] }
 0xa76   :  { %5991 = vmatpush3.bf16.msra.mxu1 %v5988_v23  ;;  %5677 = vmatprep.mubr.msk.f32.mxu1 %vm687_vm5, %v1740_v25  ;;  %v2545_v25 = vsel %vm313_vm0, %v308_v24, 0.0 }
 0xa77   :  { %v6386_v52 = vpop.eup %6385  ;;  %v5992_v50 = vpack.c.bf16 %v6245_v27, %v6244_v28  ;;  %5681 = vmatpush3.msra.mxu0 %v497_v7  ;;  %v307_v27 = vld [vmem:[#allocation5] sm:$0xff]  ;;  %v309_v28 = vld [vmem:[#allocation5 + $0x10] sm:$0xff] }
 0xa78   :  { %v1741_v31 = vmul.f32 %v6386_v52, %v6378_v60  ;;  %6000 = vmatprep.subr.msk.bf16.mxu0 %vm7387_vm2, %v5998_v30  ;;  %v2018_v56 = vpop.permute.xlu1 %2017  ;;  %v2548_v52 = vsel %vm313_vm0, %v309_v28, 0.0 }
 0xa79   :  { %5994 = vmatprep.subr.msk.bf16.mxu1 %vm7387_vm2, %v5992_v50 }
 0xa7a   :  { %5678 = vmatmul.mubr.msk.f32.vlgmr.msra.gmra.mrb[16].mxu1 %vm687_vm5, %v1741_v31 }
 0xa7b   :  { %5692 = vmatprep.mubr.msk.f32.mxu1 %vm506_vm1, %v2018_v56 }
 0xa7c   :  { %v2020_v32 = vpop.permute.xlu1 %2019 }
 0xa7f   :  { %5997 = vmatpush3.bf16.xpose.msk.msra.mxu1 %vm7387_vm2, %v5992_v50  ;;  %v310_v50 = vld [vmem:[#allocation5 + $0x18] sm:$0xff] }
 0xa80   :  { %v2111_v37 = vpop.permute.xlu1 %2110  ;;  %v2551_v31 = vsel %vm313_vm0, %v310_v50, 0.0 }
 0xa86   :  { %5693 = vmatmul.mubr.msk.f32.vlgmr.msra.gmra.mrb[18].mxu1 %vm506_vm1, %v2020_v32 }
 0xb48   :  { %v5672_v55 = vpop.f32.mrb[12].mxu0 }
 0xb49   :  { %v1820_v33 = vpop.f32.mrb[13].mxu0 }
 0xb4a   :  { %5682 = vmatprep.mubr.msk.f32.mxu0 %vm506_vm1, %v1820_v33 }
 0xb4b   :  { %5683 = vmatmul.mubr.msk.f32.vlgmr.msra.gmra.mrb[8].mxu0 %vm506_vm1, %v5672_v55 }
 0xb4c   :  { %6003 = vmatpush3.bf16.xpose.msk.msra.mxu0 %vm7387_vm2, %v5998_v30  ;;  %v2542_v30 = vsel %vm313_vm0, %v307_v27, 0.0 }
 0xb4d   :  { %v5679_v34 = vpop.f32.mrb[16].mxu1 }
 0xb4e   :  { %v1907_v35 = vpop.f32.mrb[17].mxu1 }
 0xb4f   :  { %5685 = vmatprep.mubr.msk.f32.mxu0 %vm506_vm1, %v1907_v35 }
 0xb50   :  { %5686 = vmatmul.mubr.msk.f32.gmra.mrb[10].mxu0 %vm506_vm1, %v5679_v34 }
 0xb51   :  { %5699 = vmatprep.mubr.msk.f32.mxu0 %vm506_vm1, %v2109_v36 }
 0xb54   :  { %5700 = vmatmul.mubr.msk.f32.vlgmr.msra.gmra.mrb[14].mxu0 %vm506_vm1, %v2111_v37 }
 0xb59   :  { %v5694_v38 = vpop.f32.mrb[18].mxu1 }
 0xb5a   :  { %v2200_v39 = vmul.f32 0.35355338, %v5694_v38  ;;  %v2099_v40 = vpop.f32.mrb[19].mxu1 }
 0xb5b   :  { %v2199_v41 = vmul.f32 0.35355338, %v2099_v40 }
 0xb5c   :  { %v2204_v42 = vadd.f32 %v2200_v39, %v7403_v26 }
 0xb5d   :  { %v2203_v43 = vadd.f32 %v2199_v41, %v7405_v29 }
 0xb5e   :  { %v2210_v44 = vsel %vm687_vm5, %v2204_v42, -inf }
 0xb5f   :  { %2211 = vmax.xlane.f32.xlu1 %v2210_v44  ;;  %v2207_v45 = vsel %vm687_vm5, %v2203_v43, -inf }
 0xb60   :  { %2208 = vmax.xlane.f32.xlu0 %v2207_v45 }
 0xbec   :  { %v2212_v46 = vpop.xlane.xlu1 %2211 }
 0xbed   :  { %v2220_v47 = vsub.f32 %v2204_v42, %v2212_v46  ;;  %v2209_v54 = vpop.xlane.xlu0 %2208 }
 0xbee   :  { %v2219_v57 = vsub.f32 %v2203_v43, %v2209_v54 }
 0xbef   :  { %v2225_v48 = vmul.f32 1.442695, %v2220_v47 }
 0xbf0   :  { %v2223_v58 = vmul.f32 1.442695, %v2219_v57 }
 0xbf1   :  { %6387 = vpow2.f32 %v2225_v48 }
 0xbf2   :  { %6389 = vpow2.f32 %v2223_v58 }
 0xbfb   :  { %v7570_v49 = vpop.eup %6387 }
 0xbfc   :  { %v2234_v51 = vsel %vm687_vm5, %v7570_v49, 0.0  ;;  %v6390_v12 = vpop.eup %6389 }
 0xbfd   :  { %2235 = vadd.xlane.f32.xlu1 %v2234_v51  ;;  %v2231_v4 = vsel %vm687_vm5, %v6390_v12, 0.0 }
 0xc27   :  { %v5701_v60 = vpop.f32.mrb[14].mxu0 }
 0xc28   :  { %v2190_v62 = vpop.f32.mrb[15].mxu0  ;;  %v2202_v0 = vmul.f32 0.35355338, %v5701_v60 }
 0xc29   :  { %v2201_v1 = vmul.f32 0.35355338, %v2190_v62 }
 0xc2a   :  { %v2206_v8 = vadd.f32 %v2202_v0, %v7403_v26 }
 0xc2b   :  { %v2205_v3 = vadd.f32 %v2201_v1, %v7405_v29 }
 0xc2c   :  { %v2216_v11 = vsel %vm687_vm5, %v2206_v8, -inf }
 0xc2d   :  { %v2213_v5 = vsel %vm687_vm5, %v2205_v3, -inf }
 0xc2e   :  { %2214 = vmax.xlane.f32.xlu0 %v2213_v5 }
 0xc32   :  { %2217 = vmax.xlane.f32.xlu0 %v2216_v11 }
 0xc36   :  { %2232 = vadd.xlane.f32.xlu0 %v2231_v4 }
 0xc8a   :  { %v2236_v56 = vpop.xlane.xlu1 %2235 }
 0xcbb   :  { %v2215_v13 = vpop.xlane.xlu0 %2214 }
 0xcbc   :  { %v2221_v9 = vsub.f32 %v2205_v3, %v2215_v13 }
 0xcbe   :  { %v2227_v2 = vmul.f32 1.442695, %v2221_v9  ;;  %v498_v9 = vld [vmem:[%s7912_s10 + $0x18] sm:$0xff] }
 0xcbf   :  { %v2218_v15 = vpop.xlane.xlu0 %2217 }
 0xcc0   :  { %6391 = vpow2.f32 %v2227_v2  ;;  %v2222_v16 = vsub.f32 %v2206_v8, %v2218_v15  ;;  %v2722_v2 = vld [vmem:[#allocation23] sm:$0xff]  ;;  %v2723_v15 = vld [vmem:[#allocation23 + $0x8] sm:$0xff] }
 0xcc2   :  { %v2229_v7 = vmul.f32 1.442695, %v2222_v16  ;;  %v6020_v16 = vpack.c.bf16 %v2723_v15, %v2722_v2  ;;  %v5276_v2 = vld [vmem:[#allocation25] ss:$0 sm:$0xff] }
 0xcc3   :  { %v2233_v17 = vpop.xlane.xlu0 %2232 }
 0xcc4   :  { %6393 = vpow2.f32 %v2229_v7  ;;  %v2614_v7 = vld [vmem:[#allocation20] sm:$0xff] }
 0xcc5   :  { %6395 = vrcp.f32 %v2233_v17  ;;  %v2615_v17 = vld [vmem:[#allocation20 + $0x8] sm:$0xff] }
 0xcc6   :  { %6397 = vrcp.f32 %v2236_v56 }
 0xcca   :  { %v6392_v18 = vpop.eup %6391 }
 0xccb   :  { %v2237_v19 = vsel %vm687_vm5, %v6392_v18, 0.0 }
 0xccc   :  { %2238 = vadd.xlane.f32.xlu0 %v2237_v19 }
 0xcce   :  { %v6394_v20 = vpop.eup %6393 }
 0xccf   :  { %v6396_v21 = vpop.eup %6395  ;;  %v2240_v22 = vsel %vm687_vm5, %v6394_v20, 0.0 }
 0xcd0   :  { %2241 = vadd.xlane.f32.xlu1 %v2240_v22  ;;  %v2247_v23 = vmul.f32 %v6396_v21, %v6390_v12  ;;  %v6398_v35 = vpop.eup %6397 }
 0xcd1   :  { %v2248_v40 = vmul.f32 %v6398_v35, %v7570_v49 }
 0xcd2   :  { %5706 = vmatprep.mubr.msk.f32.mxu1 %vm687_vm5, %v2247_v23 }
 0xce1   :  { %6257 = vrot.lane.b32.xlu1 %v7381_v10, %s6954_s8 }
 0xce2   :  { %6252 = vrot.lane.b32.xlu0 %v7369_v6, %s6954_s8 }
 0xd01   :  { %2546 = vadd.xlane.f32.xlu0 %v2545_v25 }
 0xd05   :  { %2543 = vadd.xlane.f32.xlu1 %v2542_v30  ;;  %2549 = vadd.xlane.f32.xlu0 %v2548_v52 }
 0xd09   :  { %2552 = vadd.xlane.f32.xlu1 %v2551_v31 }
 0xd59   :  { %v2239_v10 = vpop.xlane.xlu0 %2238 }
 0xd5a   :  { %6399 = vrcp.f32 %v2239_v10  ;;  %v2724_v10 = vld [vmem:[#allocation23 + $0x10] sm:$0xff] }
 0xd5d   :  { %v2242_v6 = vpop.xlane.xlu1 %2241  ;;  %v6253_v32 = vpop.permute.xlu0 %6252 }
 0xd5e   :  { %6401 = vrcp.f32 %v2242_v6  ;;  %v6255_v55 = vunpack.i.h.bf16 %v6253_v32  ;;  %v6254_v33 = vunpack.i.l.bf16 %v6253_v32  ;;  %v2725_v6 = vld [vmem:[#allocation23 + $0x18] sm:$0xff]  ;;  %v5269_v32 = vld [vmem:[#allocation10] ss:$0 sm:$0xff] }
 0xd60   :  { %v6004_v34 = vpack.c.bf16 %v6255_v55, %v6254_v33 }
 0xd61   :  { %v6258_v36 = vpop.permute.xlu1 %6257 }
 0xd62   :  { %v6260_v37 = vunpack.i.h.bf16 %v6258_v36  ;;  %v6259_v38 = vunpack.i.l.bf16 %v6258_v36  ;;  %6005 = vmatprep.subr.bf16.mxu1 %v6004_v34 }
 0xd63   :  { %6007 = vmatpush3.bf16.msra.mxu1 %v6004_v34 }
 0xd64   :  { %v6400_v39 = vpop.eup %6399  ;;  %v6008_v41 = vpack.c.bf16 %v6260_v37, %v6259_v38  ;;  %v6024_v37 = vpack.c.bf16 %v2725_v6, %v2724_v10 }
 0xd65   :  { %v2249_v42 = vmul.f32 %v6400_v39, %v6392_v18  ;;  %v6012_v18 = vpack.c.bf16 %v2615_v17, %v2614_v7 }
 0xd66   :  { %5707 = vmatmul.mubr.msk.f32.vlgmr.msra.gmra.mrb[20].mxu1 %vm687_vm5, %v2248_v40  ;;  %6009 = vmatprep.subr.bf16.mxu0 %v6008_v41  ;;  %v5270_v40 = vld [vmem:[#allocation11] ss:$0 sm:$0xff] }
 0xd67   :  { %6011 = vmatpush3.bf16.msra.mxu0 %v6008_v41  ;;  %5713 = vmatprep.mubr.msk.f32.mxu0 %vm687_vm5, %v2249_v42 }
 0xd68   :  { %v6402_v43 = vpop.eup %6401  ;;  %5716 = vmatprep.subr.mxu0 %v498_v9  ;;  %6013 = vmatprep.subr.bf16.mxu1 %v6012_v18 }
 0xd69   :  { %v2250_v44 = vmul.f32 %v6402_v43, %v6394_v20  ;;  %6015 = vmatpush3.bf16.msra.mxu1 %v6012_v18 }
 0xd6b   :  { %5714 = vmatmul.mubr.msk.f32.vlgmr.msra.gmra.mrb[16].mxu0 %vm687_vm5, %v2250_v44 }
 0xd6c   :  { %5717 = vmatpush3.msra.mxu0 %v498_v9 }
 0xd6d   :  { %6021 = vmatprep.subr.bf16.mxu0 %v6020_v16 }
 0xd8e   :  { %v2547_v45 = vpop.xlane.xlu0 %2546 }
 0xd8f   :  { %v2555_v46 = vmul.f32 0.03125, %v2547_v45 }
 0xd91   :  { %v2559_v47 = vsub.f32 %v308_v24, %v2555_v46 }
 0xd92   :  { %v2544_v48 = vpop.xlane.xlu1 %2543  ;;  %v2550_v51 = vpop.xlane.xlu0 %2549 }
 0xd93   :  { %v2554_v54 = vmul.f32 0.03125, %v2544_v48  ;;  %v2556_v57 = vmul.f32 0.03125, %v2550_v51  ;;  %v2563_v49 = vmul.f32 %v2559_v47, %v2559_v47 }
 0xd95   :  { %v2558_v58 = vsub.f32 %v307_v27, %v2554_v54  ;;  %v2560_v60 = vsub.f32 %v309_v28, %v2556_v57  ;;  %v2569_v62 = vsel %vm313_vm0, %v2563_v49, 0.0  ;;  %v2616_v49 = vld [vmem:[#allocation20 + $0x10] sm:$0xff] }
 0xd96   :  { %v2553_v0 = vpop.xlane.xlu1 %2552  ;;  %2570 = vadd.xlane.f32.xlu1 %v2569_v62  ;;  %v5268_v62 = vld [vmem:[#allocation19] ss:$0 sm:$0xff] }
 0xd97   :  { %v2557_v1 = vmul.f32 0.03125, %v2553_v0  ;;  %v2562_v3 = vmul.f32 %v2558_v58, %v2558_v58  ;;  %v2564_v5 = vmul.f32 %v2560_v60, %v2560_v60 }
 0xd99   :  { %v2561_v8 = vsub.f32 %v310_v50, %v2557_v1  ;;  %v2566_v11 = vsel %vm313_vm0, %v2562_v3, 0.0  ;;  %v2572_v12 = vsel %vm313_vm0, %v2564_v5, 0.0 }
 0xd9a   :  { %2567 = vadd.xlane.f32.xlu0 %v2566_v11 }
 0xd9b   :  { %v2565_v4 = vmul.f32 %v2561_v8, %v2561_v8 }
 0xd9d   :  { %v2575_v13 = vsel %vm313_vm0, %v2565_v4, 0.0 }
 0xd9e   :  { %2573 = vadd.xlane.f32.xlu0 %v2572_v12  ;;  %2576 = vadd.xlane.f32.xlu1 %v2575_v13 }
 0xe23   :  { %v2571_v19 = vpop.xlane.xlu1 %2570 }
 0xe24   :  { %v2579_v20 = vmul.f32 0.03125, %v2571_v19 }
 0xe26   :  { %v2583_v22 = vadd.f32 1e-05, %v2579_v20 }
 0xe27   :  { %v2568_v21 = vpop.xlane.xlu0 %2567 }
 0xe28   :  { %v2578_v23 = vmul.f32 0.03125, %v2568_v21  ;;  %6403 = vrsqrt.f32 %v2583_v22 }
 0xe2a   :  { %v2582_v24 = vadd.f32 1e-05, %v2578_v23 }
 0xe2b   :  { %v2574_v25 = vpop.xlane.xlu0 %2573  ;;  %v2577_v27 = vpop.xlane.xlu1 %2576 }
 0xe2c   :  { %6405 = vrsqrt.f32 %v2582_v24  ;;  %v2580_v28 = vmul.f32 0.03125, %v2574_v25  ;;  %v2581_v30 = vmul.f32 0.03125, %v2577_v27  ;;  %v5271_v24 = vld [vmem:[#allocation22] ss:$0 sm:$0xff] }
 0xe2e   :  { %v2584_v52 = vadd.f32 1e-05, %v2580_v28  ;;  %v2585_v50 = vadd.f32 1e-05, %v2581_v30 }
 0xe30   :  { %6407 = vrsqrt.f32 %v2584_v52 }
 0xe31   :  { %6409 = vrsqrt.f32 %v2585_v50 }
 0xe32   :  { %v6404_v31 = vpop.eup %6403 }
 0xe33   :  { %v2591_v34 = vmul.f32 %v6404_v31, %v2559_v47 }
 0xe35   :  { %v2601_v42 = vmul.f32 %v5269_v32, %v2591_v34 }
 0xe36   :  { %v6406_v56 = vpop.eup %6405 }
 0xe37   :  { %v2590_v55 = vmul.f32 %v6406_v56, %v2558_v58  ;;  %v2611_v47 = vadd.f32 %v5270_v40, %v2601_v42  ;;  %v2617_v58 = vld [vmem:[#allocation20 + $0x18] sm:$0xff] }
 0xe39   :  { %v5708_v33 = vpop.f32.mrb[20].mxu1  ;;  %v2600_v38 = vmul.f32 %v5269_v32, %v2590_v55 }
 0xe3a   :  { %v6408_v35 = vpop.eup %6407  ;;  %v2329_v36 = vpop.f32.mrb[21].mxu1 }
 0xe3b   :  { %v6410_v39 = vpop.eup %6409  ;;  %5718 = vmatprep.mubr.msk.f32.mxu0 %vm506_vm1, %v2329_v36  ;;  %v2592_v41 = vmul.f32 %v6408_v35, %v2560_v60  ;;  %v2610_v45 = vadd.f32 %v5270_v40, %v2600_v38  ;;  %v6016_v60 = vpack.c.bf16 %v2617_v58, %v2616_v49 }
 0xe3c   :  { %5719 = vmatmul.mubr.msk.f32.vlgmr.msra.gmra.mrb[8].mxu0 %vm506_vm1, %v5708_v33  ;;  %v2593_v43 = vmul.f32 %v6410_v39, %v2561_v8 }
 0xe3d   :  { %6023 = vmatpush3.bf16.msra.mxu0 %v6020_v16  ;;  %v2602_v46 = vmul.f32 %v5269_v32, %v2592_v41  ;;  %6017 = vmatprep.subr.bf16.mxu1 %v6016_v60 }
 0xe3e   :  { %v5715_v44 = vpop.f32.mrb[16].mxu0  ;;  %6025 = vmatprep.subr.bf16.mxu0 %v6024_v37  ;;  %v2603_v51 = vmul.f32 %v5269_v32, %v2593_v43  ;;  %6019 = vmatpush3.bf16.msra.mxu1 %v6016_v60 }
 0xe3f   :  { %v2416_v48 = vpop.f32.mrb[17].mxu0  ;;  %v2612_v54 = vadd.f32 %v5270_v40, %v2602_v46 }
 0xe40   :  { %5721 = vmatprep.mubr.msk.f32.mxu0 %vm506_vm1, %v2416_v48  ;;  %v2613_v57 = vadd.f32 %v5270_v40, %v2603_v51 }
 0xe41   :  { %5722 = vmatmul.mubr.msk.f32.gmra.mrb[10].mxu0 %vm506_vm1, %v5715_v44 }
 0xe42   :  { %6027 = vmatpush3.bf16.msra.mxu0 %v6024_v37  ;;  %5746 = vmatprep.mubr.msk.f32.mxu0 %vm313_vm0, %v2610_v45 }
 0xe45   :  { %5747 = vmatmul.mubr.msk.f32.vlgmr.msra.gmra.mrb[18].mxu0 %vm313_vm0, %v2611_v47 }
 0xe46   :  { %5749 = vmatprep.mubr.msk.f32.mxu0 %vm313_vm0, %v2612_v54 }
 0xe49   :  { %5750 = vmatmul.mubr.msk.f32.gmra.mrb[20].mxu0 %vm313_vm0, %v2613_v57 }
 0xf0f   :  { %v5720_v0 = vpop.f32.mrb[8].mxu0 }
 0xf10   :  { %v2533_v1 = vadd.f32 %v5720_v0, %v5268_v62  ;;  %v2503_v3 = vpop.f32.mrb[9].mxu0 }
 0xf11   :  { %v2532_v5 = vadd.f32 %v5268_v62, %v2503_v3 }
 0xf12   :  { %v7611_v11 = vadd.f32 %v2533_v1, %v7349_v59 }
 0xf13   :  { %v7608_v8 = vadd.f32 %v2532_v5, %v7345_v53 }
 0xf14   :  { %v5723_v12 = vpop.f32.mrb[10].mxu0 }
 0xf15   :  { %v2535_v4 = vadd.f32 %v5723_v12, %v5268_v62  ;;  %v2513_v13 = vpop.f32.mrb[11].mxu0  ;;  %5732 = vmatprep.mubr.msk.f32.mxu1 %vm313_vm0, %v7608_v8 }
 0xf16   :  { %v2534_v9 = vadd.f32 %v5268_v62, %v2513_v13  ;;  %5733 = vmatmul.mubr.msk.f32.vlgmr.msra.gmra.mrb[22].mxu1 %vm313_vm0, %v7611_v11 }
 0xf17   :  { %v7621_v53 = vadd.f32 %v2535_v4, %v7357_v63 }
 0xf18   :  { %v7618_v15 = vadd.f32 %v2534_v9, %v7351_v61  ;;  %v5748_v16 = vpop.f32.mrb[18].mxu0 }
 0xf19   :  { %v2817_v59 = vadd.f32 %v5748_v16, %v5276_v2  ;;  %v2811_v7 = vpop.f32.mrb[19].mxu0 }
 0xf1a   :  { %5735 = vmatprep.mubr.msk.f32.mxu1 %vm313_vm0, %v7618_v15  ;;  %v2812_v17 = vadd.f32 %v5276_v2, %v2811_v7 }
 0xf1b   :  { %5736 = vmatmul.mubr.msk.f32.gmra.mrb[24].mxu1 %vm313_vm0, %v7621_v53 }
 0xf1c   :  { %v5751_v18 = vpop.f32.mrb[20].mxu0  ;;  %v6028_v19 = vpack.c.bf16 %v2817_v59, %v2812_v17  ;;  %v7627_v20 = vpack.i.bf16 %v2817_v59, %v2812_v17 }
 0xf1d   :  { %v2827_v21 = vadd.f32 %v5751_v18, %v5276_v2  ;;  %v2821_v61 = vpop.f32.mrb[21].mxu0 }
 0xf1e   :  { %v2822_v22 = vadd.f32 %v5276_v2, %v2821_v61  ;;  %6030 = vmatprep.subr.msk.bf16.mxu1 %vm7387_vm2, %v6028_v19 }
 0xf1f   :  { %6033 = vmatpush3.bf16.xpose.msk.msra.mxu1 %vm7387_vm2, %v6028_v19 }
 0xf20   :  { %v6034_v63 = vpack.c.bf16 %v2827_v21, %v2822_v22  ;;  %v7633_v23 = vpack.i.bf16 %v2827_v21, %v2822_v22 }
 0xf22   :  { %6036 = vmatprep.subr.msk.bf16.mxu0 %vm7387_vm2, %v6034_v63 }
 0xf23   :  { %6039 = vmatpush3.bf16.xpose.msk.msra.mxu0 %vm7387_vm2, %v6034_v63 }
 0xfe9   :  { %v5734_v25 = vpop.f32.mrb[22].mxu1 }
 0xfea   :  { %v2703_v27 = vpop.f32.mrb[23].mxu1  ;;  %v7641_v30 = vadd.f32 %v5734_v25, %v5271_v24 }
 0xfeb   :  { %v7639_v28 = vadd.f32 %v5271_v24, %v2703_v27 }
 0xfed   :  { %5756 = vmatprep.mubr.msk.f32.mxu1 %vm506_vm1, %v7639_v28 }
 0xfee   :  { %v5737_v52 = vpop.f32.mrb[24].mxu1  ;;  %5757 = vmatmul.mubr.msk.f32.vlgmr.msra.gmra.mrb[26].mxu1 %vm506_vm1, %v7641_v30 }
 0xfef   :  { %v2713_v50 = vpop.f32.mrb[25].mxu1  ;;  %v7649_v56 = vadd.f32 %v5737_v52, %v5271_v24 }
 0xff0   :  { %v7647_v31 = vadd.f32 %v5271_v24, %v2713_v50 }
 0xff2   :  { %5763 = vmatprep.mubr.msk.f32.mxu0 %vm506_vm1, %v7647_v31 }
 0xff3   :  { %5764 = vmatmul.mubr.msk.f32.vlgmr.msra.gmra.mrb[22].mxu0 %vm506_vm1, %v7649_v56 }
0x10c1   :  { %v5758_v10 = vpop.f32.mrb[26].mxu1 }
0x10c2   :  { %v3010_v6 = vmul.f32 0.35355338, %v5758_v10  ;;  %v2913_v32 = vpop.f32.mrb[27].mxu1 }
0x10c3   :  { %v3009_v55 = vmul.f32 0.35355338, %v2913_v32 }
0x10c4   :  { %v3014_v33 = vadd.f32 %v3010_v6, %v7403_v26 }
0x10c5   :  { %v3013_v34 = vadd.f32 %v3009_v55, %v7405_v29 }
0x10c6   :  { %v5765_v35 = vpop.f32.mrb[22].mxu0  ;;  %v3020_v36 = vsel %vm687_vm5, %v3014_v33, -inf }
0x10c7   :  { %v3012_v37 = vmul.f32 0.35355338, %v5765_v35  ;;  %3021 = vmax.xlane.f32.xlu1 %v3020_v36  ;;  %v3000_v38 = vpop.f32.mrb[23].mxu0  ;;  %v3017_v39 = vsel %vm687_vm5, %v3013_v34, -inf }
0x10c8   :  { %v3011_v40 = vmul.f32 0.35355338, %v3000_v38  ;;  %3018 = vmax.xlane.f32.xlu0 %v3017_v39 }
0x10c9   :  { %v3016_v41 = vadd.f32 %v3012_v37, %v7403_v26 }
0x10ca   :  { %v3015_v42 = vadd.f32 %v3011_v40, %v7405_v29 }
0x10cb   :  { %v3026_v43 = vsel %vm687_vm5, %v3016_v41, -inf }
0x10cc   :  { %3027 = vmax.xlane.f32.xlu1 %v3026_v43  ;;  %v3023_v44 = vsel %vm687_vm5, %v3015_v42, -inf }
0x10cd   :  { %3024 = vmax.xlane.f32.xlu0 %v3023_v44 }
0x1154   :  { %v3022_v45 = vpop.xlane.xlu1 %3021 }
0x1155   :  { %v3030_v46 = vsub.f32 %v3014_v33, %v3022_v45  ;;  %v3019_v48 = vpop.xlane.xlu0 %3018 }
0x1156   :  { %v3029_v47 = vsub.f32 %v3013_v34, %v3019_v48 }
0x1157   :  { %v3035_v51 = vmul.f32 1.442695, %v3030_v46 }
0x1158   :  { %v3033_v54 = vmul.f32 1.442695, %v3029_v47 }
0x1159   :  { %6411 = vpow2.f32 %v3035_v51  ;;  %v3028_v57 = vpop.xlane.xlu1 %3027 }
0x115a   :  { %6413 = vpow2.f32 %v3033_v54  ;;  %v3032_v49 = vsub.f32 %v3016_v41, %v3028_v57  ;;  %v3025_v58 = vpop.xlane.xlu0 %3024 }
0x115b   :  { %v3031_v60 = vsub.f32 %v3015_v42, %v3025_v58 }
0x115c   :  { %v3039_v62 = vmul.f32 1.442695, %v3032_v49 }
0x115d   :  { %v3037_v0 = vmul.f32 1.442695, %v3031_v60 }
0x115e   :  { %6415 = vpow2.f32 %v3039_v62 }
0x115f   :  { %6417 = vpow2.f32 %v3037_v0 }
0x1163   :  { %v6412_v1 = vpop.eup %6411 }
0x1164   :  { %v6414_v3 = vpop.eup %6413  ;;  %v3044_v5 = vsel %vm687_vm5, %v6412_v1, 0.0 }
0x1165   :  { %3045 = vadd.xlane.f32.xlu1 %v3044_v5  ;;  %v3041_v12 = vsel %vm687_vm5, %v6414_v3, 0.0 }
0x1166   :  { %3042 = vadd.xlane.f32.xlu0 %v3041_v12 }
0x1168   :  { %v6416_v4 = vpop.eup %6415 }
0x1169   :  { %v6418_v13 = vpop.eup %6417  ;;  %v3050_v9 = vsel %vm687_vm5, %v6416_v4, 0.0 }
0x116a   :  { %3051 = vadd.xlane.f32.xlu1 %v3050_v9  ;;  %v3047_v2 = vsel %vm687_vm5, %v6418_v13, 0.0 }
0x116b   :  { %3048 = vadd.xlane.f32.xlu0 %v3047_v2 }
0x117b   :  { %6267 = vrot.lane.b32.xlu1 %v7633_v23, %s6943_s20 }
0x117f   :  { %6272 = vrot.lane.b32.xlu1 %v7633_v23, %s6947_s26 }
0x1181   :  { %6262 = vrot.lane.b32.xlu0 %v7627_v20, %s6943_s20 }
0x1183   :  { %3326 = vrot.lane.b32.xlu1 %v7647_v31, %s6947_s26 }
0x1185   :  { %3328 = vrot.lane.b32.xlu0 %v7649_v56, %s6947_s26 }
0x1187   :  { %6277 = vrot.lane.b32.xlu1 %v7627_v20, %s6947_s26 }
0x1189   :  { %3235 = vrot.lane.b32.xlu0 %v7639_v28, %s6947_s26 }
0x118b   :  { %3237 = vrot.lane.b32.xlu1 %v7641_v30, %s6947_s26  ;;  %s6955_s26 = smov [#allocation31]  }
0x118c   :  { %s5176_s7 = sshll.u32 %s6955_s26, 4  ;;  %s5177_s7 = int_to_ptr.vmem [resolvable:$true] %s5176_s7 }
0x118d   :  { %p6884_p5 = scmp.lt.s32.totalorder %s5177_s7, %s5177_s7 }
0x11f2   :  { %v3046_v16 = vpop.xlane.xlu1 %3045 }
0x11f3   :  { %v3043_v59 = vpop.xlane.xlu0 %3042 }
0x11f4   :  { %6419 = vrcp.f32 %v3043_v59 }
0x11f5   :  { %6421 = vrcp.f32 %v3046_v16 }
0x11f7   :  { %v3052_v7 = vpop.xlane.xlu1 %3051 }
0x11f8   :  { %v3049_v17 = vpop.xlane.xlu0 %3048 }
0x11f9   :  { %6423 = vrcp.f32 %v3049_v17 }
0x11fa   :  { %6425 = vrcp.f32 %v3052_v7 }
0x11fb   :  { %v6268_v18 = vpop.permute.xlu1 %6267 }
0x11fc   :  { %v6263_v19 = vpop.permute.xlu0 %6262  ;;  %v6270_v21 = vunpack.i.h.bf16 %v6268_v18  ;;  %v6269_v61 = vunpack.i.l.bf16 %v6268_v18 }
0x11fd   :  { %v6265_v22 = vunpack.i.h.bf16 %v6263_v19  ;;  %v6264_v63 = vunpack.i.l.bf16 %v6263_v19 }
0x11fe   :  { %v6420_v24 = vpop.eup %6419  ;;  %v6044_v6 = vpack.c.bf16 %v6270_v21, %v6269_v61 }
0x11ff   :  { %v6040_v25 = vpack.c.bf16 %v6265_v22, %v6264_v63  ;;  %v6273_v27 = vpop.permute.xlu1 %6272  ;;  %v3057_v52 = vmul.f32 %v6420_v24, %v6414_v3  ;;  %v6422_v50 = vpop.eup %6421 }
0x1200   :  { %v3329_v10 = vpop.permute.xlu0 %3328  ;;  %v6275_v32 = vunpack.i.h.bf16 %v6273_v27  ;;  %v6274_v55 = vunpack.i.l.bf16 %v6273_v27  ;;  %v3058_v34 = vmul.f32 %v6422_v50, %v6412_v1 }
0x1201   :  { %6041 = vmatprep.subr.bf16.mxu1 %v6040_v25  ;;  %5770 = vmatprep.mubr.msk.f32.mxu1 %vm687_vm5, %v3057_v52 }
0x1202   :  { %6043 = vmatpush3.bf16.msra.mxu1 %v6040_v25  ;;  %v6054_v39 = vpack.c.bf16 %v6275_v32, %v6274_v55 }
0x1203   :  { %v6424_v33 = vpop.eup %6423  ;;  %v3327_v35 = vpop.permute.xlu1 %3326  ;;  %6045 = vmatprep.subr.bf16.mxu1 %v6044_v6 }
0x1204   :  { %v6426_v36 = vpop.eup %6425  ;;  %v3236_v37 = vpop.permute.xlu0 %3235  ;;  %v3059_v38 = vmul.f32 %v6424_v33, %v6418_v13 }
0x1205   :  { %5771 = vmatmul.mubr.msk.f32.vlgmr.msra.gmra.mrb[28].mxu1 %vm687_vm5, %v3058_v34  ;;  %5784 = vmatprep.mubr.msk.f32.mxu0 %vm506_vm1, %v3236_v37  ;;  %v3060_v40 = vmul.f32 %v6426_v36, %v6416_v4 }
0x1206   :  { %6047 = vmatpush3.bf16.msra.mxu1 %v6044_v6  ;;  %5777 = vmatprep.mubr.msk.f32.mxu1 %vm687_vm5, %v3059_v38 }
0x1207   :  { %v6278_v41 = vpop.permute.xlu1 %6277  ;;  %6056 = vmatprep.subr.msk.bf16.mxu1 %vm7387_vm2, %v6054_v39 }
0x1208   :  { %v6280_v42 = vunpack.i.h.bf16 %v6278_v41  ;;  %v6279_v43 = vunpack.i.l.bf16 %v6278_v41 }
0x1209   :  { %5778 = vmatmul.mubr.msk.f32.vlgmr.msra.gmra.mrb[30].mxu1 %vm687_vm5, %v3060_v40 }
0x120a   :  { %v6048_v44 = vpack.c.bf16 %v6280_v42, %v6279_v43  ;;  %5791 = vmatprep.mubr.msk.f32.mxu1 %vm506_vm1, %v3327_v35 }
0x120b   :  { %v3238_v45 = vpop.permute.xlu1 %3237 }
0x120c   :  { %6050 = vmatprep.subr.msk.bf16.mxu0 %vm7387_vm2, %v6048_v44 }
0x120d   :  { %6053 = vmatpush3.bf16.xpose.msk.msra.mxu0 %vm7387_vm2, %v6048_v44 }
0x120f   :  { %6059 = vmatpush3.bf16.xpose.msk.msra.mxu1 %vm7387_vm2, %v6054_v39 }
0x1214   :  { %5785 = vmatmul.mubr.msk.f32.vlgmr.msra.gmra.mrb[24].mxu0 %vm506_vm1, %v3238_v45 }
0x1216   :  { %5792 = vmatmul.mubr.msk.f32.vlgmr.msra.gmra.mrb[32].mxu1 %vm506_vm1, %v3329_v10 }
0x12d8   :  { %v7699_v46 = vpop.f32.mrb[28].mxu1 }
0x12d9   :  { %v7701_v48 = vpop.f32.mrb[29].mxu1 }
0x12dc   :  { %v7703_v47 = vpop.f32.mrb[30].mxu1 }
0x12dd   :  { %v7705_v51 = vpop.f32.mrb[31].mxu1 }
0x12e7   :  { %v5786_v54 = vpop.f32.mrb[24].mxu0 }
0x12e8   :  { %v3317_v57 = vpop.f32.mrb[25].mxu0  ;;  %v3418_v33 = vmul.f32 0.35355338, %v5786_v54 }
0x12e9   :  { %v5793_v49 = vpop.f32.mrb[32].mxu1  ;;  %v3417_v12 = vmul.f32 0.35355338, %v3317_v57 }
0x12ea   :  { %v3420_v58 = vmul.f32 0.35355338, %v5793_v49  ;;  %v3408_v60 = vpop.f32.mrb[33].mxu1  ;;  %v3422_v34 = vadd.f32 %v3418_v33, %v7403_v26 }
0x12eb   :  { %v3419_v62 = vmul.f32 0.35355338, %v3408_v60  ;;  %v3421_v4 = vadd.f32 %v3417_v12, %v7405_v29 }
0x12ec   :  { %v3424_v0 = vadd.f32 %v3420_v58, %v7403_v26  ;;  %v3428_v35 = vsel %vm687_vm5, %v3422_v34, -inf }
0x12ed   :  { %v3423_v1 = vadd.f32 %v3419_v62, %v7405_v29  ;;  %v3425_v13 = vsel %vm687_vm5, %v3421_v4, -inf }
0x12ee   :  { %v3434_v3 = vsel %vm687_vm5, %v3424_v0, -inf }
0x12ef   :  { %3435 = vmax.xlane.f32.xlu1 %v3434_v3  ;;  %v3431_v5 = vsel %vm687_vm5, %v3423_v1, -inf }
0x12f0   :  { %3432 = vmax.xlane.f32.xlu0 %v3431_v5 }
0x1300   :  { %6287 = vrot.lane.b32.xlu1 %v7627_v20, %s6950_s11 }
0x1304   :  { %6292 = vrot.lane.b32.xlu1 %v7633_v23, %s6950_s11 }
0x1308   :  { %3837 = vrot.lane.b32.xlu1 %v7639_v28, %s6950_s11 }
0x130c   :  { %3928 = vrot.lane.b32.xlu1 %v7647_v31, %s6950_s11 }
0x1330   :  { %3426 = vmax.xlane.f32.xlu1 %v3425_v13 }
0x1341   :  { %6297 = vrot.lane.b32.xlu1 %v7627_v20, %s6946_s28 }
0x137c   :  { %v3436_v9 = vpop.xlane.xlu1 %3435 }
0x137d   :  { %v3440_v2 = vsub.f32 %v3424_v0, %v3436_v9  ;;  %v3433_v16 = vpop.xlane.xlu0 %3432 }
0x137e   :  { %v3439_v59 = vsub.f32 %v3423_v1, %v3433_v16 }
0x137f   :  { %v3447_v7 = vmul.f32 1.442695, %v3440_v2 }
0x1380   :  { %v3445_v17 = vmul.f32 1.442695, %v3439_v59  ;;  %v6288_v22 = vpop.permute.xlu1 %6287 }
0x1381   :  { %6427 = vpow2.f32 %v3447_v7  ;;  %v6290_v41 = vunpack.i.h.bf16 %v6288_v22  ;;  %v6289_v42 = vunpack.i.l.bf16 %v6288_v22 }
0x1382   :  { %6429 = vpow2.f32 %v3445_v17 }
0x1383   :  { %v6068_v54 = vpack.c.bf16 %v6290_v41, %v6289_v42 }
0x1384   :  { %v6293_v63 = vpop.permute.xlu1 %6292 }
0x1385   :  { %v6295_v62 = vunpack.i.h.bf16 %v6293_v63  ;;  %v6294_v0 = vunpack.i.l.bf16 %v6293_v63 }
0x1387   :  { %v6074_v1 = vpack.c.bf16 %v6295_v62, %v6294_v0 }
0x1388   :  { %v3838_v24 = vpop.permute.xlu1 %3837 }
0x138b   :  { %v6428_v18 = vpop.eup %6427 }
0x138c   :  { %v3458_v19 = vsel %vm687_vm5, %v6428_v18, 0.0  ;;  %v6430_v21 = vpop.eup %6429  ;;  %v3929_v25 = vpop.permute.xlu1 %3928 }
0x138d   :  { %3459 = vadd.xlane.f32.xlu0 %v3458_v19  ;;  %v3455_v61 = vsel %vm687_vm5, %v6430_v21, 0.0 }
0x1391   :  { %3456 = vadd.xlane.f32.xlu0 %v3455_v61 }
0x13a7   :  { %6282 = vrot.lane.b32.xlu0 %v7633_v23, %s6946_s28 }
0x13ab   :  { %3839 = vrot.lane.b32.xlu0 %v7641_v30, %s6950_s11 }
0x13af   :  { %3930 = vrot.lane.b32.xlu0 %v7649_v56, %s6950_s11 }
0x13bd   :  { %v3427_v27 = vpop.xlane.xlu1 %3426 }
0x13be   :  { %v3437_v52 = vsub.f32 %v3421_v4, %v3427_v27 }
0x13c0   :  { %v3441_v50 = vmul.f32 1.442695, %v3437_v52 }
0x13c1   :  { %v6298_v10 = vpop.permute.xlu1 %6297 }
0x13c2   :  { %v6300_v6 = vunpack.i.h.bf16 %v6298_v10  ;;  %v6299_v32 = vunpack.i.l.bf16 %v6298_v10  ;;  %6431 = vpow2.f32 %v3441_v50 }
0x13c4   :  { %v6060_v55 = vpack.c.bf16 %v6300_v6, %v6299_v32 }
0x13c6   :  { %6061 = vmatprep.subr.bf16.mxu0 %v6060_v55 }
0x13c7   :  { %6063 = vmatpush3.bf16.msra.mxu0 %v6060_v55 }
0x13cc   :  { %v6432_v36 = vpop.eup %6431 }
0x13cd   :  { %v3449_v37 = vsel %vm687_vm5, %v6432_v36, 0.0 }
0x13ce   :  { %3429 = vmax.xlane.f32.xlu0 %v3428_v35 }
0x13d2   :  { %3450 = vadd.xlane.f32.xlu0 %v3449_v37 }
0x141a   :  { %v3460_v38 = vpop.xlane.xlu0 %3459 }
0x141b   :  { %6433 = vrcp.f32 %v3460_v38  ;;  %v2831_v38 = vld [vmem:[#allocation26 + $0x8] sm:$0xff] }
0x141c   :  { %5808 = vmatprep.subr.mxu0 %v2831_v38 }
0x141e   :  { %v3457_v39 = vpop.xlane.xlu0 %3456 }
0x141f   :  { %6435 = vrcp.f32 %v3457_v39  ;;  %v2830_v39 = vld [vmem:[#allocation26] sm:$0xff] }
0x1422   :  { %v6283_v40 = vpop.permute.xlu0 %6282 }
0x1423   :  { %v6285_v43 = vunpack.i.h.bf16 %v6283_v40  ;;  %v6284_v44 = vunpack.i.l.bf16 %v6283_v40 }
0x1425   :  { %v6064_v45 = vpack.c.bf16 %v6285_v43, %v6284_v44  ;;  %v6434_v57 = vpop.eup %6433 }
0x1426   :  { %v3468_v60 = vmul.f32 %v6434_v57, %v6428_v18  ;;  %v3840_v3 = vpop.permute.xlu0 %3839 }
0x1427   :  { %6065 = vmatprep.subr.bf16.mxu1 %v6064_v45 }
0x1428   :  { %6067 = vmatpush3.bf16.msra.mxu1 %v6064_v45 }
0x1429   :  { %v6436_v49 = vpop.eup %6435  ;;  %6070 = vmatprep.subr.msk.bf16.mxu1 %vm7387_vm2, %v6068_v54 }
0x142a   :  { %v3467_v58 = vmul.f32 %v6436_v49, %v6430_v21  ;;  %v3931_v5 = vpop.permute.xlu0 %3930 }
0x142c   :  { %5805 = vmatprep.mubr.msk.f32.mxu1 %vm687_vm5, %v3467_v58 }
0x142d   :  { %5806 = vmatmul.mubr.msk.f32.vlgmr.msra.gmra.mrb[34].mxu1 %vm687_vm5, %v3468_v60 }
0x142e   :  { %5828 = vmatprep.mubr.msk.f32.mxu1 %vm506_vm1, %v3838_v24 }
0x1431   :  { %6073 = vmatpush3.bf16.xpose.msk.msra.mxu1 %vm7387_vm2, %v6068_v54 }
0x1432   :  { %6076 = vmatprep.subr.msk.bf16.mxu1 %vm7387_vm2, %v6074_v1 }
0x1438   :  { %5829 = vmatmul.mubr.msk.f32.vlgmr.msra.gmra.mrb[36].mxu1 %vm506_vm1, %v3840_v3 }
0x1439   :  { %6079 = vmatpush3.bf16.xpose.msk.msra.mxu1 %vm7387_vm2, %v6074_v1  ;;  %5835 = vmatprep.mubr.msk.f32.mxu1 %vm506_vm1, %v3929_v25 }
0x1440   :  { %5836 = vmatmul.mubr.msk.f32.vlgmr.msra.gmra.mrb[38].mxu1 %vm506_vm1, %v3931_v5 }
0x145b   :  { %v3430_v12 = vpop.xlane.xlu0 %3429 }
0x145c   :  { %v3438_v4 = vsub.f32 %v3422_v34, %v3430_v12 }
0x145e   :  { %v3443_v13 = vmul.f32 1.442695, %v3438_v4 }
0x145f   :  { %v3451_v9 = vpop.xlane.xlu0 %3450 }
0x1460   :  { %6437 = vpow2.f32 %v3443_v13 }
0x1461   :  { %6439 = vrcp.f32 %v3451_v9 }
0x146a   :  { %v6438_v2 = vpop.eup %6437 }
0x146b   :  { %v6440_v16 = vpop.eup %6439  ;;  %v3452_v59 = vsel %vm687_vm5, %v6438_v2, 0.0 }
0x146c   :  { %3453 = vadd.xlane.f32.xlu0 %v3452_v59  ;;  %v3465_v7 = vmul.f32 %v6440_v16, %v6432_v36 }
0x146e   :  { %5798 = vmatprep.mubr.msk.f32.mxu0 %vm687_vm5, %v3465_v7 }
0x14f9   :  { %v3454_v17 = vpop.xlane.xlu0 %3453 }
0x14fa   :  { %6441 = vrcp.f32 %v3454_v17 }
0x1500   :  { %v7750_v18 = vpop.f32.mrb[34].mxu1 }
0x1501   :  { %v7752_v19 = vpop.f32.mrb[35].mxu1 }
0x1504   :  { %v6442_v21 = vpop.eup %6441 }
0x1505   :  { %v3466_v61 = vmul.f32 %v6442_v21, %v6438_v2 }
0x1507   :  { %5799 = vmatmul.mubr.msk.f32.vlgmr.msra.gmra.mrb[26].mxu0 %vm687_vm5, %v3466_v61 }
0x1508   :  { %5809 = vmatpush3.msra.mxu0 %v2831_v38 }
0x1509   :  { %5816 = vmatprep.subr.mxu0 %v2830_v39 }
0x150b   :  { %v5830_v22 = vpop.f32.mrb[36].mxu1 }
0x150c   :  { %v4020_v63 = vmul.f32 0.35355338, %v5830_v22  ;;  %v3919_v24 = vpop.f32.mrb[37].mxu1 }
0x150d   :  { %v4019_v25 = vmul.f32 0.35355338, %v3919_v24 }
0x150e   :  { %v4024_v27 = vadd.f32 %v4020_v63, %v7403_v26  ;;  %v2832_v63 = vld [vmem:[#allocation26 + $0x10] sm:$0xff] }
0x150f   :  { %v4023_v52 = vadd.f32 %v4019_v25, %v7405_v29 }
0x1510   :  { %v4030_v50 = vsel %vm687_vm5, %v4024_v27, -inf }
0x1511   :  { %4031 = vmax.xlane.f32.xlu0 %v4030_v50  ;;  %v4027_v32 = vsel %vm687_vm5, %v4023_v52, -inf }
0x1513   :  { %v5837_v10 = vpop.f32.mrb[38].mxu1 }
0x1514   :  { %v4010_v6 = vpop.f32.mrb[39].mxu1  ;;  %v4022_v55 = vmul.f32 0.35355338, %v5837_v10 }
0x1515   :  { %v4021_v33 = vmul.f32 0.35355338, %v4010_v6  ;;  %4028 = vmax.xlane.f32.xlu0 %v4027_v32 }
0x1516   :  { %v4026_v35 = vadd.f32 %v4022_v55, %v7403_v26 }
0x1517   :  { %v4025_v34 = vadd.f32 %v4021_v33, %v7405_v29 }
0x1518   :  { %v4036_v37 = vsel %vm687_vm5, %v4026_v35, -inf }
0x1519   :  { %v4033_v36 = vsel %vm687_vm5, %v4025_v34, -inf }
0x151a   :  { %4034 = vmax.xlane.f32.xlu0 %v4033_v36 }
0x151e   :  { %4037 = vmax.xlane.f32.xlu0 %v4036_v37 }
0x159e   :  { %v4032_v40 = vpop.xlane.xlu0 %4031 }
0x159f   :  { %v4040_v41 = vsub.f32 %v4024_v27, %v4032_v40 }
0x15a1   :  { %v4045_v42 = vmul.f32 1.442695, %v4040_v41 }
0x15a2   :  { %v4029_v43 = vpop.xlane.xlu0 %4028 }
0x15a3   :  { %6443 = vpow2.f32 %v4045_v42  ;;  %v4039_v44 = vsub.f32 %v4023_v52, %v4029_v43 }
0x15a5   :  { %v4043_v45 = vmul.f32 1.442695, %v4039_v44 }
0x15a7   :  { %6445 = vpow2.f32 %v4043_v45  ;;  %v4035_v54 = vpop.xlane.xlu0 %4034 }
0x15a8   :  { %v4041_v57 = vsub.f32 %v4025_v34, %v4035_v54 }
0x15aa   :  { %v4047_v62 = vmul.f32 1.442695, %v4041_v57 }
0x15ab   :  { %v4038_v49 = vpop.xlane.xlu0 %4037 }
0x15ac   :  { %v4042_v58 = vsub.f32 %v4026_v35, %v4038_v49 }
0x15ad   :  { %v7763_v60 = vpop.eup %6443 }
0x15ae   :  { %v4049_v0 = vmul.f32 1.442695, %v4042_v58  ;;  %v4054_v1 = vsel %vm687_vm5, %v7763_v60, 0.0 }
0x15af   :  { %4055 = vadd.xlane.f32.xlu0 %v4054_v1 }
0x15b0   :  { %6447 = vpow2.f32 %v4049_v0 }
0x15b1   :  { %v6446_v3 = vpop.eup %6445  ;;  %6449 = vpow2.f32 %v4047_v62 }
0x15b2   :  { %v4051_v5 = vsel %vm687_vm5, %v6446_v3, 0.0 }
0x15b3   :  { %4052 = vadd.xlane.f32.xlu1 %v4051_v5 }
0x15ba   :  { %v6448_v12 = vpop.eup %6447 }
0x15bb   :  { %v4060_v4 = vsel %vm687_vm5, %v6448_v12, 0.0  ;;  %v6450_v13 = vpop.eup %6449 }
0x15bc   :  { %4061 = vadd.xlane.f32.xlu0 %v4060_v4  ;;  %v4057_v9 = vsel %vm687_vm5, %v6450_v13, 0.0 }
0x15c0   :  { %4058 = vadd.xlane.f32.xlu0 %v4057_v9 }
0x15c4   :  { %6307 = vrot.lane.b32.xlu1 %v7633_v23, %s6949_s30 }
0x15c8   :  { %4439 = vrot.lane.b32.xlu1 %v7649_v56, %s6953_s4 }
0x15d6   :  { %6302 = vrot.lane.b32.xlu0 %v7627_v20, %s6949_s30 }
0x15da   :  { %v5800_v2 = vpop.f32.mrb[26].mxu0  ;;  %6312 = vrot.lane.b32.xlu0 %v7627_v20, %s6953_s4 }
0x15db   :  { %v3547_v16 = vpop.f32.mrb[27].mxu0 }
0x15dc   :  { %5810 = vmatprep.mubr.msk.f32.mxu0 %vm506_vm1, %v3547_v16 }
0x15dd   :  { %5811 = vmatmul.mubr.msk.f32.vlgmr.msra.gmra.mrb[28].mxu0 %vm506_vm1, %v5800_v2 }
0x15de   :  { %6317 = vrot.lane.b32.xlu0 %v7633_v23, %s6953_s4  ;;  %5813 = vmatprep.mubr.msk.f32.mxu0 %vm506_vm1, %v7752_v19 }
0x15df   :  { %5817 = vmatpush3.msra.mxu0 %v2830_v39 }
0x15e1   :  { %5814 = vmatmul.mubr.msk.f32.gmra.mrb[30].mxu0 %vm506_vm1, %v7750_v18 }
0x15e2   :  { %4346 = vrot.lane.b32.xlu0 %v7639_v28, %s6953_s4  ;;  %5818 = vmatprep.mubr.msk.f32.mxu0 %vm506_vm1, %v7701_v48 }
0x15e5   :  { %5819 = vmatmul.mubr.msk.f32.vlgmr.msra.gmra.mrb[28].mxu0 %vm506_vm1, %v7699_v46 }
0x15e6   :  { %4348 = vrot.lane.b32.xlu0 %v7641_v30, %s6953_s4  ;;  %5821 = vmatprep.mubr.msk.f32.mxu0 %vm506_vm1, %v7705_v51 }
0x15e9   :  { %5822 = vmatmul.mubr.msk.f32.gmra.mrb[30].mxu0 %vm506_vm1, %v7703_v47 }
0x15ea   :  { %4437 = vrot.lane.b32.xlu0 %v7647_v31, %s6953_s4 }
0x163c   :  { %v4056_v59 = vpop.xlane.xlu0 %4055 }
0x1640   :  { %v4053_v56 = vpop.xlane.xlu1 %4052 }
0x1641   :  { %6451 = vrcp.f32 %v4053_v56 }
0x1642   :  { %6453 = vrcp.f32 %v4056_v59 }
0x1644   :  { %v6308_v28 = vpop.permute.xlu1 %6307 }
0x1645   :  { %v6310_v48 = vunpack.i.h.bf16 %v6308_v28  ;;  %v6309_v7 = vunpack.i.l.bf16 %v6308_v28 }
0x1647   :  { %v6084_v17 = vpack.c.bf16 %v6310_v48, %v6309_v7 }
0x1648   :  { %v4440_v43 = vpop.permute.xlu1 %4439 }
0x1649   :  { %6085 = vmatprep.subr.bf16.mxu1 %v6084_v17  ;;  %v4062_v46 = vpop.xlane.xlu0 %4061 }
0x164a   :  { %6087 = vmatpush3.bf16.msra.mxu1 %v6084_v17  ;;  %6455 = vrcp.f32 %v4062_v46 }
0x164b   :  { %v6452_v30 = vpop.eup %6451 }
0x164c   :  { %v4067_v18 = vmul.f32 %v6452_v30, %v6446_v3  ;;  %v6454_v61 = vpop.eup %6453 }
0x164d   :  { %v4059_v51 = vpop.xlane.xlu0 %4058  ;;  %v4068_v50 = vmul.f32 %v6454_v61, %v7763_v60 }
0x164e   :  { %6457 = vrcp.f32 %v4059_v51  ;;  %5842 = vmatprep.mubr.msk.f32.mxu0 %vm687_vm5, %v4067_v18 }
0x1651   :  { %v6303_v47 = vpop.permute.xlu0 %6302 }
0x1652   :  { %v6305_v31 = vunpack.i.h.bf16 %v6303_v47  ;;  %v6304_v19 = vunpack.i.l.bf16 %v6303_v47 }
0x1654   :  { %v6080_v21 = vpack.c.bf16 %v6305_v31, %v6304_v19  ;;  %v6456_v27 = vpop.eup %6455 }
0x1655   :  { %v6313_v22 = vpop.permute.xlu0 %6312  ;;  %v4070_v55 = vmul.f32 %v6456_v27, %v6448_v12 }
0x1656   :  { %v6315_v24 = vunpack.i.h.bf16 %v6313_v22  ;;  %v6314_v25 = vunpack.i.l.bf16 %v6313_v22  ;;  %6081 = vmatprep.subr.bf16.mxu0 %v6080_v21 }
0x1657   :  { %6083 = vmatpush3.bf16.msra.mxu0 %v6080_v21 }
0x1658   :  { %v6458_v52 = vpop.eup %6457  ;;  %v6088_v10 = vpack.c.bf16 %v6315_v24, %v6314_v25  ;;  %5852 = vmatprep.subr.mxu0 %v2832_v63 }
0x1659   :  { %v6318_v6 = vpop.permute.xlu0 %6317  ;;  %v4069_v32 = vmul.f32 %v6458_v52, %v6450_v13 }
0x165a   :  { %v6320_v33 = vunpack.i.h.bf16 %v6318_v6  ;;  %v6319_v34 = vunpack.i.l.bf16 %v6318_v6  ;;  %5843 = vmatmul.mubr.msk.f32.vlgmr.msra.gmra.mrb[32].mxu0 %vm687_vm5, %v4068_v50  ;;  %6090 = vmatprep.subr.msk.bf16.mxu1 %vm7387_vm2, %v6088_v10 }
0x165b   :  { %5849 = vmatprep.mubr.msk.f32.mxu1 %vm687_vm5, %v4069_v32  ;;  %5853 = vmatpush3.msra.mxu0 %v2832_v63 }
0x165c   :  { %v6094_v35 = vpack.c.bf16 %v6320_v33, %v6319_v34  ;;  %5850 = vmatmul.mubr.msk.f32.vlgmr.msra.gmra.mrb[40].mxu1 %vm687_vm5, %v4070_v55 }
0x165d   :  { %6093 = vmatpush3.bf16.xpose.msk.msra.mxu1 %vm7387_vm2, %v6088_v10  ;;  %v4347_v36 = vpop.permute.xlu0 %4346 }
0x165e   :  { %5864 = vmatprep.mubr.msk.f32.mxu1 %vm506_vm1, %v4347_v36  ;;  %6096 = vmatprep.subr.msk.bf16.mxu0 %vm7387_vm2, %v6094_v35 }
0x1661   :  { %v4349_v37 = vpop.permute.xlu0 %4348 }
0x1664   :  { %5865 = vmatmul.mubr.msk.f32.vlgmr.msra.gmra.mrb[42].mxu1 %vm506_vm1, %v4349_v37 }
0x1665   :  { %v4438_v42 = vpop.permute.xlu0 %4437 }
0x172d   :  { %v5844_v38 = vpop.f32.mrb[32].mxu0 }
0x172e   :  { %v4149_v39 = vpop.f32.mrb[33].mxu0 }
0x172f   :  { %v5851_v40 = vpop.f32.mrb[40].mxu1  ;;  %5854 = vmatprep.mubr.msk.f32.mxu0 %vm506_vm1, %v4149_v39 }
0x1730   :  { %v4236_v41 = vpop.f32.mrb[41].mxu1  ;;  %5855 = vmatmul.mubr.msk.f32.vlgmr.msra.gmra.mrb[28].mxu0 %vm506_vm1, %v5844_v38 }
0x1731   :  { %6099 = vmatpush3.bf16.xpose.msk.msra.mxu0 %vm7387_vm2, %v6094_v35  ;;  %5857 = vmatprep.mubr.msk.f32.mxu0 %vm506_vm1, %v4236_v41 }
0x1734   :  { %5858 = vmatmul.mubr.msk.f32.gmra.mrb[30].mxu0 %vm506_vm1, %v5851_v40  ;;  %v2833_v40 = vld [vmem:[#allocation26 + $0x18] sm:$0xff] }
0x1735   :  { %5871 = vmatprep.mubr.msk.f32.mxu0 %vm506_vm1, %v4438_v42 }
0x1737   :  { %v5866_v44 = vpop.f32.mrb[42].mxu1 }
0x1738   :  { %v4529_v45 = vmul.f32 0.35355338, %v5866_v44  ;;  %v4428_v54 = vpop.f32.mrb[43].mxu1  ;;  %5872 = vmatmul.mubr.msk.f32.vlgmr.msra.gmra.mrb[34].mxu0 %vm506_vm1, %v4440_v43 }
0x1739   :  { %v4528_v57 = vmul.f32 0.35355338, %v4428_v54 }
0x173a   :  { %v4533_v49 = vadd.f32 %v4529_v45, %v7403_v26  ;;  %v5345_v45 = vld [vmem:[#allocation28] ss:$0 sm:$0xff] }
0x173b   :  { %v4532_v58 = vadd.f32 %v4528_v57, %v7405_v29 }
0x173c   :  { %v4539_v14 = vsel %vm687_vm5, %v4533_v49, -inf }
0x173d   :  { %4540 = vmax.xlane.f32.xlu1 %v4539_v14  ;;  %v4536_v60 = vsel %vm687_vm5, %v4532_v58, -inf }
0x173e   :  { %4537 = vmax.xlane.f32.xlu0 %v4536_v60 }
0x17ca   :  { %v4541_v12 = vpop.xlane.xlu1 %4540 }
0x17cb   :  { %v4538_v62 = vpop.xlane.xlu0 %4537  ;;  %v4549_v4 = vsub.f32 %v4533_v49, %v4541_v12 }
0x17cc   :  { %v4548_v0 = vsub.f32 %v4532_v58, %v4538_v62 }
0x17cd   :  { %v4554_v13 = vmul.f32 1.442695, %v4549_v4 }
0x17ce   :  { %v4552_v1 = vmul.f32 1.442695, %v4548_v0 }
0x17d0   :  { %6459 = vpow2.f32 %v4552_v1 }
0x17d1   :  { %6461 = vpow2.f32 %v4554_v13 }
0x17da   :  { %v6460_v3 = vpop.eup %6459 }
0x17db   :  { %v4560_v5 = vsel %vm687_vm5, %v6460_v3, 0.0  ;;  %v6462_v17 = vpop.eup %6461 }
0x17dc   :  { %4561 = vadd.xlane.f32.xlu1 %v4560_v5  ;;  %v4563_v46 = vsel %vm687_vm5, %v6462_v17, 0.0 }
0x180b   :  { %v5873_v9 = vpop.f32.mrb[34].mxu0 }
0x180c   :  { %v4519_v2 = vpop.f32.mrb[35].mxu0  ;;  %v4531_v16 = vmul.f32 0.35355338, %v5873_v9 }
0x180d   :  { %v4530_v56 = vmul.f32 0.35355338, %v4519_v2 }
0x180e   :  { %v4535_v59 = vadd.f32 %v4531_v16, %v7403_v26 }
0x180f   :  { %v4534_v28 = vadd.f32 %v4530_v56, %v7405_v29 }
0x1810   :  { %v4545_v7 = vsel %vm687_vm5, %v4535_v59, -inf }
0x1811   :  { %v4542_v48 = vsel %vm687_vm5, %v4534_v28, -inf }
0x1812   :  { %4543 = vmax.xlane.f32.xlu0 %v4542_v48 }
0x1816   :  { %4546 = vmax.xlane.f32.xlu0 %v4545_v7 }
0x181a   :  { %4564 = vadd.xlane.f32.xlu0 %v4563_v46 }
0x1869   :  { %v4562_v30 = vpop.xlane.xlu1 %4561 }
0x186a   :  { %6463 = vrcp.f32 %v4562_v30 }
0x1874   :  { %v6464_v18 = vpop.eup %6463 }
0x1875   :  { %v4576_v51 = vmul.f32 %v6464_v18, %v6460_v3 }
0x1877   :  { %5878 = vmatprep.mubr.msk.f32.mxu1 %vm687_vm5, %v4576_v51 }
0x189f   :  { %v4544_v47 = vpop.xlane.xlu0 %4543 }
0x18a0   :  { %v4550_v29 = vsub.f32 %v4534_v28, %v4544_v47 }
0x18a2   :  { %v4556_v31 = vmul.f32 1.442695, %v4550_v29 }
0x18a3   :  { %v4547_v26 = vpop.xlane.xlu0 %4546 }
0x18a4   :  { %6465 = vpow2.f32 %v4556_v31  ;;  %v4551_v19 = vsub.f32 %v4535_v59, %v4547_v26 }
0x18a6   :  { %v4558_v21 = vmul.f32 1.442695, %v4551_v19 }
0x18a7   :  { %v4565_v25 = vpop.xlane.xlu0 %4564 }
0x18a8   :  { %6467 = vpow2.f32 %v4558_v21  ;;  %v4943_v21 = vld [vmem:[%s7920_s18] sm:$0xff] }
0x18a9   :  { %6469 = vrcp.f32 %v4565_v25 }
0x18ae   :  { %v6466_v61 = vpop.eup %6465 }
0x18af   :  { %v4566_v22 = vsel %vm687_vm5, %v6466_v61, 0.0 }
0x18b0   :  { %4567 = vadd.xlane.f32.xlu1 %v4566_v22 }
0x18b2   :  { %v6468_v63 = vpop.eup %6467 }
0x18b3   :  { %v4569_v24 = vsel %vm687_vm5, %v6468_v63, 0.0  ;;  %v6470_v55 = vpop.eup %6469 }
0x18b4   :  { %4570 = vadd.xlane.f32.xlu0 %v4569_v24  ;;  %v4577_v36 = vmul.f32 %v6470_v55, %v6462_v17  ;;  %v4946_v24 = vld [vmem:[%s7920_s18 + $0x18] sm:$0xff] }
0x18c1   :  { %6322 = vrot.lane.b32.xlu1 %v7627_v20, %s6952_s24 }
0x18ca   :  { %6327 = vrot.lane.b32.xlu0 %v7633_v23, %s6952_s24 }
0x193d   :  { %v4568_v27 = vpop.xlane.xlu1 %4567 }
0x193e   :  { %6471 = vrcp.f32 %v4568_v27  ;;  %v5055_v27 = vld [vmem:[#allocation29] sm:$0xff] }
0x1941   :  { %v6323_v52 = vpop.permute.xlu1 %6322  ;;  %v4571_v50 = vpop.xlane.xlu0 %4570 }
0x1942   :  { %v6325_v10 = vunpack.i.h.bf16 %v6323_v52  ;;  %v6324_v6 = vunpack.i.l.bf16 %v6323_v52  ;;  %6473 = vrcp.f32 %v4571_v50  ;;  %v5056_v52 = vld [vmem:[#allocation29 + $0x8] sm:$0xff] }
0x1943   :  { %v6116_v50 = vpack.c.bf16 %v5056_v52, %v5055_v27 }
0x1944   :  { %v6100_v32 = vpack.c.bf16 %v6325_v10, %v6324_v6 }
0x1945   :  { %v6328_v33 = vpop.permute.xlu0 %6327 }
0x1946   :  { %v6330_v34 = vunpack.i.h.bf16 %v6328_v33  ;;  %v6329_v35 = vunpack.i.l.bf16 %v6328_v33  ;;  %6101 = vmatprep.subr.bf16.mxu1 %v6100_v32 }
0x1947   :  { %6103 = vmatpush3.bf16.msra.mxu1 %v6100_v32 }
0x1948   :  { %v6472_v20 = vpop.eup %6471  ;;  %v6104_v37 = vpack.c.bf16 %v6330_v34, %v6329_v35 }
0x1949   :  { %v4578_v23 = vmul.f32 %v6472_v20, %v6466_v61  ;;  %v4944_v61 = vld [vmem:[%s7920_s18 + $0x8] sm:$0xff] }
0x194a   :  { %5879 = vmatmul.mubr.msk.f32.vlgmr.msra.gmra.mrb[44].mxu1 %vm687_vm5, %v4577_v36  ;;  %6105 = vmatprep.subr.bf16.mxu0 %v6104_v37  ;;  %v6108_v22 = vpack.c.bf16 %v4944_v61, %v4943_v21 }
0x194b   :  { %6107 = vmatpush3.bf16.msra.mxu0 %v6104_v37  ;;  %5885 = vmatprep.mubr.msk.f32.mxu0 %vm687_vm5, %v4578_v23 }
0x194c   :  { %v6474_v38 = vpop.eup %6473  ;;  %5888 = vmatprep.subr.mxu0 %v2833_v40  ;;  %6109 = vmatprep.subr.bf16.mxu1 %v6108_v22 }
0x194d   :  { %v4579_v39 = vmul.f32 %v6474_v38, %v6468_v63  ;;  %v4945_v63 = vld [vmem:[%s7920_s18 + $0x10] sm:$0xff]  ;;  %6111 = vmatpush3.bf16.msra.mxu1 %v6108_v22 }
0x194e   :  { %v6112_v25 = vpack.c.bf16 %v4946_v24, %v4945_v63 }
0x194f   :  { %5886 = vmatmul.mubr.msk.f32.vlgmr.msra.gmra.mrb[36].mxu0 %vm687_vm5, %v4579_v39 }
0x1950   :  { %5889 = vmatpush3.msra.mxu0 %v2833_v40  ;;  %6113 = vmatprep.subr.bf16.mxu1 %v6112_v25  ;;  %v5346_v40 = vld [vmem:[#allocation13] ss:$0 sm:$0xff] }
0x1951   :  { %6115 = vmatpush3.bf16.msra.mxu1 %v6112_v25  ;;  %6117 = vmatprep.subr.bf16.mxu0 %v6116_v50 }
0x1a1d   :  { %v5880_v41 = vpop.f32.mrb[44].mxu1 }
0x1a1e   :  { %v4658_v42 = vpop.f32.mrb[45].mxu1 }
0x1a1f   :  { %5890 = vmatprep.mubr.msk.f32.mxu0 %vm506_vm1, %v4658_v42 }
0x1a20   :  { %5891 = vmatmul.mubr.msk.f32.vlgmr.msra.gmra.mrb[28].mxu0 %vm506_vm1, %v5880_v41 }
0x1a21   :  { %6119 = vmatpush3.bf16.msra.mxu0 %v6116_v50 }
0x1a22   :  { %v5887_v43 = vpop.f32.mrb[36].mxu0 }
0x1a23   :  { %v4745_v44 = vpop.f32.mrb[37].mxu0 }
0x1a24   :  { %5893 = vmatprep.mubr.msk.f32.mxu0 %vm506_vm1, %v4745_v44  ;;  %v5347_v44 = vld [vmem:[#allocation14] ss:$0 sm:$0xff] }
0x1a25   :  { %5894 = vmatmul.mubr.msk.f32.gmra.mrb[30].mxu0 %vm506_vm1, %v5887_v43 }
0x1af3   :  { %v5892_v54 = vpop.f32.mrb[28].mxu0 }
0x1af4   :  { %v4862_v57 = vadd.f32 %v5892_v54, %v5345_v45  ;;  %v4832_v49 = vpop.f32.mrb[29].mxu0 }
0x1af5   :  { %v4861_v58 = vadd.f32 %v5345_v45, %v4832_v49 }
0x1af6   :  { %v4866_v14 = vadd.f32 %v4862_v57, %v7611_v11 }
0x1af7   :  { %v4865_v60 = vadd.f32 %v4861_v58, %v7608_v8 }
0x1af8   :  { %v5895_v62 = vpop.f32.mrb[30].mxu0  ;;  %v4874_v0 = vsel %vm313_vm0, %v4866_v14, 0.0 }
0x1af9   :  { %v4864_v1 = vadd.f32 %v5895_v62, %v5345_v45  ;;  %4875 = vadd.xlane.f32.xlu0 %v4874_v0  ;;  %v4842_v3 = vpop.f32.mrb[31].mxu0  ;;  %v4871_v5 = vsel %vm313_vm0, %v4865_v60, 0.0 }
0x1afa   :  { %v4863_v12 = vadd.f32 %v5345_v45, %v4842_v3  ;;  %4872 = vadd.xlane.f32.xlu1 %v4871_v5 }
0x1afb   :  { %v4868_v4 = vadd.f32 %v4864_v1, %v7621_v53 }
0x1afc   :  { %v4867_v13 = vadd.f32 %v4863_v12, %v7618_v15  ;;  %v5057_v12 = vld [vmem:[#allocation29 + $0x10] sm:$0xff] }
0x1afd   :  { %v4880_v9 = vsel %vm313_vm0, %v4868_v4, 0.0 }
0x1afe   :  { %4881 = vadd.xlane.f32.xlu0 %v4880_v9  ;;  %v4877_v11 = vsel %vm313_vm0, %v4867_v13, 0.0  ;;  %v5348_v9 = vld [vmem:[%s7921_s19] ss:$0 sm:$0xff] }
0x1aff   :  { %4878 = vadd.xlane.f32.xlu1 %v4877_v11 }
0x1b86   :  { %v4876_v8 = vpop.xlane.xlu0 %4875 }
0x1b87   :  { %v4884_v2 = vmul.f32 0.03125, %v4876_v8  ;;  %v4873_v16 = vpop.xlane.xlu1 %4872 }
0x1b88   :  { %v4883_v56 = vmul.f32 0.03125, %v4873_v16 }
0x1b89   :  { %v4888_v28 = vsub.f32 %v4866_v14, %v4884_v2 }
0x1b8a   :  { %v4887_v59 = vsub.f32 %v4865_v60, %v4883_v56 }
0x1b8b   :  { %v4882_v48 = vpop.xlane.xlu0 %4881  ;;  %v4892_v7 = vmul.f32 %v4888_v28, %v4888_v28 }
0x1b8c   :  { %v4886_v17 = vmul.f32 0.03125, %v4882_v48  ;;  %v4879_v46 = vpop.xlane.xlu1 %4878  ;;  %v4891_v30 = vmul.f32 %v4887_v59, %v4887_v59 }
0x1b8d   :  { %v4885_v53 = vmul.f32 0.03125, %v4879_v46  ;;  %v4898_v15 = vsel %vm313_vm0, %v4892_v7, 0.0 }
0x1b8e   :  { %v4890_v18 = vsub.f32 %v4868_v4, %v4886_v17  ;;  %4899 = vadd.xlane.f32.xlu0 %v4898_v15  ;;  %v4895_v51 = vsel %vm313_vm0, %v4891_v30, 0.0  ;;  %v5058_v4 = vld [vmem:[#allocation29 + $0x18] sm:$0xff] }
0x1b8f   :  { %v4889_v47 = vsub.f32 %v4867_v13, %v4885_v53  ;;  %4896 = vadd.xlane.f32.xlu1 %v4895_v51  ;;  %v6120_v13 = vpack.c.bf16 %v5058_v4, %v5057_v12  ;;  %v5353_v53 = vld [vmem:[%s7923_s21] ss:$0 sm:$0xff]  ;;  %s6879_s21 = scalar_lea.vmem %s5177_s7, 512 }
0x1b90   :  { %v4894_v29 = vmul.f32 %v4890_v18, %v4890_v18  ;;  %p6880_p4 = scmp.ne.s32.totalorder %s5177_s7, %s6879_s21  ;;  %p6885_p6 = scmp.lt.s32.totalorder %s6879_s21, %s6879_s21 }
0x1b91   :  { %v4893_v31 = vmul.f32 %v4889_v47, %v4889_v47  ;;  %6121 = vmatprep.subr.bf16.mxu0 %v6120_v13 }
0x1b92   :  { %v4904_v26 = vsel %vm313_vm0, %v4894_v29, 0.0  ;;  %6123 = vmatpush3.bf16.msra.mxu0 %v6120_v13  ;;  %p6886_p7 = por %p6885_p6, %p6884_p5 }
0x1b93   :  { %4905 = vadd.xlane.f32.xlu0 %v4904_v26  ;;  %v4901_v19 = vsel %vm313_vm0, %v4893_v31, 0.0 }
0x1b94   :  { %4902 = vadd.xlane.f32.xlu1 %v4901_v19  ;;  %p6887_p8 = pnand %p6886_p7, %p6880_p4 }
0x1c1b   :  { %v4900_v10 = vpop.xlane.xlu0 %4899 }
0x1c1c   :  { %v4908_v6 = vmul.f32 0.03125, %v4900_v10  ;;  %v4897_v32 = vpop.xlane.xlu1 %4896 }
0x1c1d   :  { %v4907_v55 = vmul.f32 0.03125, %v4897_v32 }
0x1c1e   :  { %v4912_v33 = vadd.f32 1e-05, %v4908_v6 }
0x1c1f   :  { %v4911_v34 = vadd.f32 1e-05, %v4907_v55 }
0x1c20   :  { %6475 = vrsqrt.f32 %v4912_v33  ;;  %v4906_v35 = vpop.xlane.xlu0 %4905 }
0x1c21   :  { %6477 = vrsqrt.f32 %v4911_v34  ;;  %v4910_v20 = vmul.f32 0.03125, %v4906_v35  ;;  %v4903_v36 = vpop.xlane.xlu1 %4902 }
0x1c22   :  { %v4909_v37 = vmul.f32 0.03125, %v4903_v36 }
0x1c23   :  { %v4914_v23 = vadd.f32 1e-05, %v4910_v20 }
0x1c24   :  { %v4913_v38 = vadd.f32 1e-05, %v4909_v37 }
0x1c25   :  { %6479 = vrsqrt.f32 %v4914_v23 }
0x1c26   :  { %6481 = vrsqrt.f32 %v4913_v38 }
0x1c2a   :  { %v6476_v39 = vpop.eup %6475 }
0x1c2b   :  { %v6478_v41 = vpop.eup %6477  ;;  %v4920_v42 = vmul.f32 %v6476_v39, %v4888_v28 }
0x1c2c   :  { %v4919_v43 = vmul.f32 %v6478_v41, %v4887_v59 }
0x1c2d   :  { %v4930_v45 = vmul.f32 %v5346_v40, %v4920_v42 }
0x1c2e   :  { %v4929_v54 = vmul.f32 %v5346_v40, %v4919_v43 }
0x1c2f   :  { %v6480_v57 = vpop.eup %6479  ;;  %v4940_v60 = vadd.f32 %v5347_v44, %v4930_v45 }
0x1c30   :  { %v6482_v49 = vpop.eup %6481  ;;  %v4939_v58 = vadd.f32 %v5347_v44, %v4929_v54  ;;  %v4922_v14 = vmul.f32 %v6480_v57, %v4890_v18 }
0x1c31   :  { %v4921_v62 = vmul.f32 %v6482_v49, %v4889_v47 }
0x1c32   :  { %5904 = vmatprep.mubr.msk.f32.mxu1 %vm313_vm0, %v4939_v58  ;;  %v4932_v0 = vmul.f32 %v5346_v40, %v4922_v14 }
0x1c33   :  { %5905 = vmatmul.mubr.msk.f32.vlgmr.msra.gmra.mrb[46].mxu1 %vm313_vm0, %v4940_v60  ;;  %v4931_v1 = vmul.f32 %v5346_v40, %v4921_v62 }
0x1c34   :  { %v4942_v5 = vadd.f32 %v5347_v44, %v4932_v0 }
0x1c35   :  { %v4941_v3 = vadd.f32 %v5347_v44, %v4931_v1 }
0x1c37   :  { %5907 = vmatprep.mubr.msk.f32.mxu1 %vm313_vm0, %v4941_v3 }
0x1c38   :  { %5908 = vmatmul.mubr.msk.f32.gmra.mrb[48].mxu1 %vm313_vm0, %v4942_v5 }
0x1d06   :  { %v5906_v11 = vpop.f32.mrb[46].mxu1 }
0x1d07   :  { %v5038_v8 = vadd.f32 %v5906_v11, %v5348_v9  ;;  %v5032_v2 = vpop.f32.mrb[47].mxu1 }
0x1d08   :  { %v5033_v16 = vadd.f32 %v5348_v9, %v5032_v2 }
0x1d09   :  { %v5052_v28 = vmax.f32 %v5038_v8, 0.0 }
0x1d0a   :  { %v5051_v56 = vmax.f32 %v5033_v16, 0.0 }
0x1d0b   :  { %v5909_v59 = vpop.f32.mrb[48].mxu1 }
0x1d0c   :  { %v5048_v48 = vadd.f32 %v5909_v59, %v5348_v9  ;;  %v5042_v7 = vpop.f32.mrb[49].mxu1  ;;  %5918 = vmatprep.mubr.msk.f32.mxu0 %vm313_vm0, %v5051_v56 }
0x1d0d   :  { %v5043_v17 = vadd.f32 %v5348_v9, %v5042_v7  ;;  %5919 = vmatmul.mubr.msk.f32.vlgmr.msra.gmra.mrb[38].mxu0 %vm313_vm0, %v5052_v28 }
0x1d0e   :  { %v5054_v30 = vmax.f32 %v5048_v48, 0.0 }
0x1d0f   :  { %v5053_v46 = vmax.f32 %v5043_v17, 0.0 }
0x1d11   :  { %5921 = vmatprep.mubr.msk.f32.mxu0 %vm313_vm0, %v5053_v46 }
0x1d12   :  { %5922 = vmatmul.mubr.msk.f32.gmra.mrb[40].mxu0 %vm313_vm0, %v5054_v30 }
0x1de0   :  { %v5920_v15 = vpop.f32.mrb[38].mxu0 }
0x1de1   :  { %v5150_v18 = vadd.f32 %v5920_v15, %v5353_v53  ;;  %v5144_v51 = vpop.f32.mrb[39].mxu0 }
0x1de2   :  { %v5145_v47 = vadd.f32 %v5353_v53, %v5144_v51 }
0x1de3   :  { %v5164_v29 = vadd.f32 %v5150_v18, %v4940_v60 }
0x1de4   :  { %v5163_v31 = vadd.f32 %v5145_v47, %v4939_v58 }
0x1de5   :  { %5168 = vst.msk [vmem:[#allocation31 + $0x8] sm:$0xff] %vm313_vm0, %v5164_v29  ;;  %v5923_v26 = vpop.f32.mrb[40].mxu0 }
0x1de6   :  { %5167 = vst.msk [vmem:[#allocation31] sm:$0xff] %vm313_vm0, %v5163_v31  ;;  %v5160_v19 = vadd.f32 %v5923_v26, %v5353_v53  ;;  %v5154_v21 = vpop.f32.mrb[41].mxu0 }
0x1de7   :  { %v5155_v61 = vadd.f32 %v5353_v53, %v5154_v21 }
0x1de8   :  { %v5166_v22 = vadd.f32 %v5160_v19, %v4942_v5 }
0x1de9   :  { %v5165_v63 = vadd.f32 %v5155_v61, %v4941_v3 }
0x1dea   :  { %5170 = vst.msk [vmem:[#allocation31 + $0x18] sm:$0xff] %vm313_vm0, %v5166_v22 }
0x1deb   :  { %5169 = vst.msk [vmem:[#allocation31 + $0x10] sm:$0xff] %vm313_vm0, %v5165_v63 }
0x1dec   :  { %6890 = shalt.err (!%p6887_p8)
}
0x1ded   :  { %s7956_s14 = sld [smem:[#allocation50_spill]] }
0x1df3   :  { %s6891_s25 = scalar_lea.hbm %s7956_s14, 512 }
0x1df4   :  { %p6892_p9 = scmp.ne.s32.totalorder %s7956_s14, %s6891_s25  ;;  %p6895_p10 = scmp.lt.u32.totalorder %s6891_s25, %s7956_s14 }
0x1df6   :  { %p6897_p11 = pnand %p6895_p10, %p6892_p9 }
0x1df8   :  { %6900 = shalt.err (!%p6897_p11)
}
0x1df9   :  { %5182 = dma.vmem_to_hbm [thread:$0]  %s5177_s7, 512, %s7956_s14, [#allocation4], %s7949_s1, %s7949_s1, %s7948_s9  }
0x1dfa   :  { %6921 = dma.done.wait [#allocation4], 512  }
0x1dfb   :  { %6922 = vsyncadd [#allocation4], 4294966784 }
0x1dfc   :  { %5186 = vsyncpa [#allocation3], 1 }
0x1dfd   :  { %5187 = vsyncpa [#allocation6], 1 }
0x1dfe   :  { %5188 = vsyncpa [#allocation9], 1 }
0x1dff   :  { %5189 = vsyncpa [#allocation12], 1 }
0x1e00   :  { %5190 = vsyncpa [#allocation15], 1 }
0x1e01   :  { %5191 = vsyncpa [#allocation18], 1 }
0x1e02   :  { %5192 = vsyncpa [#allocation21], 1 }
0x1e03   :  { %5193 = vsyncpa [#allocation24], 1 }
0x1e04   :  { %5194 = vsyncpa [#allocation27], 1 }
0x1e05   :  { %5195 = vsyncpa [#allocation30], 1 }
0x1e06   :  { %5196 = vsyncpa [#allocation4], 1 }

</bundles_post_ra>
